<compile_context>
chip_gen: v6e
topology: v6e:2x2x1
jax: 0.10.0
libtpu: 0.0.40
codegen_flags: <defaults>
</compile_context>

<pallas_src>
import jax
import jax.numpy as jnp
from jax.experimental import pallas as pl
from jax.experimental.pallas import tpu as pltpu


# ---------------------------------------------------------------------------
# Fused kernel
# ---------------------------------------------------------------------------

def _ge_layer_s1_kernel(xp_ref, xr_ref, w1_ref, b1_ref, wd_ref, bd_ref,
                        w2_ref, b2_ref, o_ref):
    """Fused GELayerS1 for one (image, row-tile) grid step.

    xp_ref: (1, H+4, W+4, Cin)   2px zero-padded image (whole image, VMEM-resident)
    xr_ref: (1, TH, W, Cin)      residual tile (rows [h*TH, (h+1)*TH))
    w1_ref: (9*Cin, Cmid)        conv1 weights, im2col layout, BN scale folded
    b1_ref: (1, Cmid)            conv1 folded BN bias
    wd_ref: (9, Cmid)            depthwise weights (tap-major), BN scale folded
    bd_ref: (1, Cmid)            dwconv folded BN bias
    w2_ref: (Cmid, Cout)         1x1 conv weights, BN scale folded
    b2_ref: (1, Cout)            conv2 folded BN bias
    o_ref : (1, TH, W, Cout)
    """
    _, TH, W, Cout = o_ref.shape
    Cin = xr_ref.shape[3]
    Cmid = b1_ref.shape[1]

    h = pl.program_id(1)
    n_h = pl.num_programs(1)
    row0 = pl.multiple_of(h * TH, TH)

    # (TH+4, W+4, Cin) halo window: padded rows [h*TH, h*TH + TH + 4).
    xin = xp_ref[:, pl.ds(row0, TH + 4), :, :][0]

    # ---- conv1: 3x3 dense conv via im2col -> single K=9*Cin MXU matmul -----
    # Computed with a 1-pixel halo (TH+2, W+2) so the depthwise conv below
    # needs no further HBM/pad traffic.
    taps = []
    for ky in range(3):
        for kx in range(3):
            taps.append(xin[ky:ky + TH + 2, kx:kx + W + 2, :])
    patches = jnp.concatenate(taps, axis=-1)               # (TH+2, W+2, 9*Cin)
    y1 = jnp.dot(patches.reshape((TH + 2) * (W + 2), 9 * Cin), w1_ref[...],
                 preferred_element_type=jnp.float32)
    y1 = jnp.maximum(y1 + b1_ref[...], 0.0)                # bias + ReLU
    y1 = y1.reshape(TH + 2, W + 2, Cmid)

    # The reference dwconv zero-pads conv1's HxW output, so halo positions that
    # fall OUTSIDE the image must be exactly zero (not conv1 evaluated past the
    # border, which would be relu(bias + partial conv) != 0).
    row_i = jax.lax.broadcasted_iota(jnp.int32, (TH + 2, W + 2, 1), 0)
    col_i = jax.lax.broadcasted_iota(jnp.int32, (TH + 2, W + 2, 1), 1)
    valid = jnp.logical_and(
        jnp.logical_and(jnp.logical_or(h > 0, row_i > 0),
                        jnp.logical_or(h < n_h - 1, row_i < TH + 1)),
        jnp.logical_and(col_i > 0, col_i < W + 1))
    y1 = jnp.where(valid, y1, 0.0)

    # ---- dwconv: 3x3 depthwise (VPU multiply-adds), bias + ReLU -------------
    wd = wd_ref[...]                                        # (9, Cmid)
    acc = jnp.zeros((TH, W, Cmid), jnp.float32)
    for ky in range(3):
        for kx in range(3):
            acc += y1[ky:ky + TH, kx:kx + W, :] * wd[3 * ky + kx]
    y2 = jnp.maximum(acc + bd_ref[...], 0.0)

    # ---- conv2 (1x1 matmul) + bias + residual + ReLU -------------------------
    z = jnp.dot(y2.reshape(TH * W, Cmid), w2_ref[...],
                preferred_element_type=jnp.float32)
    z = z + b2_ref[...] + xr_ref[0].reshape(TH * W, Cout)
    o_ref[...] = jnp.maximum(z, 0.0).reshape(1, TH, W, Cout)


# ---------------------------------------------------------------------------
# Wrapper
# ---------------------------------------------------------------------------

def ge_layer_s1(x_nchw, params, tile_h=8):
    """GELayerS1 forward. x_nchw: (N, Cin, H, W) float32, returns NCHW."""
    x = jnp.transpose(x_nchw, (0, 2, 3, 1)).astype(jnp.float32)   # -> NHWC
    N, H, W, Cin = x.shape
    Cmid = params["w1"].shape[-1]
    Cout = params["w2"].shape[-1]
    assert Cout == Cin, "GELayerS1 residual add requires out_chan == in_chan"

    # H row-tile: gives the pipeline / megacore enough grid steps and keeps the
    # Cmid-sized intermediates tile-sized in VMEM (fits v7x's 64 MiB as well).
    TH = tile_h if (H % tile_h == 0) else H
    HT = H // TH

    # Fold the BN scale into the conv weights at trace time; kernel only adds a
    # bias (saves one full-tile VPU multiply per stage).
    w1 = (params["w1"] * params["sb1"][0]).reshape(9 * Cin, Cmid)   # (ky,kx,ci)-major
    b1 = params["sb1"][1].reshape(1, Cmid)
    wd = (params["wd"] * params["sbd"][0]).reshape(9, Cmid)
    bd = params["sbd"][1].reshape(1, Cmid)
    w2 = params["w2"] * params["sb2"][0][None, :]
    b2 = params["sb2"][1].reshape(1, Cout)

    # Single 2px zero pad of the SMALL (Cin-channel) input supplies the halos
    # for both 3x3 convs; the 6x-sized intermediates are never padded nor
    # written to HBM.
    # TODO(synk): this pad could also be removed by zero-filling a VMEM halo
    # in-kernel, but it is a minor cost relative to the fused savings.
    xp = jnp.pad(x, ((0, 0), (2, 2), (2, 2), (0, 0)))

    flops = 2 * N * H * W * (9 * Cin * Cmid + 9 * Cmid + Cmid * Cout)
    bytes_accessed = 4 * (xp.size + x.size + N * H * W * Cout
                          + w1.size + wd.size + w2.size)

    out = pl.pallas_call(
        _ge_layer_s1_kernel,
        out_shape=jax.ShapeDtypeStruct((N, H, W, Cout), jnp.float32),
        grid=(N, HT),
        in_specs=[
            # whole padded image; index_map ignores h -> stays VMEM-resident
            pl.BlockSpec((1, H + 4, W + 4, Cin), lambda n, h: (n, 0, 0, 0)),
            # residual tile (matches output rows)
            pl.BlockSpec((1, TH, W, Cin), lambda n, h: (n, h, 0, 0)),
            pl.BlockSpec((9 * Cin, Cmid), lambda n, h: (0, 0)),
            pl.BlockSpec((1, Cmid), lambda n, h: (0, 0)),
            pl.BlockSpec((9, Cmid), lambda n, h: (0, 0)),
            pl.BlockSpec((1, Cmid), lambda n, h: (0, 0)),
            pl.BlockSpec((Cmid, Cout), lambda n, h: (0, 0)),
            pl.BlockSpec((1, Cout), lambda n, h: (0, 0)),
        ],
        out_specs=pl.BlockSpec((1, TH, W, Cout), lambda n, h: (n, h, 0, 0)),
        compiler_params=pltpu.CompilerParams(
            dimension_semantics=("parallel", "parallel"),
            vmem_limit_bytes=32 * 1024 * 1024),
        cost_estimate=pl.CostEstimate(flops=int(flops), transcendentals=0,
                                      bytes_accessed=int(bytes_accessed)),
    )(xp, x, w1, b1, wd, bd, w2, b2)

    return jnp.transpose(out, (0, 3, 1, 2))   # back to NCHW


# ---------------------------------------------------------------------------
# Deterministic parameter initialization (matches GELayerS1 shapes)
# ---------------------------------------------------------------------------

def init_params(key, in_chan, out_chan, exp_ratio=6, eps=1e-5):
    mid = in_chan * exp_ratio
    ks = jax.random.split(key, 16)

    def bn_fold(k0, k1, k2, k3, c):
        gamma = jax.random.uniform(k0, (c,), minval=0.5, maxval=1.5)
        beta = jax.random.normal(k1, (c,)) * 0.1
        mean = jax.random.normal(k2, (c,)) * 0.1
        var = jax.random.uniform(k3, (c,), minval=0.5, maxval=1.5)
        scale = gamma * jax.lax.rsqrt(var + eps)
        bias = beta - mean * scale
        return jnp.stack([scale, bias]).astype(jnp.float32)   # (2, c)

    params = {
        # conv1: nn.Conv2d(in, mid, 3) -> HWIO
        "w1": (jax.random.normal(ks[0], (3, 3, in_chan, mid)) * 0.1).astype(jnp.float32),
        "sb1": bn_fold(ks[3], ks[4], ks[5], ks[6], mid),
        # dwconv: nn.Conv2d(mid, mid, 3, groups=mid) -> depthwise HWIO (I=1)
        "wd": (jax.random.normal(ks[1], (3, 3, 1, mid)) * 0.1).astype(jnp.float32),
        "sbd": bn_fold(ks[7], ks[8], ks[9], ks[10], mid),
        # conv2: nn.Conv2d(mid, out, 1) -> (Cmid, Cout)
        "w2": (jax.random.normal(ks[2], (mid, out_chan)) * 0.1).astype(jnp.float32),
        "sb2": bn_fold(ks[11], ks[12], ks[13], ks[14], out_chan),
    }
    return params


# ---------------------------------------------------------------------------
# Pure-JAX reference for validation
# ---------------------------------------------------------------------------

def reference_forward(x_nchw, p):
    x = jnp.transpose(x_nchw, (0, 2, 3, 1)).astype(jnp.float32)
    dn = ("NHWC", "HWIO", "NHWC")
    y = jax.lax.conv_general_dilated(x, p["w1"], (1, 1), "SAME", dimension_numbers=dn)
    y = jnp.maximum(y * p["sb1"][0] + p["sb1"][1], 0.0)
    y = jax.lax.conv_general_dilated(y, p["wd"], (1, 1), "SAME", dimension_numbers=dn,
                                     feature_group_count=p["wd"].shape[-1])
    y = jnp.maximum(y * p["sbd"][0] + p["sbd"][1], 0.0)
    w2 = p["w2"].reshape(1, 1, *p["w2"].shape)
    y = jax.lax.conv_general_dilated(y, w2, (1, 1), "SAME", dimension_numbers=dn)
    y = y * p["sb2"][0] + p["sb2"][1]
    y = jnp.maximum(y + x, 0.0)
    return jnp.transpose(y, (0, 3, 1, 2))


# ---------------------------------------------------------------------------

if __name__ == "__main__":
    key = jax.random.PRNGKey(0)
    kx, kp = jax.random.split(key)

    N, Cin, H, W = 2, 8, 16, 16
    Cout = Cin                      # residual add requires out_chan == in_chan
    x = jax.random.normal(kx, (N, Cin, H, W), dtype=jnp.float32)
    params = init_params(kp, Cin, Cout, exp_ratio=6)

    out = ge_layer_s1(x, params)
    out = jax.block_until_ready(out)

    ref = jax.block_until_ready(reference_forward(x, params))
    err = float(jnp.max(jnp.abs(out - ref)))
    assert out.shape == (N, Cout, H, W)
    assert err < 2e-2, f"max abs error too large: {err}"

    print("KERNEL_OK")
</pallas_src>

<mosaic_0001>
module attributes {stable_mosaic.version = 11 : i64} {
  func.func @_ge_layer_s1_kernel(%arg0: i32, %arg1: i32, %arg2: memref<1x20x20x8xf32, #tpu.memory_space<vmem>>, %arg3: memref<1x8x16x8xf32, #tpu.memory_space<vmem>>, %arg4: memref<72x48xf32, #tpu.memory_space<vmem>>, %arg5: memref<1x48xf32, #tpu.memory_space<vmem>>, %arg6: memref<9x48xf32, #tpu.memory_space<vmem>>, %arg7: memref<1x48xf32, #tpu.memory_space<vmem>>, %arg8: memref<48x8xf32, #tpu.memory_space<vmem>>, %arg9: memref<1x8xf32, #tpu.memory_space<vmem>>, %arg10: memref<1x8x16x8xf32, #tpu.memory_space<vmem>>) attributes {dimension_semantics = [#tpu.dimension_semantics<parallel>, #tpu.dimension_semantics<parallel>], iteration_bounds = array<i64: 2, 2>, scalar_prefetch = 0 : i64, scratch_operands = 0 : i64, tpu.core_type = #tpu.core_type<tc>, window_params = [{transform_indices = @transform_0, window_bounds = array<i64: 1, 20, 20, 8>}, {transform_indices = @transform_1, window_bounds = array<i64: 1, 8, 16, 8>}, {pipeline_mode = #tpu.pipeline_mode<synchronous>, transform_indices = @transform_2, window_bounds = array<i64: 72, 48>}, {pipeline_mode = #tpu.pipeline_mode<synchronous>, transform_indices = @transform_3, window_bounds = array<i64: 1, 48>}, {pipeline_mode = #tpu.pipeline_mode<synchronous>, transform_indices = @transform_4, window_bounds = array<i64: 9, 48>}, {pipeline_mode = #tpu.pipeline_mode<synchronous>, transform_indices = @transform_5, window_bounds = array<i64: 1, 48>}, {pipeline_mode = #tpu.pipeline_mode<synchronous>, transform_indices = @transform_6, window_bounds = array<i64: 48, 8>}, {pipeline_mode = #tpu.pipeline_mode<synchronous>, transform_indices = @transform_7, window_bounds = array<i64: 1, 8>}, {transform_indices = @transform_8, window_bounds = array<i64: 1, 8, 16, 8>}]} {
    %c8_i32 = arith.constant 8 : i32
    %0 = arith.muli %arg1, %c8_i32 : i32
    %1 = tpu.assume_multiple %0, 8 : i32
    %c0 = arith.constant 0 : index
    %2 = arith.index_cast %1 : i32 to index
    %c0_0 = arith.constant 0 : index
    %c0_1 = arith.constant 0 : index
    %3 = vector.load %arg2[%c0, %2, %c0_0, %c0_1] : memref<1x20x20x8xf32, #tpu.memory_space<vmem>>, vector<1x12x20x8xf32>
    %4 = vector.shape_cast %3 : vector<1x12x20x8xf32> to vector<12x20x8xf32>
    %5 = vector.extract_strided_slice %4 {offsets = [0, 0, 0], sizes = [10, 18, 8], strides = [1, 1, 1]} : vector<12x20x8xf32> to vector<10x18x8xf32>
    %6 = vector.extract_strided_slice %4 {offsets = [0, 1, 0], sizes = [10, 18, 8], strides = [1, 1, 1]} : vector<12x20x8xf32> to vector<10x18x8xf32>
    %7 = vector.extract_strided_slice %4 {offsets = [0, 2, 0], sizes = [10, 18, 8], strides = [1, 1, 1]} : vector<12x20x8xf32> to vector<10x18x8xf32>
    %8 = vector.extract_strided_slice %4 {offsets = [1, 0, 0], sizes = [10, 18, 8], strides = [1, 1, 1]} : vector<12x20x8xf32> to vector<10x18x8xf32>
    %9 = vector.extract_strided_slice %4 {offsets = [1, 1, 0], sizes = [10, 18, 8], strides = [1, 1, 1]} : vector<12x20x8xf32> to vector<10x18x8xf32>
    %10 = vector.extract_strided_slice %4 {offsets = [1, 2, 0], sizes = [10, 18, 8], strides = [1, 1, 1]} : vector<12x20x8xf32> to vector<10x18x8xf32>
    %11 = vector.extract_strided_slice %4 {offsets = [2, 0, 0], sizes = [10, 18, 8], strides = [1, 1, 1]} : vector<12x20x8xf32> to vector<10x18x8xf32>
    %12 = vector.extract_strided_slice %4 {offsets = [2, 1, 0], sizes = [10, 18, 8], strides = [1, 1, 1]} : vector<12x20x8xf32> to vector<10x18x8xf32>
    %13 = vector.extract_strided_slice %4 {offsets = [2, 2, 0], sizes = [10, 18, 8], strides = [1, 1, 1]} : vector<12x20x8xf32> to vector<10x18x8xf32>
    %14 = tpu.concatenate %5, %6, %7, %8, %9, %10, %11, %12, %13 in 2 : vector<10x18x8xf32>, vector<10x18x8xf32>, vector<10x18x8xf32>, vector<10x18x8xf32>, vector<10x18x8xf32>, vector<10x18x8xf32>, vector<10x18x8xf32>, vector<10x18x8xf32>, vector<10x18x8xf32> -> vector<10x18x72xf32>
    %15 = vector.shape_cast %14 : vector<10x18x72xf32> to vector<180x72xf32>
    %c0_2 = arith.constant 0 : index
    %c0_3 = arith.constant 0 : index
    %16 = vector.load %arg4[%c0_2, %c0_3] : memref<72x48xf32, #tpu.memory_space<vmem>>, vector<72x48xf32>
    %cst = arith.constant dense<0.000000e+00> : vector<180x48xf32>
    %17 = tpu.matmul %15, %16, %cst {dimension_numbers = #tpu.dot_dimension_numbers<[1], [0], [0], [1], [0, 0, 1, 1], [], []>} : vector<180x72xf32>, vector<72x48xf32>, vector<180x48xf32> -> vector<180x48xf32>
    %c0_4 = arith.constant 0 : index
    %c0_5 = arith.constant 0 : index
    %18 = vector.load %arg5[%c0_4, %c0_5] : memref<1x48xf32, #tpu.memory_space<vmem>>, vector<1x48xf32>
    %19 = vector.broadcast %18 : vector<1x48xf32> to vector<180x48xf32>
    %20 = arith.addf %17, %19 : vector<180x48xf32>
    %cst_6 = arith.constant 0.000000e+00 : f32
    %21 = vector.broadcast %cst_6 : f32 to vector<180x48xf32>
    %22 = arith.maximumf %20, %21 : vector<180x48xf32>
    %23 = vector.shape_cast %22 : vector<180x48xf32> to vector<10x18x48xf32>
    %24 = tpu.iota {dimensions = array<i32: 0>} : vector<10x18x1xi32>
    %25 = tpu.iota {dimensions = array<i32: 1>} : vector<10x18x1xi32>
    %c0_i32 = arith.constant 0 : i32
    %26 = arith.cmpi sgt, %arg1, %c0_i32 : i32
    %c0_i32_7 = arith.constant 0 : i32
    %27 = vector.broadcast %c0_i32_7 : i32 to vector<10x18x1xi32>
    %28 = arith.cmpi sgt, %24, %27 : vector<10x18x1xi32>
    %29 = vector.broadcast %26 : i1 to vector<10x18x1xi1>
    %30 = arith.ori %29, %28 : vector<10x18x1xi1>
    %c1_i32 = arith.constant 1 : i32
    %31 = arith.cmpi slt, %arg1, %c1_i32 : i32
    %c9_i32 = arith.constant 9 : i32
    %32 = vector.broadcast %c9_i32 : i32 to vector<10x18x1xi32>
    %33 = arith.cmpi slt, %24, %32 : vector<10x18x1xi32>
    %34 = vector.broadcast %31 : i1 to vector<10x18x1xi1>
    %35 = arith.ori %34, %33 : vector<10x18x1xi1>
    %36 = arith.andi %30, %35 : vector<10x18x1xi1>
    %c0_i32_8 = arith.constant 0 : i32
    %37 = vector.broadcast %c0_i32_8 : i32 to vector<10x18x1xi32>
    %38 = arith.cmpi sgt, %25, %37 : vector<10x18x1xi32>
    %c17_i32 = arith.constant 17 : i32
    %39 = vector.broadcast %c17_i32 : i32 to vector<10x18x1xi32>
    %40 = arith.cmpi slt, %25, %39 : vector<10x18x1xi32>
    %41 = arith.andi %38, %40 : vector<10x18x1xi1>
    %42 = arith.andi %36, %41 : vector<10x18x1xi1>
    %cst_9 = arith.constant 0.000000e+00 : f32
    %43 = vector.shape_cast %42 : vector<10x18x1xi1> to vector<10x18x1xi1>
    %44 = vector.broadcast %43 : vector<10x18x1xi1> to vector<10x18x48xi1>
    %45 = vector.broadcast %cst_9 : f32 to vector<10x18x48xf32>
    %46 = arith.select %44, %23, %45 : vector<10x18x48xi1>, vector<10x18x48xf32>
    %c0_10 = arith.constant 0 : index
    %c0_11 = arith.constant 0 : index
    %47 = vector.load %arg6[%c0_10, %c0_11] : memref<9x48xf32, #tpu.memory_space<vmem>>, vector<9x48xf32>
    %cst_12 = arith.constant 0.000000e+00 : f32
    %48 = vector.broadcast %cst_12 : f32 to vector<8x16x48xf32>
    %49 = vector.extract_strided_slice %46 {offsets = [0, 0, 0], sizes = [8, 16, 48], strides = [1, 1, 1]} : vector<10x18x48xf32> to vector<8x16x48xf32>
    %50 = vector.extract_strided_slice %47 {offsets = [0, 0], sizes = [1, 48], strides = [1, 1]} : vector<9x48xf32> to vector<1x48xf32>
    %51 = vector.shape_cast %50 : vector<1x48xf32> to vector<48xf32>
    %52 = vector.shape_cast %51 : vector<48xf32> to vector<1x1x48xf32>
    %53 = vector.broadcast %52 : vector<1x1x48xf32> to vector<8x16x48xf32>
    %54 = arith.mulf %49, %53 : vector<8x16x48xf32>
    %55 = arith.addf %48, %54 : vector<8x16x48xf32>
    %56 = vector.extract_strided_slice %46 {offsets = [0, 1, 0], sizes = [8, 16, 48], strides = [1, 1, 1]} : vector<10x18x48xf32> to vector<8x16x48xf32>
    %57 = vector.extract_strided_slice %47 {offsets = [1, 0], sizes = [1, 48], strides = [1, 1]} : vector<9x48xf32> to vector<1x48xf32>
    %58 = vector.shape_cast %57 : vector<1x48xf32> to vector<48xf32>
    %59 = vector.shape_cast %58 : vector<48xf32> to vector<1x1x48xf32>
    %60 = vector.broadcast %59 : vector<1x1x48xf32> to vector<8x16x48xf32>
    %61 = arith.mulf %56, %60 : vector<8x16x48xf32>
    %62 = arith.addf %55, %61 : vector<8x16x48xf32>
    %63 = vector.extract_strided_slice %46 {offsets = [0, 2, 0], sizes = [8, 16, 48], strides = [1, 1, 1]} : vector<10x18x48xf32> to vector<8x16x48xf32>
    %64 = vector.extract_strided_slice %47 {offsets = [2, 0], sizes = [1, 48], strides = [1, 1]} : vector<9x48xf32> to vector<1x48xf32>
    %65 = vector.shape_cast %64 : vector<1x48xf32> to vector<48xf32>
    %66 = vector.shape_cast %65 : vector<48xf32> to vector<1x1x48xf32>
    %67 = vector.broadcast %66 : vector<1x1x48xf32> to vector<8x16x48xf32>
    %68 = arith.mulf %63, %67 : vector<8x16x48xf32>
    %69 = arith.addf %62, %68 : vector<8x16x48xf32>
    %70 = vector.extract_strided_slice %46 {offsets = [1, 0, 0], sizes = [8, 16, 48], strides = [1, 1, 1]} : vector<10x18x48xf32> to vector<8x16x48xf32>
    %71 = vector.extract_strided_slice %47 {offsets = [3, 0], sizes = [1, 48], strides = [1, 1]} : vector<9x48xf32> to vector<1x48xf32>
    %72 = vector.shape_cast %71 : vector<1x48xf32> to vector<48xf32>
    %73 = vector.shape_cast %72 : vector<48xf32> to vector<1x1x48xf32>
    %74 = vector.broadcast %73 : vector<1x1x48xf32> to vector<8x16x48xf32>
    %75 = arith.mulf %70, %74 : vector<8x16x48xf32>
    %76 = arith.addf %69, %75 : vector<8x16x48xf32>
    %77 = vector.extract_strided_slice %46 {offsets = [1, 1, 0], sizes = [8, 16, 48], strides = [1, 1, 1]} : vector<10x18x48xf32> to vector<8x16x48xf32>
    %78 = vector.extract_strided_slice %47 {offsets = [4, 0], sizes = [1, 48], strides = [1, 1]} : vector<9x48xf32> to vector<1x48xf32>
    %79 = vector.shape_cast %78 : vector<1x48xf32> to vector<48xf32>
    %80 = vector.shape_cast %79 : vector<48xf32> to vector<1x1x48xf32>
    %81 = vector.broadcast %80 : vector<1x1x48xf32> to vector<8x16x48xf32>
    %82 = arith.mulf %77, %81 : vector<8x16x48xf32>
    %83 = arith.addf %76, %82 : vector<8x16x48xf32>
    %84 = vector.extract_strided_slice %46 {offsets = [1, 2, 0], sizes = [8, 16, 48], strides = [1, 1, 1]} : vector<10x18x48xf32> to vector<8x16x48xf32>
    %85 = vector.extract_strided_slice %47 {offsets = [5, 0], sizes = [1, 48], strides = [1, 1]} : vector<9x48xf32> to vector<1x48xf32>
    %86 = vector.shape_cast %85 : vector<1x48xf32> to vector<48xf32>
    %87 = vector.shape_cast %86 : vector<48xf32> to vector<1x1x48xf32>
    %88 = vector.broadcast %87 : vector<1x1x48xf32> to vector<8x16x48xf32>
    %89 = arith.mulf %84, %88 : vector<8x16x48xf32>
    %90 = arith.addf %83, %89 : vector<8x16x48xf32>
    %91 = vector.extract_strided_slice %46 {offsets = [2, 0, 0], sizes = [8, 16, 48], strides = [1, 1, 1]} : vector<10x18x48xf32> to vector<8x16x48xf32>
    %92 = vector.extract_strided_slice %47 {offsets = [6, 0], sizes = [1, 48], strides = [1, 1]} : vector<9x48xf32> to vector<1x48xf32>
    %93 = vector.shape_cast %92 : vector<1x48xf32> to vector<48xf32>
    %94 = vector.shape_cast %93 : vector<48xf32> to vector<1x1x48xf32>
    %95 = vector.broadcast %94 : vector<1x1x48xf32> to vector<8x16x48xf32>
    %96 = arith.mulf %91, %95 : vector<8x16x48xf32>
    %97 = arith.addf %90, %96 : vector<8x16x48xf32>
    %98 = vector.extract_strided_slice %46 {offsets = [2, 1, 0], sizes = [8, 16, 48], strides = [1, 1, 1]} : vector<10x18x48xf32> to vector<8x16x48xf32>
    %99 = vector.extract_strided_slice %47 {offsets = [7, 0], sizes = [1, 48], strides = [1, 1]} : vector<9x48xf32> to vector<1x48xf32>
    %100 = vector.shape_cast %99 : vector<1x48xf32> to vector<48xf32>
    %101 = vector.shape_cast %100 : vector<48xf32> to vector<1x1x48xf32>
    %102 = vector.broadcast %101 : vector<1x1x48xf32> to vector<8x16x48xf32>
    %103 = arith.mulf %98, %102 : vector<8x16x48xf32>
    %104 = arith.addf %97, %103 : vector<8x16x48xf32>
    %105 = vector.extract_strided_slice %46 {offsets = [2, 2, 0], sizes = [8, 16, 48], strides = [1, 1, 1]} : vector<10x18x48xf32> to vector<8x16x48xf32>
    %106 = vector.extract_strided_slice %47 {offsets = [8, 0], sizes = [1, 48], strides = [1, 1]} : vector<9x48xf32> to vector<1x48xf32>
    %107 = vector.shape_cast %106 : vector<1x48xf32> to vector<48xf32>
    %108 = vector.shape_cast %107 : vector<48xf32> to vector<1x1x48xf32>
    %109 = vector.broadcast %108 : vector<1x1x48xf32> to vector<8x16x48xf32>
    %110 = arith.mulf %105, %109 : vector<8x16x48xf32>
    %111 = arith.addf %104, %110 : vector<8x16x48xf32>
    %c0_13 = arith.constant 0 : index
    %c0_14 = arith.constant 0 : index
    %112 = vector.load %arg7[%c0_13, %c0_14] : memref<1x48xf32, #tpu.memory_space<vmem>>, vector<1x48xf32>
    %113 = vector.shape_cast %112 : vector<1x48xf32> to vector<1x1x48xf32>
    %114 = vector.broadcast %113 : vector<1x1x48xf32> to vector<8x16x48xf32>
    %115 = arith.addf %111, %114 : vector<8x16x48xf32>
    %cst_15 = arith.constant 0.000000e+00 : f32
    %116 = vector.broadcast %cst_15 : f32 to vector<8x16x48xf32>
    %117 = arith.maximumf %115, %116 : vector<8x16x48xf32>
    %118 = vector.shape_cast %117 : vector<8x16x48xf32> to vector<128x48xf32>
    %c0_16 = arith.constant 0 : index
    %c0_17 = arith.constant 0 : index
    %119 = vector.load %arg8[%c0_16, %c0_17] : memref<48x8xf32, #tpu.memory_space<vmem>>, vector<48x8xf32>
    %cst_18 = arith.constant dense<0.000000e+00> : vector<128x8xf32>
    %120 = tpu.matmul %118, %119, %cst_18 {dimension_numbers = #tpu.dot_dimension_numbers<[1], [0], [0], [1], [0, 0, 1, 1], [], []>} : vector<128x48xf32>, vector<48x8xf32>, vector<128x8xf32> -> vector<128x8xf32>
    %c0_19 = arith.constant 0 : index
    %c0_20 = arith.constant 0 : index
    %121 = vector.load %arg9[%c0_19, %c0_20] : memref<1x8xf32, #tpu.memory_space<vmem>>, vector<1x8xf32>
    %122 = vector.broadcast %121 : vector<1x8xf32> to vector<128x8xf32>
    %123 = arith.addf %120, %122 : vector<128x8xf32>
    %c0_21 = arith.constant 0 : index
    %c0_22 = arith.constant 0 : index
    %c0_23 = arith.constant 0 : index
    %c0_24 = arith.constant 0 : index
    %124 = vector.load %arg3[%c0_21, %c0_22, %c0_23, %c0_24] : memref<1x8x16x8xf32, #tpu.memory_space<vmem>>, vector<1x8x16x8xf32>
    %125 = vector.shape_cast %124 : vector<1x8x16x8xf32> to vector<8x16x8xf32>
    %126 = vector.shape_cast %125 : vector<8x16x8xf32> to vector<128x8xf32>
    %127 = arith.addf %123, %126 : vector<128x8xf32>
    %cst_25 = arith.constant 0.000000e+00 : f32
    %128 = vector.broadcast %cst_25 : f32 to vector<128x8xf32>
    %129 = arith.maximumf %127, %128 : vector<128x8xf32>
    %130 = vector.shape_cast %129 : vector<128x8xf32> to vector<1x8x16x8xf32>
    %c0_26 = arith.constant 0 : index
    %c0_27 = arith.constant 0 : index
    %c0_28 = arith.constant 0 : index
    %c0_29 = arith.constant 0 : index
    %131 = vector.load %arg10[%c0_26, %c0_27, %c0_28, %c0_29] : memref<1x8x16x8xf32, #tpu.memory_space<vmem>>, vector<1x8x16x8xf32>
    tpu.vector_store %arg10[%c0_26, %c0_27, %c0_28, %c0_29], %130 {strides = array<i32>} : memref<1x8x16x8xf32, #tpu.memory_space<vmem>>, vector<1x8x16x8xf32>,
    return
  }
  func.func @transform_0(%arg0: i32, %arg1: i32) -> (i32, i32, i32, i32) {
    %c0_i32 = arith.constant 0 : i32
    %c0_i32_0 = arith.constant 0 : i32
    %c0_i32_1 = arith.constant 0 : i32
    %c0_i32_2 = arith.constant 0 : i32
    return %arg0, %c0_i32, %c0_i32_0, %c0_i32_1 : i32, i32, i32, i32
  }
  func.func @transform_1(%arg0: i32, %arg1: i32) -> (i32, i32, i32, i32) {
    %c0_i32 = arith.constant 0 : i32
    %c0_i32_0 = arith.constant 0 : i32
    %c0_i32_1 = arith.constant 0 : i32
    return %arg0, %arg1, %c0_i32, %c0_i32_0 : i32, i32, i32, i32
  }
  func.func @transform_2(%arg0: i32, %arg1: i32) -> (i32, i32) {
    %c0_i32 = arith.constant 0 : i32
    %c0_i32_0 = arith.constant 0 : i32
    %c0_i32_1 = arith.constant 0 : i32
    return %c0_i32, %c0_i32_0 : i32, i32
  }
  func.func @transform_3(%arg0: i32, %arg1: i32) -> (i32, i32) {
    %c0_i32 = arith.constant 0 : i32
    %c0_i32_0 = arith.constant 0 : i32
    %c0_i32_1 = arith.constant 0 : i32
    return %c0_i32, %c0_i32_0 : i32, i32
  }
  func.func @transform_4(%arg0: i32, %arg1: i32) -> (i32, i32) {
    %c0_i32 = arith.constant 0 : i32
    %c0_i32_0 = arith.constant 0 : i32
    %c0_i32_1 = arith.constant 0 : i32
    return %c0_i32, %c0_i32_0 : i32, i32
  }
  func.func @transform_5(%arg0: i32, %arg1: i32) -> (i32, i32) {
    %c0_i32 = arith.constant 0 : i32
    %c0_i32_0 = arith.constant 0 : i32
    %c0_i32_1 = arith.constant 0 : i32
    return %c0_i32, %c0_i32_0 : i32, i32
  }
  func.func @transform_6(%arg0: i32, %arg1: i32) -> (i32, i32) {
    %c0_i32 = arith.constant 0 : i32
    %c0_i32_0 = arith.constant 0 : i32
    %c0_i32_1 = arith.constant 0 : i32
    return %c0_i32, %c0_i32_0 : i32, i32
  }
  func.func @transform_7(%arg0: i32, %arg1: i32) -> (i32, i32) {
    %c0_i32 = arith.constant 0 : i32
    %c0_i32_0 = arith.constant 0 : i32
    %c0_i32_1 = arith.constant 0 : i32
    return %c0_i32, %c0_i32_0 : i32, i32
  }
  func.func @transform_8(%arg0: i32, %arg1: i32) -> (i32, i32, i32, i32) {
    %c0_i32 = arith.constant 0 : i32
    %c0_i32_0 = arith.constant 0 : i32
    %c0_i32_1 = arith.constant 0 : i32
    return %arg0, %arg1, %c0_i32, %c0_i32_0 : i32, i32, i32, i32
  }
}

</mosaic_0001>

<bundles_post_ra>
// kernel: tpu_custom_call.1
= control target key start
LH: loop header
LB: loop body
LE: loop exit
PB: predicated region body
PF: predicated region fallthrough
CT: control target
= control target key end

     0   :  { %s5246_s27 = smov 0   ;;  %s5248_s28 = smov 0   ;;  %s8200_s0 = inlined_call_operand.vmem [shape: f32[2,20,20,8], index: 0, kind: input, shape index: {}]   ;;  %s8201_s1 = inlined_call_operand.vmem [shape: f32[2,16,16,8], index: 1, kind: input, shape index: {}]   ;;  %s8202_s2 = inlined_call_operand.vmem [shape: f32[72,48], index: 2, kind: input, shape index: {}]   ;;  %s8203_s3 = inlined_call_operand.vmem [shape: f32[1,48], index: 3, kind: input, shape index: {}]   ;;  %s8204_s4 = inlined_call_operand.vmem [shape: f32[9,48], index: 4, kind: input, shape index: {}]   ;;  %s8205_s5 = inlined_call_operand.vmem [shape: f32[1,48], index: 5, kind: input, shape index: {}]   ;;  %s8206_s6 = inlined_call_operand.vmem [shape: f32[48,8], index: 6, kind: input, shape index: {}]   ;;  %s8207_s7 = inlined_call_operand.vmem [shape: f32[1,8], index: 7, kind: input, shape index: {}]   ;;  %s8208_s8 = inlined_call_operand.vmem [shape: f32[2,16,16,8], index: 8, kind: output, shape index: {}]  }
   0x1   :  { %s5250_s29 = smov 0   ;;  %s5252_s30 = smov 0  }
   0x2   :  { %s5254_s9 = smov 0  }
   0x3 LB: > { %s27_s10 = sadd.s32 1, %s5180_s29  ;;  %s30_s11 = sadd.s32 1, %s5184_s30  ;;  %s5188_s9 = sphi %s5254_s9, %s18_s9   ;;  %s5184_s30 = sphi %s5252_s30, %s8289_s30   ;;  %s5180_s29 = sphi %s5250_s29, %s8288_s29   ;;  %s5176_s28 = sphi %s5248_s28, %s8287_s28   ;;  %s5172_s27 = sphi %s5246_s27, %s8286_s27  }
   0x4   : > { %p28_p0 = scmp.ge.s32.totalorder %s27_s10, 2  ;;  %p4826_p1 = scmp.ge.s32.totalorder %s5188_s9, 1 }
   0x5   : > { %p294_p2 = scmp.lt.s32.totalorder %s5188_s9, 5 }
   0x6   : > { %s8291_s10 = smov (%p28_p0, %s27_s10), 0  ;;  %s8293_s11 = smov (!%p28_p0, %s30_s11), %s5184_s30 }
   0x7   : > { %p295_p3 = pnand %p4826_p1, %p294_p2  ;;  %p32_p4 = scmp.ge.s32.totalorder %s8293_s11, 2 }
   0x9   : > { %s8295_s11 = smov (%p32_p4, %s8293_s11), 0  ;;  %298 = sbr.rel (%p295_p3) target bundleno = 1046 (0x416), region = 52 }
   0xe   : > { %p343_p5 = scmp.lt.s32.totalorder %s5176_s28, 1  ;;  %s4837_s12 = smul.u32 192, %s5172_s27  ;;  %vm439_vm0 = vcmask 1046528   ;;  %vm580_vm1 = vcmask 1045504   ;;  %v1983_v24 = vld [vmem:[%s8202_s2 + $0x40] sm:$0xff]  ;;  %v8209_v25 = vmov 0.0  }
   0xf   : > { %s5190_s18 = smov 24   ;;  %s5191_s19 = smov 8   ;;  %4937 = vmatprep.subr.mxu0 %v8209_v25  ;;  %v1982_v26 = vld [vmem:[%s8202_s2 + $0x38] sm:$0xff]  ;;  %v1981_v32 = vld [vmem:[%s8202_s2 + $0x30] sm:$0xff]  ;;  %5060 = vmatprep.subr.mxu1 %v8209_v25  ;;  %v1980_v33 = vld [vmem:[%s8202_s2 + $0x28] sm:$0xff]  ;;  %vm5199_vm2 = vmmov 0  }
  0x10   : > { %s8297_s28 = smov (!%p343_p5, %s5176_s28), 1  ;;  %s5192_s20 = smov 48   ;;  %4938 = vmatpush3.msra.mxu0 %v1983_v24  ;;  %5069 = vmatpush3.msra.mxu1 %v1983_v24  ;;  %v1979_v36 = vld [vmem:[%s8202_s2 + $0x20] sm:$0xff]  ;;  %v1978_v38 = vld [vmem:[%s8202_s2 + $0x18] sm:$0xff]  ;;  %v1977_v42 = vld [vmem:[%s8202_s2 + $0x10] sm:$0xff]  ;;  %vm1287_vm3 = vcmask 64512   ;;  %v1569_v24 = vlaneseq }
  0x11   : > { %s5078_s13 = smul.u32 480, %s8297_s28  ;;  %s5193_s21 = smov 16   ;;  %4939 = vmatprep.subr.mxu0 %v8209_v25  ;;  %5061 = vmatprep.subr.mxu1 %v8209_v25  ;;  %v1976_v43 = vld [vmem:[%s8202_s2 + $0x8] sm:$0xff]  ;;  %v1975_v47 = vld [vmem:[%s8202_s2] sm:$0xff]  ;;  %vm1318_vm4 = vcmask 130048   ;;  %vm1349_vm5 = vcmask 195584  }
  0x12   : > { %s5194_s22 = smov 32   ;;  %4940 = vmatpush3.msra.mxu0 %v1982_v26  ;;  %s5197_s23 = smov 56   ;;  %5070 = vmatpush3.msra.mxu1 %v1982_v26  ;;  %vm1380_vm6 = vcmask 261120   ;;  %vm1411_vm7 = vcmask 326656   ;;  %vm1442_vm8 = vcmask 392192   ;;  %vm1473_vm9 = vcmask 457728  }
  0x13   : > { %s347_s16 = scalar_lea.vmem %s8200_s0, %s5078_s13  ;;  %4941 = vmatprep.subr.mxu0 %v8209_v25  ;;  %s5198_s14 = smov 64   ;;  %4955 = vmatprep.mubr.msk.f32.mxu0 %vm5199_vm2, %v8209_v25  ;;  %vm1504_vm10 = vcmask 523264   ;;  %vm2373_vm11 = vcmask 588800  }
  0x14   : > { %s5285_s17 = scalar_lea.vmem %s347_s16, %s4837_s12  ;;  %s5196_s12 = smov 40   ;;  %4942 = vmatpush3.msra.mxu0 %v1981_v32  ;;  %5062 = vmatprep.subr.mxu1 %v8209_v25 }
  0x15   : > { %v5288_v0 = vld [vmem:[%s5285_s17 + $0x18] sm:$0xff]  ;;  %v5291_v1 = vld [vmem:[%s5285_s17] sm:$0xff]  ;;  %v5294_v2 = vld [vmem:[%s5285_s17 + $0x8] sm:$0xff]  ;;  %4943 = vmatprep.subr.mxu0 %v8209_v25  ;;  %5071 = vmatpush3.msra.mxu1 %v1981_v32  ;;  %v5605_v32 = vshrl.u32 %v1569_v24, 7  ;;  %p3032_p6 = scmp.gt.s32.totalorder %s5172_s27, 0  ;;  %p3036_p8 = scmp.lt.s32.totalorder %s5172_s27, 1 }
  0x16   : > { %724 = vrot.lane.b32.xlu1 %v5288_v0, %s5190_s18  ;;  %v440_v3 = vrot.slane %v5291_v1, 1  ;;  %v441_v4 = vrot.slane %v5294_v2, 1  ;;  %v581_v5 = vrot.slane %v5291_v1, 2  ;;  %v582_v6 = vrot.slane %v5294_v2, 2  ;;  %v5303_v7 = vld [vmem:[%s5285_s17 + $0x20] sm:$0xff]  ;;  %v5306_v8 = vld [vmem:[%s5285_s17 + $0x30] sm:$0xff]  ;;  %4944 = vmatpush3.msra.mxu0 %v1980_v33 }
  0x17   : > { %v445_v9 = vrot.slane %v5288_v0, 1  ;;  %v446_v10 = vrot.slane %v5303_v7, 1  ;;  %v5311_v11 = vld [vmem:[%s5285_s17 + $0x10] sm:$0xf]  ;;  %v586_v16 = vrot.slane %v5288_v0, 2  ;;  %v587_v17 = vrot.slane %v5303_v7, 2  ;;  %4945 = vmatprep.subr.mxu0 %v8209_v25  ;;  %5063 = vmatprep.subr.mxu1 %v8209_v25 }
  0x18   : > { %v442_v12 = vsel %vm439_vm0, %v440_v3, %v441_v4  ;;  %v583_v13 = vsel %vm580_vm1, %v581_v5, %v582_v6  ;;  %v443_v14 = vrot.slane %v5311_v11, 1  ;;  %v5325_v18 = vld [vmem:[%s5285_s17 + $0x38] sm:$0xff]  ;;  %v584_v20 = vrot.slane %v5311_v11, 2  ;;  %v5360_v31 = vld [vmem:[%s5285_s17 + $0x28] sm:$0xf]  ;;  %4946 = vmatpush3.msra.mxu0 %v1979_v36  ;;  %5072 = vmatpush3.msra.mxu1 %v1980_v33  ;;  %v5474_v50 = vld [vmem:[%s5285_s17 + $0x50] sm:$0xff] }
  0x19   : > { %490 = vrot.lane.b32.xlu0 %v442_v12, %s5191_s19  ;;  %v5320_v15 = vsel %vm439_vm0, %v445_v9, %v446_v10  ;;  %v5337_v21 = vsel %vm580_vm1, %v586_v16, %v587_v17  ;;  %v450_v22 = vrot.slane %v5306_v8, 1  ;;  %v451_v23 = vrot.slane %v5325_v18, 1  ;;  %v5386_v37 = vld [vmem:[%s5285_s17 + $0x40] sm:$0xf]  ;;  %4947 = vmatprep.subr.mxu0 %v8209_v25  ;;  %v5467_v49 = vld [vmem:[%s5285_s17 + $0x48] sm:$0xff] }
  0x1a   : > { %1007 = vrot.lane.b32.xlu1 %v5306_v8, %s5192_s20  ;;  %v444_v19 = vsel %vm439_vm0, %v441_v4, %v443_v14  ;;  %v585_v27 = vsel %vm580_vm1, %v582_v6, %v584_v20  ;;  %v591_v29 = vrot.slane %v5306_v8, 2  ;;  %v592_v30 = vrot.slane %v5325_v18, 2  ;;  %4948 = vmatpush3.msra.mxu0 %v1978_v38  ;;  %v5507_v57 = vld [vmem:[%s5285_s17 + $0x58] sm:$0xf]  ;;  %v5542_v62 = vld [vmem:[%s5285_s17 + $0x60] sm:$0xff]  ;;  %v5549_v63 = vld [vmem:[%s5285_s17 + $0x68] sm:$0xff] }
  0x1b   : > { %v5355_v28 = vsel %vm439_vm0, %v450_v22, %v451_v23  ;;  %v5375_v34 = vrot.slane %v5360_v31, 1  ;;  %v5399_v40 = vrot.slane %v5360_v31, 2  ;;  %v5402_v41 = vrot.slane %v5386_v37, 1  ;;  %4949 = vmatprep.subr.mxu0 %v8209_v25  ;;  %5003 = vmatprep.mubr.msk.f32.mxu1 %vm5199_vm2, %v8209_v25  ;;  %v5582_v16 = vld [vmem:[%s5285_s17 + $0x70] sm:$0xf] }
  0x1c   : > { %v5378_v35 = vsel %vm580_vm1, %v591_v29, %v592_v30  ;;  %4950 = vmatpush3.msra.mxu0 %v1977_v42  ;;  %v5427_v46 = vrot.slane %v5386_v37, 2  ;;  %5064 = vmatprep.subr.mxu1 %v8209_v25  ;;  %v455_v51 = vrot.slane %v5467_v49, 1  ;;  %v456_v52 = vrot.slane %v5474_v50, 1  ;;  %s3033_s24 = scalar_select %p3032_p6, 1, 0 }
  0x1d   : > { %631 = vrot.lane.b32.xlu0 %v583_v13, %s5193_s21  ;;  %v449_v39 = vsel %vm439_vm0, %v446_v10, %v5375_v34  ;;  %v590_v44 = vsel %vm580_vm1, %v587_v17, %v5399_v40  ;;  %v5424_v45 = vsel %vm439_vm0, %v451_v23, %v5402_v41  ;;  %4951 = vmatprep.subr.mxu0 %v8209_v25  ;;  %v596_v53 = vrot.slane %v5467_v49, 2 }
  0x1e   : > { %819 = vrot.lane.b32.xlu1 %v5320_v15, %s5194_s22  ;;  %4952 = vmatpush3.msra.mxu0 %v1976_v43  ;;  %v595_v48 = vsel %vm580_vm1, %v592_v30, %v5427_v46  ;;  %v597_v54 = vrot.slane %v5474_v50, 2  ;;  %v457_v55 = vsel %vm439_vm0, %v455_v51, %v456_v52  ;;  %v5514_v58 = vrot.slane %v5507_v57, 1 }
  0x1f   : > { %4953 = vmatprep.subr.mxu0 %v8209_v25  ;;  %5073 = vmatpush3.msra.mxu1 %v1979_v36  ;;  %v5517_v59 = vrot.slane %v5507_v57, 2  ;;  %v460_v3 = vrot.slane %v5542_v62, 1  ;;  %v461_v4 = vrot.slane %v5549_v63, 1  ;;  %v601_v5 = vrot.slane %v5542_v62, 2 }
  0x20   : > { %4954 = vmatpush3.msra.mxu0 %v1975_v47  ;;  %5065 = vmatprep.subr.mxu1 %v8209_v25  ;;  %v5490_v56 = vsel %vm580_vm1, %v596_v53, %v597_v54  ;;  %v5525_v60 = vsel %vm439_vm0, %v456_v52, %v5514_v58  ;;  %v602_v6 = vrot.slane %v5549_v63, 2  ;;  %v5200_v22 = vmov 1983009808  }
  0x21   : > { %492 = vrot.lane.b32.xlu0 %v444_v19, %s5191_s19  ;;  %5074 = vmatpush3.msra.mxu1 %v1978_v38  ;;  %v5529_v61 = vsel %vm580_vm1, %v597_v54, %v5517_v59  ;;  %v5564_v9 = vsel %vm439_vm0, %v460_v3, %v461_v4  ;;  %v1567_v23 = vunpack.c.l.s4 %v5200_v22  ;;  %vm3040_vm13 = vcmp.gt.s32.totalorder %v5605_v32, 0 }
  0x22   : > { %914 = vrot.lane.b32.xlu1 %v5337_v21, %s5196_s12  ;;  %5066 = vmatprep.subr.mxu1 %v8209_v25  ;;  %v5567_v10 = vsel %vm580_vm1, %v601_v5, %v602_v6 }
  0x23   : > { %5075 = vmatpush3.msra.mxu1 %v1977_v42  ;;  %v1568_v30 = vunpack.c.0.s8 %v1567_v23 }
  0x24   : > { %5067 = vmatprep.subr.mxu1 %v8209_v25 }
  0x25   : > { %633 = vrot.lane.b32.xlu0 %v585_v27, %s5193_s21  ;;  %5076 = vmatpush3.msra.mxu1 %v1976_v43  ;;  %v5594_v27 = vrot.slane %v5582_v16, 2 }
  0x26   : > { %1102 = vrot.lane.b32.xlu1 %v5355_v28, %s5197_s23  ;;  %5068 = vmatprep.subr.mxu1 %v8209_v25 }
  0x27   : > { %5077 = vmatpush3.msra.mxu1 %v1975_v47 }
  0x29   : > { %726 = vrot.lane.b32.xlu0 %v5303_v7, %s5190_s18 }
  0x2a   : > { %1197 = vrot.lane.b32.xlu1 %v5378_v35, %s5198_s14 }
  0x2d   : > { %821 = vrot.lane.b32.xlu0 %v449_v39, %s5194_s22 }
  0x2e   : > { %1009 = vrot.lane.b32.xlu1 %v5325_v18, %s5192_s20 }
  0x31   : > { %916 = vrot.lane.b32.xlu0 %v590_v44, %s5196_s12 }
  0x32   : > { %1104 = vrot.lane.b32.xlu1 %v5424_v45, %s5197_s23 }
  0x35   : > { %496 = vrot.lane.b32.xlu0 %v5320_v15, %s5191_s19 }
  0x36   : > { %1199 = vrot.lane.b32.xlu1 %v595_v48, %s5198_s14 }
  0x39   : > { %637 = vrot.lane.b32.xlu0 %v5337_v21, %s5193_s21  ;;  %v5591_v21 = vrot.slane %v5582_v16, 1 }
  0x3a   : > { %730 = vrot.lane.b32.xlu1 %v5306_v8, %s5190_s18 }
  0x3b   : > { %v5603_v29 = vsel %vm439_vm0, %v461_v4, %v5591_v21 }
  0x3d   : > { %494 = vrot.lane.b32.xlu0 %v443_v14, %s5191_s19 }
  0x3e   : > { %825 = vrot.lane.b32.xlu1 %v5355_v28, %s5194_s22 }
  0x41   : > { %635 = vrot.lane.b32.xlu0 %v584_v20, %s5193_s21 }
  0x42   : > { %728 = vrot.lane.b32.xlu1 %v5360_v31, %s5190_s18 }
  0x45   : > { %498 = vrot.lane.b32.xlu0 %v449_v39, %s5191_s19  ;;  %v5618_v39 = vsub.s32 %v1568_v30, %v5605_v32 }
  0x46   : > { %639 = vrot.lane.b32.xlu1 %v590_v44, %s5193_s21 }
  0x49   : > { %920 = vrot.lane.b32.xlu0 %v5378_v35, %s5196_s12 }
  0x4a   : > { %1013 = vrot.lane.b32.xlu1 %v5467_v49, %s5192_s20 }
  0x4d   : > { %823 = vrot.lane.b32.xlu0 %v5375_v34, %s5194_s22 }
  0x4e   : > { %918 = vrot.lane.b32.xlu1 %v5399_v40, %s5196_s12 }
  0x51   : > { %732 = vrot.lane.b32.xlu0 %v5325_v18, %s5190_s18 }
  0x52   : > { %827 = vrot.lane.b32.xlu1 %v5424_v45, %s5194_s22 }
  0x55   : > { %1108 = vrot.lane.b32.xlu0 %v457_v55, %s5197_s23 }
  0x56   : > { %1203 = vrot.lane.b32.xlu1 %v5490_v56, %s5198_s14 }
  0x59   : > { %1011 = vrot.lane.b32.xlu0 %v5386_v37, %s5192_s20 }
  0x5a   : > { %922 = vrot.lane.b32.xlu1 %v595_v48, %s5196_s12 }
  0x5d   : > { %502 = vrot.lane.b32.xlu0 %v5355_v28, %s5191_s19 }
  0x5e   : > { %643 = vrot.lane.b32.xlu1 %v5378_v35, %s5193_s21  ;;  %v5610_v35 = vsel %vm580_vm1, %v602_v6, %v5594_v27 }
  0x61   : > { %1106 = vrot.lane.b32.xlu0 %v5402_v41, %s5197_s23 }
  0x62   : > { %1201 = vrot.lane.b32.xlu1 %v5427_v46, %s5198_s14 }
  0x65   : > { %1015 = vrot.lane.b32.xlu0 %v5474_v50, %s5192_s20 }
  0x66   : > { %736 = vrot.lane.b32.xlu1 %v5467_v49, %s5190_s18 }
  0x69   : > { %500 = vrot.lane.b32.xlu0 %v5375_v34, %s5191_s19 }
  0x6a   : > { %641 = vrot.lane.b32.xlu1 %v5399_v40, %s5193_s21 }
  0x6d   : > { %1110 = vrot.lane.b32.xlu0 %v5525_v60, %s5197_s23 }
  0x6e   : > { %1205 = vrot.lane.b32.xlu1 %v5529_v61, %s5198_s14 }
  0x71   : > { %831 = vrot.lane.b32.xlu0 %v457_v55, %s5194_s22 }
  0x72   : > { %734 = vrot.lane.b32.xlu1 %v5386_v37, %s5190_s18 }
  0x75   : > { %504 = vrot.lane.b32.xlu0 %v5424_v45, %s5191_s19 }
  0x76   : > { %645 = vrot.lane.b32.xlu1 %v595_v48, %s5193_s21 }
  0x79   : > { %926 = vrot.lane.b32.xlu0 %v5490_v56, %s5196_s12 }
  0x7a   : > { %1019 = vrot.lane.b32.xlu1 %v5542_v62, %s5192_s20 }
  0x7d   : > { %829 = vrot.lane.b32.xlu0 %v5402_v41, %s5194_s22 }
  0x7e   : > { %924 = vrot.lane.b32.xlu1 %v5427_v46, %s5196_s12 }
  0x81   : > { %738 = vrot.lane.b32.xlu0 %v5474_v50, %s5190_s18 }
  0x82   : > { %833 = vrot.lane.b32.xlu1 %v5525_v60, %s5194_s22 }
  0x85   : > { %1114 = vrot.lane.b32.xlu0 %v5564_v9, %s5197_s23 }
  0x86   : > { %1209 = vrot.lane.b32.xlu1 %v5567_v10, %s5198_s14 }
  0x88   : > { %v725_v12 = vpop.permute.xlu1 %724 }
  0x89   : > { %1017 = vrot.lane.b32.xlu0 %v5507_v57, %s5192_s20 }
  0x8a   : > { %1112 = vrot.lane.b32.xlu1 %v5514_v58, %s5197_s23 }
  0x8b   : > { %v491_v13 = vpop.permute.xlu0 %490 }
  0x8c   : > { %v1008_v14 = vpop.permute.xlu1 %1007  ;;  %v1288_v17 = vsel %vm1287_vm3, %v5291_v1, %v491_v13 }
  0x8d   : > { %928 = vrot.lane.b32.xlu0 %v5529_v61, %s5196_s12 }
  0x8e   : > { %1207 = vrot.lane.b32.xlu1 %v5517_v59, %s5198_s14 }
  0x8f   : > { %v632_v15 = vpop.permute.xlu0 %631 }
  0x90   : > { %v820_v19 = vpop.permute.xlu1 %819  ;;  %v1319_v20 = vsel %vm1318_vm4, %v1288_v17, %v632_v15 }
  0x91   : > { %1021 = vrot.lane.b32.xlu0 %v5549_v63, %s5192_s20  ;;  %v1350_v1 = vsel %vm1349_vm5, %v1319_v20, %v725_v12 }
  0x92   : > { %508 = vrot.lane.b32.xlu1 %v457_v55, %s5191_s19  ;;  %v1381_v33 = vsel %vm1380_vm6, %v1350_v1, %v820_v19 }
  0x93   : > { %v493_v26 = vpop.permute.xlu0 %492 }
  0x94   : > { %v915_v28 = vpop.permute.xlu1 %914  ;;  %v1289_v48 = vsel %vm1287_vm3, %v5294_v2, %v493_v26 }
  0x95   : > { %506 = vrot.lane.b32.xlu0 %v5402_v41, %s5191_s19  ;;  %v1412_v36 = vsel %vm1411_vm7, %v1381_v33, %v915_v28  ;;  %v388_v28 = vld [vmem:[%s5285_s17 + $0x78] sm:$0xff] }
  0x96   : > { %647 = vrot.lane.b32.xlu1 %v5427_v46, %s5193_s21  ;;  %v1443_v40 = vsel %vm1442_vm8, %v1412_v36, %v1008_v14 }
  0x97   : > { %v634_v34 = vpop.permute.xlu0 %633 }
  0x98   : > { %v1103_v38 = vpop.permute.xlu1 %1102  ;;  %v1320_v54 = vsel %vm1318_vm4, %v1289_v48, %v634_v34 }
  0x99   : > { %1116 = vrot.lane.b32.xlu0 %v5603_v29, %s5197_s23  ;;  %v1474_v42 = vsel %vm1473_vm9, %v1443_v40, %v1103_v38 }
  0x9a   : > { %1211 = vrot.lane.b32.xlu1 %v5610_v35, %s5198_s14 }
  0x9b   : > { %v727_v41 = vpop.permute.xlu0 %726 }
  0x9c   : > { %v1198_v43 = vpop.permute.xlu1 %1197  ;;  %v1351_v55 = vsel %vm1349_vm5, %v1320_v54, %v727_v41 }
  0x9d   : > { %v1505_v44 = vsel %vm1504_vm10, %v1474_v42, %v1198_v43  ;;  %649 = vrot.lane.b32.xlu0 %v5490_v56, %s5193_s21 }
  0x9e   : > { %v1565_v45 = vcombine.high %v1505_v44, %v1505_v44  ;;  %v1572_v46 = vrot.slane %v1505_v44, %v5618_v39  ;;  %742 = vrot.lane.b32.xlu1 %v5542_v62, %s5190_s18  ;;  %v465_v44 = vrot.slane %v388_v28, 1 }
  0x9f   : > { %v822_v47 = vpop.permute.xlu0 %821 }
  0xa0   : > { %v1579_v51 = vrot.slane %v1565_v45, %v5618_v39  ;;  %v1580_v52 = vcombine.high %v1572_v46, %v1572_v46  ;;  %v1010_v53 = vpop.permute.xlu1 %1009  ;;  %v1382_v4 = vsel %vm1380_vm6, %v1351_v55, %v822_v47  ;;  %v606_v47 = vrot.slane %v388_v28, 2 }
  0xa1   : > { %740 = vrot.lane.b32.xlu0 %v5507_v57, %s5190_s18 }
  0xa2   : > { %v1581_v56 = vcombine.high %v1579_v51, %v1579_v51  ;;  %v1991_v3 = vcombine.low %v1572_v46, %v1580_v52  ;;  %837 = vrot.lane.b32.xlu1 %v5564_v9, %s5194_s22 }
  0xa3   : > { %v917_v5 = vpop.permute.xlu0 %916 }
  0xa4   : > { %v1992_v2 = vcombine.low %v1579_v51, %v1581_v56  ;;  %v1413_v6 = vsel %vm1411_vm7, %v1382_v4, %v917_v5  ;;  %v1105_v12 = vpop.permute.xlu1 %1104  ;;  %v1999_v14 = vrot.slane %v1991_v3, %v5618_v39 }
  0xa5   : > { %v1444_v13 = vsel %vm1442_vm8, %v1413_v6, %v1010_v53  ;;  %835 = vrot.lane.b32.xlu0 %v5514_v58, %s5194_s22 }
  0xa6   : > { %v2006_v15 = vrot.slane %v1992_v2, %v5618_v39  ;;  %930 = vrot.lane.b32.xlu1 %v5517_v59, %s5196_s12  ;;  %v1475_v19 = vsel %vm1473_vm9, %v1444_v13, %v1105_v12 }
  0xa7   : > { %v497_v17 = vpop.permute.xlu0 %496 }
  0xa8   : > { %v1200_v20 = vpop.permute.xlu1 %1199  ;;  %v2007_v22 = vcombine.low %v1999_v14, %v2006_v15  ;;  %v1291_v5 = vsel %vm1287_vm3, %v5288_v0, %v497_v17 }
  0xa9   : > { %v1506_v23 = vsel %vm1504_vm10, %v1475_v19, %v1200_v20  ;;  %510 = vrot.lane.b32.xlu0 %v5525_v60, %s5191_s19  ;;  %v5711_v19 = vld [vmem:[%s5285_s17 + $0x88] sm:$0xf] }
  0xaa   : > { %v1582_v24 = vcombine.high %v1506_v23, %v1506_v23  ;;  %v1589_v26 = vrot.slane %v1506_v23, %v5618_v39  ;;  %651 = vrot.lane.b32.xlu1 %v5529_v61, %s5193_s21  ;;  %4956 = vmatmul.mubr.msk.f32.vlgmr.msra.gmra.mxu0 %vm2373_vm11, %v2007_v22  ;;  %v5662_v61 = vld [vmem:[%s5285_s17 + $0x80] sm:$0xff]  ;;  %v5720_v23 = vrot.slane %v5711_v19, 1 }
  0xab   : > { %v638_v1 = vpop.permute.xlu0 %637  ;;  %4958 = vmatprep.mubr.msk.f32.mxu0 %vm5199_vm2, %v8209_v25  ;;  %v466_v45 = vrot.slane %v5662_v61, 1  ;;  %v607_v48 = vrot.slane %v5662_v61, 2 }
  0xac   : > { %v1596_v30 = vrot.slane %v1582_v24, %v5618_v39  ;;  %v1597_v33 = vcombine.high %v1589_v26, %v1589_v26  ;;  %v731_v34 = vpop.permute.xlu1 %730  ;;  %v1322_v2 = vsel %vm1318_vm4, %v1291_v5, %v638_v1 }
  0xad   : > { %932 = vrot.lane.b32.xlu0 %v5567_v10, %s5196_s12  ;;  %v5678_v53 = vsel %vm439_vm0, %v465_v44, %v466_v45  ;;  %v5681_v55 = vsel %vm580_vm1, %v606_v47, %v607_v48  ;;  %v1353_v13 = vsel %vm1349_vm5, %v1322_v2, %v731_v34  ;;  %v5735_v34 = vsel %vm439_vm0, %v466_v45, %v5720_v23 }
  0xae   : > { %v1598_v60 = vcombine.high %v1596_v30, %v1596_v30  ;;  %v2008_v36 = vcombine.low %v1589_v26, %v1597_v33  ;;  %1025 = vrot.lane.b32.xlu1 %v388_v28, %s5192_s20 }
  0xaf   : > { %v495_v38 = vpop.permute.xlu0 %494 }
  0xb0   : > { %v2009_v40 = vcombine.low %v1596_v30, %v1598_v60  ;;  %v826_v41 = vpop.permute.xlu1 %825  ;;  %v2016_v42 = vrot.slane %v2008_v36, %v5618_v39  ;;  %v1290_v22 = vsel %vm1287_vm3, %v5311_v11, %v495_v38  ;;  %v5725_v30 = vrot.slane %v5711_v19, 2 }
  0xb1   : > { %1023 = vrot.lane.b32.xlu0 %v5582_v16, %s5192_s20  ;;  %v1384_v14 = vsel %vm1380_vm6, %v1353_v13, %v826_v41  ;;  %v5776_v13 = vld [vmem:[%s5285_s17 + $0x90] sm:$0xff] }
  0xb2   : > { %v2023_v43 = vrot.slane %v2009_v40, %v5618_v39  ;;  %1118 = vrot.lane.b32.xlu1 %v5591_v21, %s5197_s23  ;;  %v5742_v38 = vsel %vm580_vm1, %v607_v48, %v5725_v30 }
  0xb3   : > { %v636_v46 = vpop.permute.xlu0 %635 }
  0xb4   : > { %v729_v51 = vpop.permute.xlu1 %728  ;;  %v2024_v52 = vcombine.low %v2016_v42, %v2023_v43  ;;  %v1321_v24 = vsel %vm1318_vm4, %v1290_v22, %v636_v46 }
  0xb5   : > { %744 = vrot.lane.b32.xlu0 %v5549_v63, %s5190_s18 }
  0xb6   : > { %839 = vrot.lane.b32.xlu1 %v5603_v29, %s5194_s22  ;;  %4959 = vmatmul.mubr.msk.f32.gmra.mxu0 %vm2373_vm11, %v2024_v52 }
  0xb7   : > { %v499_v54 = vpop.permute.xlu0 %498  ;;  %4961 = vmatprep.mubr.msk.f32.mxu0 %vm5199_vm2, %v8209_v25 }
  0xb8   : > { %v5685_v56 = vpop.permute.xlu1 %639  ;;  %v1292_v48 = vsel %vm1287_vm3, %v5303_v7, %v499_v54 }
  0xb9   : > { %1120 = vrot.lane.b32.xlu0 %v5678_v53, %s5197_s23  ;;  %v1323_v2 = vsel %vm1318_vm4, %v1292_v48, %v5685_v56 }
  0xba   : > { %1215 = vrot.lane.b32.xlu1 %v5681_v55, %s5198_s14 }
  0xbb   : > { %v921_v3 = vpop.permute.xlu0 %920 }
  0xbc   : > { %v1014_v4 = vpop.permute.xlu1 %1013  ;;  %v1415_v0 = vsel %vm1411_vm7, %v1384_v14, %v921_v3 }
  0xbd   : > { %1213 = vrot.lane.b32.xlu0 %v5594_v27, %s5198_s14 }
  0xbe   : > { %514 = vrot.lane.b32.xlu1 %v5564_v9, %s5191_s19  ;;  %v1446_v9 = vsel %vm1442_vm8, %v1415_v0, %v1014_v4 }
  0xbf   : > { %v824_v6 = vpop.permute.xlu0 %823 }
  0xc0   : > { %v919_v12 = vpop.permute.xlu1 %918 }
  0xc1   : > { %512 = vrot.lane.b32.xlu0 %v5514_v58, %s5191_s19 }
  0xc2   : > { %653 = vrot.lane.b32.xlu1 %v5517_v59, %s5193_s21 }
  0xc3   : > { %v733_v15 = vpop.permute.xlu0 %732 }
  0xc4   : > { %v828_v17 = vpop.permute.xlu1 %827 }
  0xc5   : > { %934 = vrot.lane.b32.xlu0 %v5610_v35, %s5196_s12 }
  0xc6   : > { %1027 = vrot.lane.b32.xlu1 %v5662_v61, %s5192_s20 }
  0xc7   : > { %v1109_v58 = vpop.permute.xlu0 %1108 }
  0xc8   : > { %v1477_v20 = vsel %vm1473_vm9, %v1446_v9, %v1109_v58  ;;  %v1204_v59 = vpop.permute.xlu1 %1203  ;;  %v5789_v9 = vld [vmem:[%s5285_s17 + $0x98] sm:$0xff] }
  0xc9   : > { %655 = vrot.lane.b32.xlu0 %v5567_v10, %s5193_s21  ;;  %v1508_v26 = vsel %vm1504_vm10, %v1477_v20, %v1204_v59  ;;  %v1352_v10 = vsel %vm1349_vm5, %v1321_v24, %v729_v51  ;;  %v470_v59 = vrot.slane %v5776_v13, 1 }
  0xca   : > { %748 = vrot.lane.b32.xlu1 %v388_v28, %s5190_s18  ;;  %v1606_v11 = vcombine.high %v1508_v26, %v1508_v26  ;;  %v1613_v28 = vrot.slane %v1508_v26, %v5618_v39  ;;  %v1383_v60 = vsel %vm1380_vm6, %v1352_v10, %v824_v6  ;;  %v1354_v6 = vsel %vm1349_vm5, %v1323_v2, %v733_v15 }
  0xcb   : > { %v1012_v1 = vpop.permute.xlu0 %1011  ;;  %v1414_v40 = vsel %vm1411_vm7, %v1383_v60, %v919_v12  ;;  %v1385_v0 = vsel %vm1380_vm6, %v1354_v6, %v828_v17  ;;  %v611_v10 = vrot.slane %v5776_v13, 2 }
  0xcc   : > { %v923_v33 = vpop.permute.xlu1 %922  ;;  %v1620_v41 = vrot.slane %v1606_v11, %v5618_v39  ;;  %v1621_v42 = vcombine.high %v1613_v28, %v1613_v28  ;;  %v1445_v43 = vsel %vm1442_vm8, %v1414_v40, %v1012_v1  ;;  %v471_v1 = vrot.slane %v5789_v9, 1 }
  0xcd   : > { %746 = vrot.lane.b32.xlu0 %v5582_v16, %s5190_s18  ;;  %v612_v11 = vrot.slane %v5789_v9, 2 }
  0xce   : > { %841 = vrot.lane.b32.xlu1 %v5591_v21, %s5194_s22  ;;  %v2026_v51 = vcombine.low %v1621_v42, %v1620_v41  ;;  %v1622_v22 = vcombine.high %v1620_v41, %v1620_v41 }
  0xcf   : > { %v5738_v36 = vpop.permute.xlu0 %502 }
  0xd0   : > { %v5744_v16 = vpop.permute.xlu1 %643  ;;  %v2040_v7 = vrot.slane %v2026_v51, %v5618_v39  ;;  %v5821_v51 = vld [vmem:[%s5285_s17 + $0xa0] sm:$0xf]  ;;  %v1294_v2 = vsel %vm1287_vm3, %v5306_v8, %v5738_v36 }
  0xd1   : > { %1122 = vrot.lane.b32.xlu0 %v5735_v34, %s5197_s23 }
  0xd2   : > { %1217 = vrot.lane.b32.xlu1 %v5742_v38, %s5198_s14 }
  0xd3   : > { %v1107_v44 = vpop.permute.xlu0 %1106 }
  0xd4   : > { %v1476_v45 = vsel %vm1473_vm9, %v1445_v43, %v1107_v44  ;;  %v1202_v46 = vpop.permute.xlu1 %1201  ;;  %v5813_v43 = vsel %vm439_vm0, %v470_v59, %v471_v1 }
  0xd5   : > { %v1507_v47 = vsel %vm1504_vm10, %v1476_v45, %v1202_v46  ;;  %843 = vrot.lane.b32.xlu0 %v5678_v53, %s5194_s22  ;;  %v5816_v45 = vsel %vm580_vm1, %v611_v10, %v612_v11 }
  0xd6   : > { %v1605_v52 = vrot.slane %v1507_v47, %v5618_v39  ;;  %936 = vrot.lane.b32.xlu1 %v5594_v27, %s5196_s12 }
  0xd7   : > { %v1016_v3 = vpop.permute.xlu0 %1015 }
  0xd8   : > { %v2025_v4 = vcombine.low %v1605_v52, %v1613_v28  ;;  %v5762_v5 = vpop.permute.xlu1 %736 }
  0xd9   : > { %516 = vrot.lane.b32.xlu0 %v5603_v29, %s5191_s19  ;;  %v1416_v29 = vsel %vm1411_vm7, %v1385_v0, %v923_v33  ;;  %v1325_v0 = vsel %vm1318_vm4, %v1294_v2, %v5744_v16 }
  0xda   : > { %v2033_v54 = vrot.slane %v2025_v4, %v5618_v39  ;;  %657 = vrot.lane.b32.xlu1 %v5610_v35, %s5193_s21  ;;  %v1447_v35 = vsel %vm1442_vm8, %v1416_v29, %v1016_v3  ;;  %v5828_v3 = vrot.slane %v5821_v51, 1  ;;  %v1356_v8 = vsel %vm1349_vm5, %v1325_v0, %v5762_v5 }
  0xdb   : > { %v5773_v12 = vpop.permute.xlu0 %500 }
  0xdc   : > { %v5778_v14 = vpop.permute.xlu1 %641  ;;  %v2041_v56 = vcombine.low %v2033_v54, %v2040_v7  ;;  %v5842_v7 = vsel %vm439_vm0, %v471_v1, %v5828_v3  ;;  %v5845_v54 = vrot.slane %v5821_v51, 2  ;;  %v1293_v16 = vsel %vm1287_vm3, %v5360_v31, %v5773_v12 }
  0xdd   : > { %938 = vrot.lane.b32.xlu0 %v5681_v55, %s5196_s12  ;;  %v1324_v5 = vsel %vm1318_vm4, %v1293_v16, %v5778_v14 }
  0xde   : > { %1031 = vrot.lane.b32.xlu1 %v5776_v13, %s5192_s20  ;;  %4962 = vmatmul.mubr.msk.f32.gmra.mxu0 %vm2373_vm11, %v2041_v56 }
  0xdf   : > { %v1111_v15 = vpop.permute.xlu0 %1110  ;;  %4964 = vmatprep.mubr.msk.f32.mxu0 %vm5199_vm2, %v8209_v25 }
  0xe0   : > { %v1478_v17 = vsel %vm1473_vm9, %v1447_v35, %v1111_v15  ;;  %v1206_v58 = vpop.permute.xlu1 %1205  ;;  %v5858_v35 = vsel %vm580_vm1, %v612_v11, %v5845_v54 }
  0xe1   : > { %v1509_v20 = vsel %vm1504_vm10, %v1478_v17, %v1206_v58  ;;  %1029 = vrot.lane.b32.xlu0 %v5711_v19, %s5192_s20 }
  0xe2   : > { %v1623_v24 = vcombine.high %v1509_v20, %v1509_v20  ;;  %v1630_v26 = vrot.slane %v1509_v20, %v5618_v39  ;;  %1124 = vrot.lane.b32.xlu1 %v5720_v23, %s5197_s23 }
  0xe3   : > { %v832_v33 = vpop.permute.xlu0 %831 }
  0xe4   : > { %v5805_v28 = vrot.slane %v1623_v24, %v5618_v39  ;;  %v1638_v60 = vcombine.high %v1630_v26, %v1630_v26  ;;  %v2042_v40 = vcombine.low %v1622_v22, %v1630_v26  ;;  %v735_v41 = vpop.permute.xlu1 %734  ;;  %v1387_v36 = vsel %vm1380_vm6, %v1356_v8, %v832_v33 }
  0xe5   : > { %750 = vrot.lane.b32.xlu0 %v5662_v61, %s5190_s18  ;;  %v1355_v59 = vsel %vm1349_vm5, %v1324_v5, %v735_v41 }
  0xe6   : > { %v2043_v42 = vcombine.low %v1638_v60, %v5805_v28  ;;  %845 = vrot.lane.b32.xlu1 %v5735_v34, %s5194_s22  ;;  %v2050_v46 = vrot.slane %v2042_v40, %v5618_v39 }
  0xe7   : > { %v505_v44 = vpop.permute.xlu0 %504 }
  0xe8   : > { %v2057_v47 = vrot.slane %v2043_v42, %v5618_v39  ;;  %v646_v48 = vpop.permute.xlu1 %645 }
  0xe9   : > { %1126 = vrot.lane.b32.xlu0 %v5813_v43, %s5197_s23 }
  0xea   : > { %1221 = vrot.lane.b32.xlu1 %v5816_v45, %s5198_s14  ;;  %v2058_v61 = vcombine.low %v2050_v46, %v2057_v47 }
  0xeb   : > { %v927_v52 = vpop.permute.xlu0 %926 }
  0xec   : > { %v1020_v4 = vpop.permute.xlu1 %1019  ;;  %4965 = vmatmul.mubr.msk.f32.gmra.mxu0 %vm2373_vm11, %v2058_v61  ;;  %v1418_v15 = vsel %vm1411_vm7, %v1387_v36, %v927_v52 }
  0xed   : > { %1219 = vrot.lane.b32.xlu0 %v5725_v30, %s5198_s14  ;;  %4967 = vmatprep.mubr.msk.f32.mxu0 %vm5199_vm2, %v8209_v25  ;;  %v1449_v58 = vsel %vm1442_vm8, %v1418_v15, %v1020_v4  ;;  %v5906_v4 = vld [vmem:[%s5285_s17 + $0xa8] sm:$0xff] }
  0xee   : > { %1033 = vrot.lane.b32.xlu1 %v5789_v9, %s5192_s20  ;;  %v475_v36 = vrot.slane %v5906_v4, 1 }
  0xef   : > { %v830_v6 = vpop.permute.xlu0 %829 }
  0xf0   : > { %v925_v56 = vpop.permute.xlu1 %924  ;;  %v1386_v12 = vsel %vm1380_vm6, %v1355_v59, %v830_v6 }
  0xf1   : > { %940 = vrot.lane.b32.xlu0 %v5742_v38, %s5196_s12  ;;  %v1417_v26 = vsel %vm1411_vm7, %v1386_v12, %v925_v56 }
  0xf2   : > { %1128 = vrot.lane.b32.xlu1 %v5842_v7, %s5197_s23 }
  0xf3   : > { %v739_v29 = vpop.permute.xlu0 %738 }
  0xf4   : > { %v834_v17 = vpop.permute.xlu1 %833 }
  0xf5   : > { %520 = vrot.lane.b32.xlu0 %v5678_v53, %s5191_s19 }
  0xf6   : > { %1223 = vrot.lane.b32.xlu1 %v5858_v35, %s5198_s14 }
  0xf7   : > { %v1115_v20 = vpop.permute.xlu0 %1114 }
  0xf8   : > { %v1480_v22 = vsel %vm1473_vm9, %v1449_v58, %v1115_v20  ;;  %v1210_v31 = vpop.permute.xlu1 %1209 }
  0xf9   : > { %v1511_v24 = vsel %vm1504_vm10, %v1480_v22, %v1210_v31  ;;  %661 = vrot.lane.b32.xlu0 %v5681_v55, %s5193_s21 }
  0xfa   : > { %v1654_v53 = vrot.slane %v1511_v24, %v5618_v39  ;;  %754 = vrot.lane.b32.xlu1 %v5776_v13, %s5190_s18  ;;  %v1295_v13 = vsel %vm1287_vm3, %v5325_v18, %v505_v44  ;;  %v1647_v47 = vcombine.high %v1511_v24, %v1511_v24 }
  0xfb   : > { %v1018_v14 = vpop.permute.xlu0 %1017 }
  0xfc   : > { %v1113_v1 = vpop.permute.xlu1 %1112  ;;  %v1448_v33 = vsel %vm1442_vm8, %v1417_v26, %v1018_v14  ;;  %v1662_v10 = vcombine.high %v1654_v53, %v1654_v53  ;;  %v1661_v2 = vrot.slane %v1647_v47, %v5618_v39 }
  0xfd   : > { %518 = vrot.lane.b32.xlu0 %v5591_v21, %s5191_s19  ;;  %v1479_v55 = vsel %vm1473_vm9, %v1448_v33, %v1113_v1  ;;  %v1639_v21 = vcombine.high %v5805_v28, %v5805_v28 }
  0xfe   : > { %849 = vrot.lane.b32.xlu1 %v5813_v43, %s5194_s22  ;;  %v2060_v41 = vcombine.low %v1654_v53, %v1662_v10  ;;  %v1663_v16 = vcombine.high %v1661_v2, %v1661_v2  ;;  %v616_v10 = vrot.slane %v5906_v4, 2 }
  0xff   : > { %v929_v11 = vpop.permute.xlu0 %928 }
 0x100   : > { %v1208_v60 = vpop.permute.xlu1 %1207  ;;  %v2074_v44 = vrot.slane %v2060_v41, %v5618_v39  ;;  %v2076_v22 = vcombine.low %v1661_v2, %v1663_v16 }
 0x101   : > { %v1510_v40 = vsel %vm1504_vm10, %v1479_v55, %v1208_v60  ;;  %659 = vrot.lane.b32.xlu0 %v5594_v27, %s5193_s21  ;;  %v1326_v27 = vsel %vm1318_vm4, %v1295_v13, %v646_v48  ;;  %v5910_v48 = vld [vmem:[%s5285_s17 + $0xb0] sm:$0xff] }
 0x102   : > { %v1646_v42 = vrot.slane %v1510_v40, %v5618_v39  ;;  %752 = vrot.lane.b32.xlu1 %v5711_v19, %s5190_s18  ;;  %v1357_v18 = vsel %vm1349_vm5, %v1326_v27, %v739_v29  ;;  %v476_v29 = vrot.slane %v5910_v48, 1  ;;  %v2084_v14 = vrot.slane %v2076_v22, %v5618_v39  ;;  %v5978_v27 = vld [vmem:[%s5285_s17 + $0xc8] sm:$0xff] }
 0x103   : > { %v1022_v46 = vpop.permute.xlu0 %1021  ;;  %v481_v2 = vrot.slane %v5978_v27, 1 }
 0x104   : > { %v2059_v61 = vcombine.low %v1639_v21, %v1646_v42  ;;  %v509_v52 = vpop.permute.xlu1 %508  ;;  %v5934_v59 = vsel %vm439_vm0, %v475_v36, %v476_v29 }
 0x105   : > { %522 = vrot.lane.b32.xlu0 %v5735_v34, %s5191_s19  ;;  %v1388_v34 = vsel %vm1380_vm6, %v1357_v18, %v834_v17 }
 0x106   : > { %v2067_v28 = vrot.slane %v2059_v61, %v5618_v39  ;;  %663 = vrot.lane.b32.xlu1 %v5742_v38, %s5193_s21  ;;  %v1419_v0 = vsel %vm1411_vm7, %v1388_v34, %v929_v11 }
 0x107   : > { %v507_v19 = vpop.permute.xlu0 %506  ;;  %v1450_v38 = vsel %vm1442_vm8, %v1419_v0, %v1022_v46  ;;  %v5996_v0 = vld [vmem:[%s5285_s17 + $0xb8] sm:$0xf] }
 0x108   : > { %v648_v6 = vpop.permute.xlu1 %647  ;;  %v2075_v56 = vcombine.low %v2067_v28, %v2074_v44  ;;  %v1296_v42 = vsel %vm1287_vm3, %v5386_v37, %v507_v19 }
 0x109   : > { %944 = vrot.lane.b32.xlu0 %v5816_v45, %s5196_s12  ;;  %v1327_v44 = vsel %vm1318_vm4, %v1296_v42, %v648_v6 }
 0x10a   : > { %1037 = vrot.lane.b32.xlu1 %v5906_v4, %s5192_s20  ;;  %4968 = vmatmul.mubr.msk.f32.gmra.mxu0 %vm2373_vm11, %v2075_v56 }
 0x10b   : > { %v1117_v8 = vpop.permute.xlu0 %1116  ;;  %4970 = vmatprep.mubr.msk.f32.mxu0 %vm5199_vm2, %v8209_v25 }
 0x10c   : > { %v1481_v15 = vsel %vm1473_vm9, %v1450_v38, %v1117_v8  ;;  %v1212_v17 = vpop.permute.xlu1 %1211 }
 0x10d   : > { %v1512_v5 = vsel %vm1504_vm10, %v1481_v15, %v1212_v17  ;;  %847 = vrot.lane.b32.xlu0 %v5720_v23, %s5194_s22  ;;  %v6011_v17 = vrot.slane %v5996_v0, 1 }
 0x10e   : > { %v1671_v58 = vrot.slane %v1512_v5, %v5618_v39  ;;  %942 = vrot.lane.b32.xlu1 %v5725_v30, %s5196_s12  ;;  %v1664_v18 = vcombine.high %v1512_v5, %v1512_v5 }
 0x10f   : > { %v650_v20 = vpop.permute.xlu0 %649 }
 0x110   : > { %v1679_v31 = vcombine.high %v1671_v58, %v1671_v58  ;;  %v743_v12 = vpop.permute.xlu1 %742  ;;  %v1678_v38 = vrot.slane %v1664_v18, %v5618_v39 }
 0x111   : > { %756 = vrot.lane.b32.xlu0 %v5789_v9, %s5190_s18  ;;  %v617_v9 = vrot.slane %v5910_v48, 2 }
 0x112   : > { %v2077_v24 = vcombine.low %v1671_v58, %v1679_v31  ;;  %532 = vrot.lane.b32.xlu1 %v5934_v59, %s5191_s19  ;;  %v1680_v22 = vcombine.high %v1678_v38, %v1678_v38 }
 0x113   : > { %v741_v53 = vpop.permute.xlu0 %740  ;;  %v5958_v60 = vsel %vm580_vm1, %v616_v10, %v617_v9 }
 0x114   : > { %v2091_v26 = vrot.slane %v2077_v24, %v5618_v39  ;;  %v838_v1 = vpop.permute.xlu1 %837  ;;  %v1358_v37 = vsel %vm1349_vm5, %v1327_v44, %v741_v53  ;;  %v6025_v24 = vsel %vm439_vm0, %v476_v29, %v6011_v17  ;;  %v6039_v29 = vrot.slane %v5996_v0, 2 }
 0x115   : > { %1132 = vrot.lane.b32.xlu0 %v5934_v59, %s5197_s23 }
 0x116   : > { %1035 = vrot.lane.b32.xlu1 %v5821_v51, %s5192_s20  ;;  %v2092_v33 = vcombine.low %v2084_v14, %v2091_v26  ;;  %v2093_v26 = vcombine.low %v1678_v38, %v1680_v22 }
 0x117   : > { %v836_v11 = vpop.permute.xlu0 %835 }
 0x118   : > { %v931_v55 = vpop.permute.xlu1 %930  ;;  %4971 = vmatmul.mubr.msk.f32.gmra.mxu0 %vm2373_vm11, %v2092_v33  ;;  %v1389_v56 = vsel %vm1380_vm6, %v1358_v37, %v836_v11 }
 0x119   : > { %851 = vrot.lane.b32.xlu0 %v5842_v7, %s5194_s22  ;;  %4973 = vmatprep.mubr.msk.f32.mxu0 %vm5199_vm2, %v8209_v25  ;;  %v1420_v8 = vsel %vm1411_vm7, %v1389_v56, %v931_v55 }
 0x11a   : > { %526 = vrot.lane.b32.xlu1 %v5813_v43, %s5191_s19  ;;  %v1297_v43 = vsel %vm1287_vm3, %v5467_v49, %v509_v52 }
 0x11b   : > { %v5960_v40 = vpop.permute.xlu0 %510  ;;  %v1328_v46 = vsel %vm1318_vm4, %v1297_v43, %v650_v20  ;;  %v622_v43 = vrot.slane %v5978_v27, 2 }
 0x11c   : > { %v5962_v13 = vpop.permute.xlu1 %651  ;;  %v1359_v49 = vsel %vm1349_vm5, %v1328_v46, %v743_v12 }
 0x11d   : > { %1227 = vrot.lane.b32.xlu0 %v5958_v60, %s5198_s14  ;;  %v1390_v52 = vsel %vm1380_vm6, %v1359_v49, %v838_v1 }
 0x11e   : > { %946 = vrot.lane.b32.xlu1 %v5858_v35, %s5196_s12 }
 0x11f   : > { %v933_v41 = vpop.permute.xlu0 %932 }
 0x120   : > { %v1026_v21 = vpop.permute.xlu1 %1025  ;;  %v1421_v6 = vsel %vm1411_vm7, %v1390_v52, %v933_v41  ;;  %v2101_v41 = vrot.slane %v2093_v26, %v5618_v39 }
 0x121   : > { %673 = vrot.lane.b32.xlu0 %v5958_v60, %s5193_s21  ;;  %v1452_v36 = vsel %vm1442_vm8, %v1421_v6, %v1026_v21 }
 0x122   : > { %667 = vrot.lane.b32.xlu1 %v5816_v45, %s5193_s21  ;;  %v5987_v45 = vld [vmem:[%s5285_s17 + $0xc0] sm:$0xff] }
 0x123   : > { %v1024_v47 = vpop.permute.xlu0 %1023  ;;  %v480_v19 = vrot.slane %v5987_v45, 1 }
 0x124   : > { %v1119_v61 = vpop.permute.xlu1 %1118  ;;  %v1451_v5 = vsel %vm1442_vm8, %v1420_v8, %v1024_v47  ;;  %v6055_v47 = vsel %vm580_vm1, %v617_v9, %v6039_v29  ;;  %v6089_v8 = vld [vmem:[%s5285_s17 + $0xe0] sm:$0xff] }
 0x125   : > { %1130 = vrot.lane.b32.xlu0 %v5828_v3, %s5197_s23  ;;  %v6008_v15 = vsel %vm439_vm0, %v480_v19, %v481_v2  ;;  %v1482_v31 = vsel %vm1473_vm9, %v1451_v5, %v1119_v61  ;;  %v1298_v61 = vsel %vm1287_vm3, %v5474_v50, %v5960_v40  ;;  %v486_v22 = vrot.slane %v6089_v8, 1 }
 0x126   : > { %1039 = vrot.lane.b32.xlu1 %v5910_v48, %s5192_s20  ;;  %v1329_v50 = vsel %vm1318_vm4, %v1298_v61, %v5962_v13 }
 0x127   : > { %v745_v28 = vpop.permute.xlu0 %744 }
 0x128   : > { %v840_v34 = vpop.permute.xlu1 %839  ;;  %v1360_v40 = vsel %vm1349_vm5, %v1329_v50, %v745_v28 }
 0x129   : > { %766 = vrot.lane.b32.xlu0 %v5987_v45, %s5190_s18  ;;  %v1391_v49 = vsel %vm1380_vm6, %v1360_v40, %v840_v34 }
 0x12a   : > { %524 = vrot.lane.b32.xlu1 %v5720_v23, %s5191_s19 }
 0x12b   : > { %v1121_v16 = vpop.permute.xlu0 %1120 }
 0x12c   : > { %v1483_v58 = vsel %vm1473_vm9, %v1452_v36, %v1121_v16  ;;  %v1216_v20 = vpop.permute.xlu1 %1215 }
 0x12d   : > { %1225 = vrot.lane.b32.xlu0 %v5845_v54, %s5198_s14  ;;  %v1514_v23 = vsel %vm1504_vm10, %v1483_v58, %v1216_v20 }
 0x12e   : > { %861 = vrot.lane.b32.xlu1 %v6008_v15, %s5194_s22  ;;  %v1695_v1 = vrot.slane %v1514_v23, %v5618_v39  ;;  %v1688_v44 = vcombine.high %v1514_v23, %v1514_v23 }
 0x12f   : > { %v1214_v12 = vpop.permute.xlu0 %1213 }
 0x130   : > { %v1513_v53 = vsel %vm1504_vm10, %v1482_v31, %v1214_v12  ;;  %v6028_v14 = vpop.permute.xlu1 %514  ;;  %v1702_v13 = vrot.slane %v1688_v44, %v5618_v39  ;;  %v1703_v28 = vcombine.high %v1695_v1, %v1695_v1  ;;  %v6106_v12 = vld [vmem:[%s5285_s17 + $0xd0] sm:$0xf] }
 0x131   : > { %v1687_v33 = vrot.slane %v1513_v53, %v5618_v39  ;;  %760 = vrot.lane.b32.xlu0 %v5906_v4, %s5190_s18  ;;  %v621_v4 = vrot.slane %v5987_v45, 2 }
 0x132   : > { %534 = vrot.lane.b32.xlu1 %v6025_v24, %s5191_s19  ;;  %v1704_v16 = vcombine.high %v1702_v13, %v1702_v13 }
 0x133   : > { %v2094_v10 = vcombine.low %v1687_v33, %v1695_v1  ;;  %v6036_v11 = vpop.permute.xlu0 %512  ;;  %v6120_v1 = vrot.slane %v6106_v12, 1 }
 0x134   : > { %v6041_v55 = vpop.permute.xlu1 %653 }
 0x135   : > { %v2108_v21 = vrot.slane %v2094_v10, %v5618_v39  ;;  %1134 = vrot.lane.b32.xlu0 %v6025_v24, %s5197_s23 }
 0x136   : > { %855 = vrot.lane.b32.xlu1 %v5934_v59, %s5194_s22  ;;  %v6068_v59 = vsel %vm580_vm1, %v621_v4, %v622_v43 }
 0x137   : > { %v935_v42 = vpop.permute.xlu0 %934  ;;  %v2109_v46 = vcombine.low %v2101_v41, %v2108_v21  ;;  %v6131_v21 = vsel %vm439_vm0, %v481_v2, %v6120_v1 }
 0x138   : > { %v1028_v18 = vpop.permute.xlu1 %1027  ;;  %v1422_v52 = vsel %vm1411_vm7, %v1391_v49, %v935_v42  ;;  %v1300_v42 = vsel %vm1287_vm3, %v5542_v62, %v6028_v14  ;;  %v627_v14 = vrot.slane %v6089_v8, 2 }
 0x139   : > { %665 = vrot.lane.b32.xlu0 %v5725_v30, %s5193_s21  ;;  %4974 = vmatmul.mubr.msk.f32.gmra.mxu0 %vm2373_vm11, %v2109_v46  ;;  %v1453_v56 = vsel %vm1442_vm8, %v1422_v52, %v1028_v18  ;;  %v1299_v46 = vsel %vm1287_vm3, %v5507_v57, %v6036_v11 }
 0x13a   : > { %1229 = vrot.lane.b32.xlu1 %v6055_v47, %s5198_s14  ;;  %4976 = vmatprep.mubr.msk.f32.mxu0 %vm5199_vm2, %v8209_v25 }
 0x13b   : > { %v656_v9 = vpop.permute.xlu0 %655 }
 0x13c   : > { %v749_v30 = vpop.permute.xlu1 %748  ;;  %v1331_v2 = vsel %vm1318_vm4, %v1300_v42, %v656_v9 }
 0x13d   : > { %956 = vrot.lane.b32.xlu0 %v6068_v59, %s5196_s12  ;;  %v1362_v50 = vsel %vm1349_vm5, %v1331_v2, %v749_v30 }
 0x13e   : > { %675 = vrot.lane.b32.xlu1 %v6055_v47, %s5193_s21 }
 0x13f   : > { %v747_v37 = vpop.permute.xlu0 %746 }
 0x140   : > { %v842_v19 = vpop.permute.xlu1 %841 }
 0x141   : > { %528 = vrot.lane.b32.xlu0 %v5842_v7, %s5191_s19  ;;  %v2110_v7 = vcombine.low %v1703_v28, %v1702_v13 }
 0x142   : > { %950 = vrot.lane.b32.xlu1 %v5958_v60, %s5196_s12  ;;  %v6100_v60 = vld [vmem:[%s5285_s17 + $0xd8] sm:$0xff] }
 0x143   : > { %v1123_v6 = vpop.permute.xlu0 %1122  ;;  %v485_v20 = vrot.slane %v6100_v60, 1  ;;  %v626_v62 = vrot.slane %v6100_v60, 2 }
 0x144   : > { %v1484_v34 = vsel %vm1473_vm9, %v1453_v56, %v1123_v6  ;;  %v1218_v38 = vpop.permute.xlu1 %1217 }
 0x145   : > { %v1515_v36 = vsel %vm1504_vm10, %v1484_v34, %v1218_v38  ;;  %758 = vrot.lane.b32.xlu0 %v5821_v51, %s5190_s18  ;;  %v2118_v51 = vrot.slane %v2110_v7, %v5618_v39  ;;  %v6117_v26 = vsel %vm439_vm0, %v485_v20, %v486_v22  ;;  %v6166_v30 = vsel %vm580_vm1, %v626_v62, %v627_v14 }
 0x146   : > { %v6095_v5 = vrot.slane %v1515_v36, %v5618_v39  ;;  %669 = vrot.lane.b32.xlu1 %v5858_v35, %s5193_s21  ;;  %v1705_v44 = vcombine.high %v1515_v36, %v1515_v36 }
 0x147   : > { %v844_v58 = vpop.permute.xlu0 %843 }
 0x148   : > { %v2111_v23 = vcombine.low %v1704_v16, %v6095_v5  ;;  %v937_v31 = vpop.permute.xlu1 %936  ;;  %v1393_v11 = vsel %vm1380_vm6, %v1362_v50, %v844_v58  ;;  %v1719_v6 = vrot.slane %v1705_v44, %v5618_v39  ;;  %v1720_v34 = vcombine.high %v6095_v5, %v6095_v5 }
 0x149   : > { %1049 = vrot.lane.b32.xlu0 %v6100_v60, %s5192_s20 }
 0x14a   : > { %v2125_v53 = vrot.slane %v2111_v23, %v5618_v39  ;;  %853 = vrot.lane.b32.xlu1 %v5828_v3, %s5194_s22 }
 0x14b   : > { %v517_v35 = vpop.permute.xlu0 %516 }
 0x14c   : > { %v658_v33 = vpop.permute.xlu1 %657  ;;  %v2126_v10 = vcombine.low %v2118_v51, %v2125_v53  ;;  %v1301_v13 = vsel %vm1287_vm3, %v5549_v63, %v517_v35  ;;  %v6184_v63 = vrot.slane %v6106_v12, 2  ;;  %v2127_v53 = vcombine.low %v1720_v34, %v1719_v6 }
 0x14d   : > { %768 = vrot.lane.b32.xlu0 %v5978_v27, %s5190_s18  ;;  %v1332_v16 = vsel %vm1318_vm4, %v1301_v13, %v658_v33 }
 0x14e   : > { %1144 = vrot.lane.b32.xlu1 %v6117_v26, %s5197_s23  ;;  %4977 = vmatmul.mubr.msk.f32.gmra.mxu0 %vm2373_vm11, %v2126_v10  ;;  %v1721_v10 = vcombine.high %v1719_v6, %v1719_v6  ;;  %v6200_v33 = vsel %vm580_vm1, %v622_v43, %v6184_v63 }
 0x14f   : > { %v939_v41 = vpop.permute.xlu0 %938  ;;  %4979 = vmatprep.mubr.msk.f32.mxu0 %vm5199_vm2, %v8209_v25 }
 0x150   : > { %v1032_v4 = vpop.permute.xlu1 %1031  ;;  %v1424_v40 = vsel %vm1411_vm7, %v1393_v11, %v939_v41 }
 0x151   : > { %1043 = vrot.lane.b32.xlu0 %v5987_v45, %s5192_s20  ;;  %v1330_v45 = vsel %vm1318_vm4, %v1299_v46, %v6041_v55 }
 0x152   : > { %863 = vrot.lane.b32.xlu1 %v6131_v21, %s5194_s22  ;;  %v1361_v57 = vsel %vm1349_vm5, %v1330_v45, %v747_v37  ;;  %v1455_v37 = vsel %vm1442_vm8, %v1424_v40, %v1032_v4 }
 0x153   : > { %v1030_v61 = vpop.permute.xlu0 %1029  ;;  %v1392_v55 = vsel %vm1380_vm6, %v1361_v57, %v842_v19 }
 0x154   : > { %v1125_v18 = vpop.permute.xlu1 %1124  ;;  %v1423_v49 = vsel %vm1411_vm7, %v1392_v55, %v937_v31 }
 0x155   : > { %762 = vrot.lane.b32.xlu0 %v5910_v48, %s5190_s18  ;;  %v1454_v28 = vsel %vm1442_vm8, %v1423_v49, %v1030_v61 }
 0x156   : > { %1138 = vrot.lane.b32.xlu1 %v6008_v15, %s5197_s23  ;;  %v1485_v58 = vsel %vm1473_vm9, %v1454_v28, %v1125_v18 }
 0x157   : > { %v751_v9 = vpop.permute.xlu0 %750 }
 0x158   : > { %v846_v48 = vpop.permute.xlu1 %845  ;;  %v1363_v5 = vsel %vm1349_vm5, %v1332_v16, %v751_v9 }
 0x159   : > { %948 = vrot.lane.b32.xlu0 %v5845_v54, %s5196_s12  ;;  %v1394_v4 = vsel %vm1380_vm6, %v1363_v5, %v846_v48  ;;  %v6218_v48 = vld [vmem:[%s8203_s3] ss:$0 sm:$0xff] }
 0x15a   : > { %536 = vrot.lane.b32.xlu1 %v6011_v17, %s5191_s19 }
 0x15b   : > { %v1127_v52 = vpop.permute.xlu0 %1126 }
 0x15c   : > { %v1486_v19 = vsel %vm1473_vm9, %v1455_v37, %v1127_v52  ;;  %v1222_v56 = vpop.permute.xlu1 %1221 }
 0x15d   : > { %v1517_v38 = vsel %vm1504_vm10, %v1486_v19, %v1222_v56  ;;  %1239 = vrot.lane.b32.xlu0 %v6166_v30, %s5198_s14 }
 0x15e   : > { %v1729_v36 = vcombine.high %v1517_v38, %v1517_v38  ;;  %v1736_v7 = vrot.slane %v1517_v38, %v5618_v39  ;;  %857 = vrot.lane.b32.xlu1 %v6025_v24, %s5194_s22 }
 0x15f   : > { %v1220_v20 = vpop.permute.xlu0 %1219 }
 0x160   : > { %v1743_v23 = vrot.slane %v1729_v36, %v5618_v39  ;;  %v1516_v31 = vsel %vm1504_vm10, %v1485_v58, %v1220_v20  ;;  %v1034_v51 = vpop.permute.xlu1 %1033  ;;  %v1744_v35 = vcombine.high %v1736_v7, %v1736_v7  ;;  %v6237_v36 = vld [vmem:[%s5285_s17 + $0xe8] sm:$0xf] }
 0x161   : > { %v1728_v24 = vrot.slane %v1516_v31, %v5618_v39  ;;  %538 = vrot.lane.b32.xlu0 %v6008_v15, %s5191_s19  ;;  %v2135_v15 = vrot.slane %v2127_v53, %v5618_v39  ;;  %v6249_v5 = vrot.slane %v6237_v36, 1 }
 0x162   : > { %v1745_v41 = vcombine.high %v1743_v23, %v1743_v23  ;;  %1041 = vrot.lane.b32.xlu1 %v5996_v0, %s5192_s20  ;;  %v2144_v45 = vcombine.low %v1736_v7, %v1744_v35 }
 0x163   : > { %v2128_v42 = vcombine.low %v1721_v10, %v1728_v24  ;;  %v941_v46 = vpop.permute.xlu0 %940 }
 0x164   : > { %v2145_v2 = vcombine.low %v1743_v23, %v1745_v41  ;;  %v1425_v61 = vsel %vm1411_vm7, %v1394_v4, %v941_v46  ;;  %v1129_v18 = vpop.permute.xlu1 %1128  ;;  %v2152_v44 = vrot.slane %v2144_v45, %v5618_v39  ;;  %v6268_v41 = vsel %vm439_vm0, %v486_v22, %v6249_v5 }
 0x165   : > { %v2142_v50 = vrot.slane %v2128_v42, %v5618_v39  ;;  %v1456_v62 = vsel %vm1442_vm8, %v1425_v61, %v1034_v51  ;;  %958 = vrot.lane.b32.xlu0 %v6200_v33, %s5196_s12 }
 0x166   : > { %677 = vrot.lane.b32.xlu1 %v6039_v29, %s5193_s21  ;;  %v2159_v43 = vrot.slane %v2145_v2, %v5618_v39  ;;  %v1487_v9 = vsel %vm1473_vm9, %v1456_v62, %v1129_v18  ;;  %v3034_v62 = vstv %s3033_s24  ;;  %s4830_s24 = sshll.u32 %s8297_s28, 5 }
 0x167   : > { %v6212_v57 = vpop.permute.xlu0 %520  ;;  %v2143_v11 = vcombine.low %v2135_v15, %v2142_v50  ;;  %vm6297_vm12 = vcmp.eq.s32.totalorder %v3034_v62, 1 }
 0x168   : > { %v1224_v40 = vpop.permute.xlu1 %1223  ;;  %v2160_v19 = vcombine.low %v2152_v44, %v2159_v43  ;;  %v6293_v44 = vrot.slane %v6237_v36, 2  ;;  %vm3049_vm14 = vmand %vm6297_vm12, %vm3040_vm13 }
 0x169   : > { %v1518_v55 = vsel %vm1504_vm10, %v1487_v9, %v1224_v40  ;;  %1233 = vrot.lane.b32.xlu0 %v6068_v59, %s5198_s14  ;;  %4980 = vmatmul.mubr.msk.f32.gmra.mxu0 %vm2373_vm11, %v2143_v11 }
 0x16a   : > { %v1746_v49 = vcombine.high %v1518_v55, %v1518_v55  ;;  %v1753_v37 = vrot.slane %v1518_v55, %v5618_v39  ;;  %952 = vrot.lane.b32.xlu1 %v6055_v47, %s5196_s12  ;;  %v2486_v52 = vpop.f32.mrf.mxu0  ;;  %4982 = vmatprep.mubr.msk.f32.mxu0 %vm5199_vm2, %v8209_v25 }
 0x16b   : > { %v2487_v13 = vadd.f32 %v6218_v48, %v2486_v52  ;;  %v6231_v28 = vpop.permute.xlu0 %661  ;;  %v3586_v52 = vsub.s32 1, %v5605_v32 }
 0x16c   : > { %v1760_v56 = vrot.slane %v1746_v49, %v5618_v39  ;;  %v1761_v6 = vcombine.high %v1753_v37, %v1753_v37  ;;  %v6234_v34 = vpop.permute.xlu1 %754  ;;  %v4957_v38 = vpop.f32.mrf.mxu0 }
 0x16d   : > { %v2600_v7 = vmax.f32 %v2487_v13, 0.0  ;;  %679 = vrot.lane.b32.xlu0 %v6068_v59, %s5193_s21  ;;  %4983 = vmatmul.mubr.msk.f32.gmra.mxu0 %vm2373_vm11, %v2160_v19  ;;  %v3710_v13 = vsub.s32 2, %v5605_v32 }
 0x16e   : > { %v1762_v47 = vcombine.high %v1760_v56, %v1760_v56  ;;  %v2161_v16 = vcombine.low %v1753_v37, %v1761_v6  ;;  %1136 = vrot.lane.b32.xlu1 %v6011_v17, %s5197_s23  ;;  %4985 = vmatprep.mubr.msk.f32.mxu0 %vm5199_vm2, %v8209_v25 }
 0x16f   : > { %v2646_v58 = vcombine.high %v2600_v7, %v2600_v7  ;;  %v6246_v20 = vpop.permute.xlu0 %518  ;;  %v2653_v59 = vrot.slane %v2600_v7, %v5618_v39  ;;  %v6316_v7 = vsel %vm580_vm1, %v627_v14, %v6293_v44 }
 0x170   : > { %v2162_v23 = vcombine.low %v1760_v56, %v1762_v47  ;;  %v6251_v31 = vpop.permute.xlu1 %849  ;;  %v2169_v53 = vrot.slane %v2161_v16, %v5618_v39  ;;  %v6321_v47 = vld [vmem:[%s8204_s4] sm:$0xff] }
 0x171   : > { %v2660_v51 = vrot.slane %v2646_v58, %v5618_v39  ;;  %1051 = vrot.lane.b32.xlu0 %v6089_v8, %s5192_s20  ;;  %v2661_v46 = vcombine.high %v2653_v59, %v2653_v59  ;;  %v6334_v14 = vrot.slane %v6321_v47, %v3586_v52 }
 0x172   : > { %v2176_v35 = vrot.slane %v2162_v23, %v5618_v39  ;;  %772 = vrot.lane.b32.xlu1 %v6100_v60, %s5190_s18  ;;  %v6337_v23 = vrot.slane %v6321_v47, %v3710_v13 }
 0x173   : > { %v2662_v10 = vcombine.high %v2660_v51, %v2660_v51  ;;  %v6262_v24 = vpop.permute.xlu0 %659  ;;  %v3076_v45 = vcombine.low %v2653_v59, %v2661_v46  ;;  %8228 = vst [vmem:[#allocation2_spill] sm:$0xff] %v6334_v14 }
 0x174   : > { %v6270_v4 = vpop.permute.xlu1 %752  ;;  %v2177_v42 = vcombine.low %v2169_v53, %v2176_v35 }
 0x175   : > { %770 = vrot.lane.b32.xlu0 %v6106_v12, %s5190_s18  ;;  %v3077_v2 = vcombine.low %v2660_v51, %v2662_v10  ;;  %v3550_v10 = vsub.s32 0, %v5605_v32 }
 0x176   : > { %1146 = vrot.lane.b32.xlu1 %v6268_v41, %s5197_s23  ;;  %v2491_v60 = vpop.f32.mrf.mxu0  ;;  %4986 = vmatmul.mubr.msk.f32.gmra.mxu0 %vm2373_vm11, %v2177_v42 }
 0x177   : > { %v2492_v61 = vadd.f32 %v6218_v48, %v2491_v60  ;;  %v6278_v18 = vpop.permute.xlu0 %522  ;;  %4988 = vmatprep.mubr.msk.f32.mxu0 %vm5199_vm2, %v8209_v25  ;;  %v3091_v43 = vrot.slane %v3077_v2, %v5618_v39 }
 0x178   : > { %v6282_v22 = vpop.permute.xlu1 %663  ;;  %v4960_v15 = vpop.f32.mrf.mxu0 }
 0x179   : > { %v2601_v50 = vmax.f32 %v2492_v61, 0.0  ;;  %1045 = vrot.lane.b32.xlu0 %v5978_v27, %s5192_s20  ;;  %v3084_v27 = vrot.slane %v3076_v45, %v5618_v39  ;;  %v6357_v45 = vrot.slane %v6321_v47, %v3550_v10 }
 0x17a   : > { %530 = vrot.lane.b32.xlu1 %v5828_v3, %s5191_s19 }
 0x17b   : > { %v2663_v11 = vcombine.high %v2601_v50, %v2601_v50  ;;  %v2670_v9 = vrot.slane %v2601_v50, %v5618_v39  ;;  %v6290_v40 = vpop.permute.xlu0 %944  ;;  %v3092_v19 = vcombine.low %v3084_v27, %v3091_v43 }
 0x17c   : > { %v6295_v55 = vpop.permute.xlu1 %1037 }
 0x17d   : > { %v2677_v3 = vrot.slane %v2663_v11, %v5618_v39  ;;  %v2678_v37 = vcombine.high %v2670_v9, %v2670_v9  ;;  %1231 = vrot.lane.b32.xlu0 %v6039_v29, %s5198_s14  ;;  %v3516_v35 = vsel %vm3049_vm14, %v3092_v19, 0.0 }
 0x17e   : > { %867 = vrot.lane.b32.xlu1 %v6117_v26, %s5194_s22  ;;  %v3588_v60 = vmul.f32 %v6334_v14, %v3516_v35  ;;  %v3712_v2 = vmul.f32 %v6337_v23, %v3516_v35  ;;  %v3552_v13 = vmul.f32 %v6357_v45, %v3516_v35 }
 0x17f   : > { %v2679_v56 = vcombine.high %v2677_v3, %v2677_v3  ;;  %v3093_v6 = vcombine.low %v2670_v9, %v2678_v37  ;;  %v6310_v38 = vpop.permute.xlu0 %847 }
 0x180   : > { %v6323_v16 = vpop.permute.xlu1 %942  ;;  %v3636_v43 = vrot.slane %v3588_v60, 1  ;;  %v3760_v9 = vrot.slane %v3712_v2, 2 }
 0x181   : > { %v3094_v58 = vcombine.low %v2677_v3, %v2679_v56  ;;  %865 = vrot.lane.b32.xlu0 %v6120_v1, %s5194_s22  ;;  %v3101_v59 = vrot.slane %v3093_v6, %v5618_v39  ;;  %v5130_v3 = vld [vmem:[%s5285_s17 + $0x78] sm:$0xff] }
 0x182   : > { %1241 = vrot.lane.b32.xlu1 %v6316_v7, %s5198_s14  ;;  %v1303_v37 = vsel %vm1287_vm3, %v5130_v3, %v6212_v57  ;;  %v6428_v3 = vld [vmem:[%s5285_s17 + $0xf8] sm:$0xff] }
 0x183   : > { %v3108_v51 = vrot.slane %v3094_v58, %v5618_v39  ;;  %v6341_v53 = vpop.permute.xlu0 %756 }
 0x184   : > { %v6344_v42 = vpop.permute.xlu1 %532 }
 0x185   : > { %v3109_v46 = vcombine.low %v3101_v59, %v3108_v51  ;;  %1140 = vrot.lane.b32.xlu0 %v6131_v21, %s5197_s23 }
 0x186   : > { %671 = vrot.lane.b32.xlu1 %v5845_v54, %s5193_s21 }
 0x187   : > { %v1133_v61 = vpop.permute.xlu0 %1132  ;;  %v6354_v15 = vsel %vm6297_vm12, %v3109_v46, 0.0 }
 0x188   : > { %v1036_v50 = vpop.permute.xlu1 %1035  ;;  %v6361_v62 = vmul.f32 %v6334_v14, %v6354_v15  ;;  %v6365_v54 = vmul.f32 %v6337_v23, %v6354_v15 }
 0x189   : > { %540 = vrot.lane.b32.xlu0 %v6131_v21, %s5191_s19  ;;  %v1334_v21 = vsel %vm1318_vm4, %v1303_v37, %v6231_v28 }
 0x18a   : > { %962 = vrot.lane.b32.xlu1 %v6166_v30, %s5196_s12  ;;  %v3637_v11 = vrot.slane %v6361_v62, 1  ;;  %v3761_v27 = vrot.slane %v6365_v54, 2  ;;  %v1365_v28 = vsel %vm1349_vm5, %v1334_v21, %v6234_v34 }
 0x18b   : > { %v6376_v52 = vpop.permute.xlu0 %851  ;;  %v1396_v51 = vsel %vm1380_vm6, %v1365_v28, %v6251_v31  ;;  %v5131_v31 = vld [vmem:[%s5285_s17 + $0x70] sm:$0xf] }
 0x18c   : > { %v6381_v19 = vpop.permute.xlu1 %526  ;;  %v3638_v56 = vsel %vm439_vm0, %v3636_v43, %v3637_v11  ;;  %v3762_v6 = vsel %vm580_vm1, %v3760_v9, %v3761_v27  ;;  %v1427_v10 = vsel %vm1411_vm7, %v1396_v51, %v6290_v40  ;;  %v1302_v2 = vsel %vm1287_vm3, %v5131_v31, %v6246_v20 }
 0x18d   : > { %960 = vrot.lane.b32.xlu0 %v6184_v63, %s5196_s12  ;;  %v3692_v57 = vadd.f32 %v3638_v56, %v3552_v13  ;;  %v1458_v46 = vsel %vm1442_vm8, %v1427_v10, %v6295_v55  ;;  %v6425_v55 = vld [vmem:[%s5285_s17 + $0xf0] sm:$0xff]  ;;  %v815_v13 = vrot.slane %v6428_v3, 1 }
 0x18e   : > { %681 = vrot.lane.b32.xlu1 %v6200_v33, %s5193_s21  ;;  %v1489_v43 = vsel %vm1473_vm9, %v1458_v46, %v1133_v61 }
 0x18f   : > { %v1228_v58 = vpop.permute.xlu0 %1227  ;;  %v6395_v59 = vadd.f32 %v3762_v6, %v3692_v57 }
 0x190   : > { %v6399_v35 = vpop.permute.xlu1 %946  ;;  %v1520_v40 = vsel %vm1504_vm10, %v1489_v43, %v1228_v58 }
 0x191   : > { %1235 = vrot.lane.b32.xlu0 %v6200_v33, %s5198_s14  ;;  %v1333_v33 = vsel %vm1318_vm4, %v1302_v2, %v6262_v24  ;;  %v1770_v61 = vcombine.high %v1520_v40, %v1520_v40 }
 0x192   : > { %1053 = vrot.lane.b32.xlu1 %v6237_v36, %s5192_s20  ;;  %v1364_v20 = vsel %vm1349_vm5, %v1333_v33, %v6270_v4 }
 0x193   : > { %v6407_v34 = vpop.permute.xlu0 %673  ;;  %v1395_v24 = vsel %vm1380_vm6, %v1364_v20, %v6310_v38  ;;  %v6450_v6 = vrot.slane %v1770_v61, %v5618_v39  ;;  %v6455_v38 = vadd.s32 16, %v5605_v32 }
 0x194   : > { %v6411_v60 = vpop.permute.xlu1 %667  ;;  %v1426_v4 = vsel %vm1411_vm7, %v1395_v24, %v6323_v16 }
 0x195   : > { %764 = vrot.lane.b32.xlu0 %v5996_v0, %s5190_s18  ;;  %v1777_v0 = vrot.slane %v1520_v40, %v5618_v39  ;;  %8229 = vst [vmem:[#allocation3_spill] sm:$0xff] %v6455_v38  ;;  %v1457_v28 = vsel %vm1442_vm8, %v1426_v4, %v1036_v50  ;;  %vm3045_vm15 = vcmp.lt.s32.totalorder %v6455_v38, 17  ;;  %v909_v40 = vrot.slane %v6425_v55, 2 }
 0x196   : > { %774 = vrot.lane.b32.xlu1 %v6089_v8, %s5190_s18  ;;  %v814_v8 = vrot.slane %v6425_v55, 1  ;;  %vm3051_vm14 = vmand %vm6297_vm12, %vm3045_vm15  ;;  %v1786_v62 = vcombine.high %v6450_v6, %v6450_v6 }
 0x197   : > { %v1131_v9 = vpop.permute.xlu0 %1130  ;;  %v1785_v57 = vcombine.high %v1777_v0, %v1777_v0 }
 0x198   : > { %v6430_v37 = vpop.permute.xlu1 %1039  ;;  %v6463_v16 = vsel %vm439_vm0, %v814_v8, %v815_v13  ;;  %v1488_v51 = vsel %vm1473_vm9, %v1457_v28, %v1131_v9  ;;  %v910_v9 = vrot.slane %v6428_v3, 2  ;;  %v5132_v8 = vld [vmem:[%s5285_s17 + $0x80] sm:$0xff] }
 0x199   : > { %1055 = vrot.lane.b32.xlu0 %v6425_v55, %s5192_s20  ;;  %v2179_v2 = vcombine.low %v1785_v57, %v6450_v6  ;;  %v1304_v4 = vsel %vm1287_vm3, %v5132_v8, %v6278_v18 }
 0x19a   : > { %1148 = vrot.lane.b32.xlu1 %v6249_v5, %s5197_s23  ;;  %v6501_v18 = vsel %vm580_vm1, %v909_v40, %v910_v9  ;;  %v1335_v49 = vsel %vm1318_vm4, %v1304_v4, %v6282_v22  ;;  %v6529_v4 = vld [vmem:[%s5285_s17 + $0x100] sm:$0xf] }
 0x19b   : > { %v6443_v21 = vpop.permute.xlu0 %766  ;;  %v2193_v28 = vrot.slane %v2179_v2, %v5618_v39 }
 0x19c   : > { %v6445_v56 = vpop.permute.xlu1 %524 }
 0x19d   : > { %859 = vrot.lane.b32.xlu0 %v6011_v17, %s5194_s22 }
 0x19e   : > { %869 = vrot.lane.b32.xlu1 %v6268_v41, %s5194_s22  ;;  %v2496_v58 = vpop.f32.mrf.mxu0 }
 0x19f   : > { %v2497_v10 = vadd.f32 %v6218_v48, %v2496_v58  ;;  %v1226_v17 = vpop.permute.xlu0 %1225 }
 0x1a0   : > { %v1519_v46 = vsel %vm1504_vm10, %v1488_v51, %v1226_v17  ;;  %v6468_v31 = vpop.permute.xlu1 %861  ;;  %v4963_v50 = vpop.f32.mrf.mxu0 }
 0x1a1   : > { %v2602_v43 = vmax.f32 %v2497_v10, 0.0  ;;  %v1769_v33 = vrot.slane %v1519_v46, %v5618_v39  ;;  %1150 = vrot.lane.b32.xlu0 %v6463_v16, %s5197_s23  ;;  %v1366_v46 = vsel %vm1349_vm5, %v1335_v49, %v6341_v53 }
 0x1a2   : > { %1243 = vrot.lane.b32.xlu1 %v6293_v44, %s5198_s14  ;;  %v1397_v40 = vsel %vm1380_vm6, %v1366_v46, %v6376_v52  ;;  %v3553_v52 = vmul.f32 %v6357_v45, %v6354_v15 }
 0x1a3   : > { %v2687_v20 = vrot.slane %v2602_v43, %v5618_v39  ;;  %v2178_v61 = vcombine.low %v1769_v33, %v1777_v0  ;;  %v6480_v24 = vpop.permute.xlu0 %760  ;;  %v2680_v50 = vcombine.high %v2602_v43, %v2602_v43  ;;  %v1428_v22 = vsel %vm1411_vm7, %v1397_v40, %v6399_v35 }
 0x1a4   : > { %v6489_v57 = vpop.permute.xlu1 %534  ;;  %v1459_v43 = vsel %vm1442_vm8, %v1428_v22, %v6430_v37 }
 0x1a5   : > { %v3116_v58 = vrot.slane %v2687_v20, %v5618_v39  ;;  %v2186_v51 = vrot.slane %v2178_v61, %v5618_v39  ;;  %954 = vrot.lane.b32.xlu0 %v6039_v29, %s5196_s12  ;;  %v2694_v35 = vrot.slane %v2680_v50, %v5618_v39 }
 0x1a6   : > { %964 = vrot.lane.b32.xlu1 %v6316_v7, %s5196_s12 }
 0x1a7   : > { %v3518_v0 = vsel %vm3051_vm14, %v3116_v58, 0.0  ;;  %v1135_v10 = vpop.permute.xlu0 %1134  ;;  %v2194_v17 = vcombine.low %v2186_v51, %v2193_v28 }
 0x1a8   : > { %v3590_v29 = vmul.f32 %v6334_v14, %v3518_v0  ;;  %v3714_v2 = vmul.f32 %v6337_v23, %v3518_v0  ;;  %v6509_v33 = vpop.permute.xlu1 %855  ;;  %v1490_v51 = vsel %vm1473_vm9, %v1459_v43, %v1135_v10  ;;  %v2695_v0 = vcombine.high %v2687_v20, %v2687_v20 }
 0x1a9   : > { %1245 = vrot.lane.b32.xlu0 %v6501_v18, %s5198_s14  ;;  %4989 = vmatmul.mubr.msk.f32.gmra.mxu0 %vm2373_vm11, %v2194_v17  ;;  %v6549_v20 = vrot.slane %v6529_v4, 1 }
 0x1aa   : > { %v3639_v53 = vrot.slane %v3590_v29, 1  ;;  %v3763_v61 = vrot.slane %v3714_v2, 2  ;;  %1057 = vrot.lane.b32.xlu1 %v6428_v3, %s5192_s20  ;;  %4991 = vmatprep.mubr.msk.f32.mxu0 %vm5199_vm2, %v8209_v25 }
 0x1ab   : > { %v6526_v8 = vpop.permute.xlu0 %665 }
 0x1ac   : > { %v3640_v28 = vsel %vm439_vm0, %v3637_v11, %v3639_v53  ;;  %v3764_v58 = vsel %vm580_vm1, %v3761_v27, %v3763_v61  ;;  %v1230_v37 = vpop.permute.xlu1 %1229  ;;  %v2501_v49 = vpop.f32.mrf.mxu0  ;;  %v2696_v53 = vcombine.high %v2694_v35, %v2694_v35 }
 0x1ad   : > { %v3693_v15 = vadd.f32 %v3640_v28, %v3553_v52  ;;  %v1521_v17 = vsel %vm1504_vm10, %v1490_v51, %v1230_v37  ;;  %v2502_v46 = vadd.f32 %v6218_v48, %v2501_v49  ;;  %1047 = vrot.lane.b32.xlu0 %v6106_v12, %s5192_s20  ;;  %v6556_v12 = vrot.slane %v6529_v4, 2 }
 0x1ae   : > { %v1787_v11 = vcombine.high %v1521_v17, %v1521_v17  ;;  %v1794_v54 = vrot.slane %v1521_v17, %v5618_v39  ;;  %544 = vrot.lane.b32.xlu1 %v6117_v26, %s5191_s19  ;;  %v4966_v27 = vpop.f32.mrf.mxu0  ;;  %v3117_v26 = vcombine.low %v2695_v0, %v2694_v35  ;;  %v3834_v52 = vsub.s32 3, %v5605_v32 }
 0x1af   : > { %v6551_v10 = vadd.f32 %v3764_v58, %v3693_v15  ;;  %v2603_v50 = vmax.f32 %v2502_v46, 0.0  ;;  %v6553_v29 = vpop.permute.xlu0 %956  ;;  %v6576_v28 = vsel %vm439_vm0, %v815_v13, %v6549_v20  ;;  %v6583_v51 = vsel %vm580_vm1, %v910_v9, %v6556_v12 }
 0x1b0   : > { %v6559_v6 = vrot.slane %v1787_v11, %v5618_v39  ;;  %v1802_v2 = vcombine.high %v1794_v54, %v1794_v54  ;;  %v2195_v40 = vcombine.low %v1786_v62, %v1794_v54  ;;  %v6561_v22 = vpop.permute.xlu1 %675  ;;  %v3125_v15 = vrot.slane %v3117_v26, %v5618_v39  ;;  %v5133_v11 = vld [vmem:[%s5285_s17 + $0x98] sm:$0xff] }
 0x1b1   : > { %8231 = vst [vmem:[#allocation5_spill] sm:$0xff] %v6561_v22  ;;  %v6564_v61 = vrot.slane %v2603_v50, %v5618_v39  ;;  %1142 = vrot.lane.b32.xlu0 %v6120_v1, %s5197_s23  ;;  %v6594_v17 = vrot.slane %v6321_v47, %v3834_v52 }
 0x1b2   : > { %8230 = vst [vmem:[#allocation4_spill] sm:$0xff] %v6559_v6  ;;  %v2196_v43 = vcombine.low %v1802_v2, %v6559_v6  ;;  %1237 = vrot.lane.b32.xlu1 %v6184_v63, %s5198_s14  ;;  %v2203_v37 = vrot.slane %v2195_v40, %v5618_v39 }
 0x1b3   : > { %v3118_v35 = vcombine.low %v2696_v53, %v6564_v61  ;;  %v529_v58 = vpop.permute.xlu0 %528 }
 0x1b4   : > { %v2210_v49 = vrot.slane %v2196_v43, %v5618_v39  ;;  %v6587_v0 = vpop.permute.xlu1 %950  ;;  %v1307_v54 = vsel %vm1287_vm3, %v5133_v11, %v529_v58  ;;  %v406_v58 = vld [vmem:[%s5285_s17 + $0x108] sm:$0xff] }
 0x1b5   : > { %v3132_v13 = vrot.slane %v3118_v35, %v5618_v39  ;;  %1152 = vrot.lane.b32.xlu0 %v6576_v28, %s5197_s23  ;;  %v1192_v11 = vrot.slane %v406_v58, 2 }
 0x1b6   : > { %1247 = vrot.lane.b32.xlu1 %v6583_v51, %s5198_s14  ;;  %v2211_v9 = vcombine.low %v2203_v37, %v2210_v49 }
 0x1b7   : > { %v3133_v46 = vcombine.low %v3125_v15, %v3132_v13  ;;  %v6598_v62 = vpop.permute.xlu0 %758 }
 0x1b8   : > { %v670_v27 = vpop.permute.xlu1 %669  ;;  %4992 = vmatmul.mubr.msk.f32.gmra.mxu0 %vm2373_vm11, %v2211_v9  ;;  %v3870_v9 = vsub.s32 4, %v5605_v32 }
 0x1b9   : > { %v6605_v2 = vsel %vm3040_vm13, %v3133_v46, 0.0  ;;  %v6608_v40 = vsel %vm1318_vm4, %v1307_v54, %v670_v27  ;;  %685 = vrot.lane.b32.xlu0 %v6166_v30, %s5193_s21  ;;  %4994 = vmatprep.mubr.msk.f32.mxu0 %vm5199_vm2, %v8209_v25  ;;  %v3994_v46 = vsub.s32 5, %v5605_v32 }
 0x1ba   : > { %8232 = vst [vmem:[#allocation6_spill] sm:$0xff] %v6608_v40  ;;  %v3836_v26 = vmul.f32 %v6594_v17, %v6605_v2  ;;  %778 = vrot.lane.b32.xlu1 %v6425_v55, %s5190_s18  ;;  %v6681_v25 = vrot.slane %v6321_v47, %v3870_v9  ;;  %v5134_v40 = vld [vmem:[%s5285_s17 + $0x90] sm:$0xff] }
 0x1bb   : > { %v6618_v53 = vpop.permute.xlu0 %1049 }
 0x1bc   : > { %v6620_v43 = vpop.permute.xlu1 %853  ;;  %v6623_v52 = vadd.f32 %v3836_v26, %v6395_v59  ;;  %8238 = vst [vmem:[#allocation12_spill] sm:$0xff] %v6681_v25 }
 0x1bd   : > { %542 = vrot.lane.b32.xlu0 %v6120_v1, %s5191_s19  ;;  %v2697_v1 = vcombine.high %v2603_v50, %v2603_v50  ;;  %v6660_v50 = vld [vmem:[%s5285_s17 + $0x110] sm:$0xff] }
 0x1be   : > { %873 = vrot.lane.b32.xlu1 %v6463_v16, %s5194_s22  ;;  %v8211_v54 = vrot.slane %v6660_v50, 1 }
 0x1bf   : > { %v6629_v30 = vpop.permute.xlu0 %768 }
 0x1c0   : > { %8233 = vst [vmem:[#allocation7_spill] sm:$0xff] %v6629_v30  ;;  %v6631_v35 = vpop.permute.xlu1 %1144 }
 0x1c1   : > { %683 = vrot.lane.b32.xlu0 %v6184_v63, %s5193_s21 }
 0x1c2   : > { %776 = vrot.lane.b32.xlu1 %v6237_v36, %s5190_s18  ;;  %v2711_v36 = vrot.slane %v2697_v1, %v5618_v39 }
 0x1c3   : > { %v6637_v55 = vpop.permute.xlu0 %1043 }
 0x1c4   : > { %v6639_v59 = vpop.permute.xlu1 %863  ;;  %v2713_v26 = vcombine.high %v2711_v36, %v2711_v36 }
 0x1c5   : > { %8234 = vst [vmem:[#allocation8_spill] sm:$0xff] %v6639_v59  ;;  %546 = vrot.lane.b32.xlu0 %v6268_v41, %s5191_s19  ;;  %v2712_v41 = vcombine.high %v6564_v61, %v6564_v61  ;;  %v1097_v61 = vrot.slane %v406_v58, 1 }
 0x1c6   : > { %687 = vrot.lane.b32.xlu1 %v6316_v7, %s5193_s21 }
 0x1c7   : > { %v6645_v16 = vpop.permute.xlu0 %762  ;;  %v3134_v27 = vcombine.low %v2712_v41, %v2711_v36  ;;  %v6686_v41 = vld [vmem:[%s5285_s17 + $0x118] sm:$0xf]  ;;  %v6689_v36 = vrot.slane %v6321_v47, %v3994_v46 }
 0x1c8   : > { %8235 = vst [vmem:[#allocation9_spill] sm:$0xff] %v6645_v16  ;;  %v6648_v37 = vpop.permute.xlu1 %1138 }
 0x1c9   : > { %968 = vrot.lane.b32.xlu0 %v6501_v18, %s5196_s12  ;;  %8239 = vst [vmem:[#allocation13_spill] sm:$0xff] %v6689_v36  ;;  %v3142_v9 = vrot.slane %v3134_v27, %v5618_v39 }
 0x1ca   : > { %1061 = vrot.lane.b32.xlu1 %v406_v58, %s5192_s20  ;;  %v2506_v63 = vpop.f32.mrf.mxu0 }
 0x1cb   : > { %v2507_v49 = vadd.f32 %v6218_v48, %v2506_v63  ;;  %v6657_v7 = vpop.permute.xlu0 %948 }
 0x1cc   : > { %v6662_v15 = vpop.permute.xlu1 %536  ;;  %v4969_v13 = vpop.f32.mrf.mxu0 }
 0x1cd   : > { %8236 = vst [vmem:[#allocation10_spill] sm:$0xff] %v6662_v15  ;;  %v6665_v18 = vmax.f32 %v2507_v49, 0.0  ;;  %871 = vrot.lane.b32.xlu0 %v6249_v5, %s5194_s22  ;;  %v1099_v49 = vsel %vm439_vm0, %v1097_v61, %v8211_v54 }
 0x1ce   : > { %966 = vrot.lane.b32.xlu1 %v6293_v44, %s5196_s12 }
 0x1cf   : > { %v2721_v1 = vrot.slane %v6665_v18, %v5618_v39  ;;  %v6675_v63 = vpop.permute.xlu0 %1239 }
 0x1d0   : > { %v6678_v13 = vpop.permute.xlu1 %857 }
 0x1d1   : > { %8237 = vst [vmem:[#allocation11_spill] sm:$0xff] %v6678_v13  ;;  %v2729_v58 = vcombine.high %v2721_v1, %v2721_v1  ;;  %v3135_v15 = vcombine.low %v2713_v26, %v2721_v1  ;;  %780 = vrot.lane.b32.xlu0 %v6428_v3, %s5190_s18  ;;  %v8241_v3 = vrot.slane %v6660_v50, 2 }
 0x1d2   : > { %875 = vrot.lane.b32.xlu1 %v6576_v28, %s5194_s22  ;;  %v1306_v28 = vsel %vm1287_vm3, %v5134_v40, %v6381_v19 }
 0x1d3   : > { %v3149_v13 = vrot.slane %v3135_v15, %v5618_v39  ;;  %v3157_v26 = vrot.slane %v2729_v58, %v5618_v39  ;;  %v6699_v1 = vpop.permute.xlu0 %538  ;;  %v1194_v46 = vsel %vm580_vm1, %v1192_v11, %v8241_v3  ;;  %v1337_v15 = vsel %vm1318_vm4, %v1306_v28, %v6411_v60 }
 0x1d4   : > { %8240 = vst [vmem:[#allocation14_spill] sm:$0xff] %v6699_v1  ;;  %v6707_v16 = vpop.permute.xlu1 %1041  ;;  %v3872_v58 = vmul.f32 %v6681_v25, %v6605_v2  ;;  %v3996_v60 = vmul.f32 %v6689_v36, %v6605_v2 }
 0x1d5   : > { %8242 = vst [vmem:[#allocation15_spill] sm:$0xff] %v6707_v16  ;;  %v3150_v54 = vcombine.low %v3142_v9, %v3149_v13  ;;  %v3521_v11 = vsel %vm3045_vm15, %v3157_v26, 0.0  ;;  %1156 = vrot.lane.b32.xlu0 %v1099_v49, %s5197_s23  ;;  %v2714_v13 = vcombine.high %v6665_v18, %v6665_v18  ;;  %v3591_v16 = vmul.f32 %v6334_v14, %v6605_v2 }
 0x1d6   : > { %v3593_v19 = vmul.f32 %v6334_v14, %v3521_v11  ;;  %v3717_v40 = vmul.f32 %v6337_v23, %v3521_v11  ;;  %v3874_v3 = vmul.f32 %v6681_v25, %v3521_v11  ;;  %v3998_v61 = vmul.f32 %v6689_v36, %v3521_v11  ;;  %1251 = vrot.lane.b32.xlu1 %v1194_v46, %s5198_s14 }
 0x1d7   : > { %v3592_v9 = vmul.f32 %v6334_v14, %v3150_v54  ;;  %v6729_v49 = vmul.f32 %v6337_v23, %v3150_v54  ;;  %v6731_v26 = vpop.permute.xlu0 %958  ;;  %v3837_v38 = vmul.f32 %v6594_v17, %v3150_v54  ;;  %v3873_v11 = vmul.f32 %v6681_v25, %v3150_v54 }
 0x1d8   : > { %8243 = vst [vmem:[#allocation16_spill] sm:$0xff] %v6731_v26  ;;  %v3644_v28 = vrot.slane %v3593_v19, 1  ;;  %v3768_v27 = vrot.slane %v3717_v40, 2  ;;  %v6735_v46 = vpop.permute.xlu1 %677  ;;  %v2511_v1 = vpop.f32.mrf.mxu0  ;;  %v3923_v18 = vrot.slane %v3874_v3, 1  ;;  %v3997_v30 = vmul.f32 %v6689_v36, %v3150_v54 }
 0x1d9   : > { %8244 = vst [vmem:[#allocation17_spill] sm:$0xff] %v6735_v46  ;;  %v3642_v59 = vrot.slane %v3592_v9, 1  ;;  %v3766_v6 = vrot.slane %v6729_v49, 2  ;;  %1059 = vrot.lane.b32.xlu0 %v6529_v4, %s5192_s20  ;;  %v3555_v26 = vmul.f32 %v6357_v45, %v3150_v54  ;;  %v3853_v19 = vadd.f32 %v3837_v38, %v6551_v10 }
 0x1da   : > { %v3921_v40 = vrot.slane %v3873_v11, 1  ;;  %v4047_v22 = vrot.slane %v3998_v61, 2  ;;  %1154 = vrot.lane.b32.xlu1 %v6549_v20, %s5197_s23  ;;  %v4972_v25 = vpop.f32.mrf.mxu0  ;;  %v2728_v9 = vrot.slane %v2714_v13, %v5618_v39  ;;  %v4045_v36 = vrot.slane %v3997_v30, 2 }
 0x1db   : > { %v3645_v49 = vsel %vm439_vm0, %v3642_v59, %v3644_v28  ;;  %v3769_v3 = vsel %vm580_vm1, %v3766_v6, %v3768_v27  ;;  %v1234_v46 = vpop.permute.xlu0 %1233  ;;  %v3715_v38 = vmul.f32 %v6337_v23, %v6605_v2  ;;  %v3920_v25 = vrot.slane %v3872_v58, 1 }
 0x1dc   : > { %v3695_v10 = vadd.f32 %v3645_v49, %v3555_v26  ;;  %v3924_v54 = vsel %vm439_vm0, %v3921_v40, %v3923_v18  ;;  %v6753_v61 = vpop.permute.xlu1 %952  ;;  %v4048_v13 = vsel %vm580_vm1, %v4045_v36, %v4047_v22  ;;  %v2512_v28 = vadd.f32 %v6218_v48, %v2511_v1 }
 0x1dd   : > { %v3977_v11 = vadd.f32 %v3924_v54, %v3853_v19  ;;  %970 = vrot.lane.b32.xlu0 %v6583_v51, %s5196_s12  ;;  %v1368_v30 = vsel %vm1349_vm5, %v1337_v15, %v6480_v24  ;;  %v4044_v27 = vrot.slane %v3996_v60, 2  ;;  %v8245_v26 = vrot.slane %v6686_v41, 2 }
 0x1de   : > { %v6761_v14 = vadd.f32 %v3769_v3, %v3695_v10  ;;  %1249 = vrot.lane.b32.xlu1 %v6556_v12, %s5198_s14  ;;  %v8246_v58 = vrot.slane %v6660_v50, 2  ;;  %v2730_v18 = vcombine.high %v2728_v9, %v2728_v9  ;;  %v6772_v19 = vmax.f32 %v2512_v28, 0.0 }
 0x1df   : > { %v6770_v1 = vadd.f32 %v4048_v13, %v3977_v11  ;;  %v6774_v51 = vpop.permute.xlu0 %679  ;;  %v3922_v24 = vsel %vm439_vm0, %v3920_v25, %v3921_v40  ;;  %v1399_v15 = vsel %vm1380_vm6, %v1368_v30, %v6509_v33  ;;  %v3641_v60 = vrot.slane %v3591_v16, 1 }
 0x1e0   : > { %v1196_v22 = vsel %vm580_vm1, %v8246_v58, %v8245_v26  ;;  %v6779_v49 = vpop.permute.xlu1 %1136  ;;  %v3976_v3 = vadd.f32 %v3922_v24, %v6623_v52  ;;  %v3554_v10 = vmul.f32 %v6357_v45, %v6605_v2  ;;  %v3765_v54 = vrot.slane %v3715_v38, 2 }
 0x1e1   : > { %v2738_v11 = vrot.slane %v6772_v19, %v5618_v39  ;;  %1063 = vrot.lane.b32.xlu0 %v6660_v50, %s5192_s20  ;;  %v4046_v40 = vsel %vm580_vm1, %v4044_v27, %v4045_v36  ;;  %v1430_v33 = vsel %vm1411_vm7, %v1399_v15, %v6587_v0  ;;  %v8247_v16 = vrot.slane %v6686_v41, 1  ;;  %v5135_v27 = vld [vmem:[%s5285_s17 + $0xa8] sm:$0xff] }
 0x1e2   : > { %v8248_v52 = vrot.slane %v6660_v50, 1  ;;  %1253 = vrot.lane.b32.xlu1 %v1196_v22, %s5198_s14  ;;  %v4100_v2 = vadd.f32 %v4046_v40, %v3976_v3  ;;  %v3643_v38 = vsel %vm439_vm0, %v3641_v60, %v3642_v59  ;;  %v3158_v13 = vcombine.low %v2728_v9, %v2730_v18  ;;  %v5136_v60 = vld [vmem:[%s5285_s17 + $0x88] sm:$0xf] }
 0x1e3   : > { %v2746_v28 = vcombine.high %v2738_v11, %v2738_v11  ;;  %v6798_v30 = vpop.permute.xlu0 %1051  ;;  %v3694_v26 = vadd.f32 %v3643_v38, %v3554_v10  ;;  %v3767_v36 = vsel %vm580_vm1, %v3765_v54, %v3766_v6  ;;  %v1309_v0 = vsel %vm1287_vm3, %v5135_v27, %v6344_v42 }
 0x1e4   : > { %v1101_v25 = vsel %vm439_vm0, %v8248_v52, %v8247_v16  ;;  %v1461_v50 = vsel %vm1442_vm8, %v1430_v33, %v6637_v55  ;;  %v6806_v58 = vpop.permute.xlu1 %772  ;;  %v4118_v22 = vsub.s32 6, %v5605_v32  ;;  %v1340_v59 = vsel %vm1318_vm4, %v1309_v0, %v6407_v34  ;;  %v8251_v0 = vld [vmem:[#allocation7_spill] sm:$0xff] }
 0x1e5   : > { %v1492_v9 = vsel %vm1473_vm9, %v1461_v50, %v6648_v37  ;;  %v3159_v18 = vcombine.low %v2738_v11, %v2746_v28  ;;  %1158 = vrot.lane.b32.xlu0 %v1101_v25, %s5197_s23  ;;  %v3818_v6 = vadd.f32 %v3767_v36, %v3694_v26  ;;  %v1371_v42 = vsel %vm1349_vm5, %v1340_v59, %v6443_v21 }
 0x1e6   : > { %v1523_v24 = vsel %vm1504_vm10, %v1492_v9, %v1234_v46  ;;  %689 = vrot.lane.b32.xlu1 %v6293_v44, %s5193_s21  ;;  %v1402_v55 = vsel %vm1380_vm6, %v1371_v42, %v6468_v31  ;;  %v3166_v34 = vrot.slane %v3158_v13, %v5618_v39  ;;  %v1305_v3 = vsel %vm1287_vm3, %v5136_v60, %v6445_v56  ;;  %v6833_v44 = vld [vmem:[%s8206_s6 + $0x28] sm:$0xff]  ;;  %v8254_v60 = vld [vmem:[#allocation16_spill] sm:$0xff] }
 0x1e7   : > { %v3173_v15 = vrot.slane %v3159_v18, %v5618_v39  ;;  %v6823_v37 = vpop.permute.xlu0 %770  ;;  %v1433_v21 = vsel %vm1411_vm7, %v1402_v55, %v6553_v29  ;;  %v6836_v31 = vrot.slane %v6321_v47, %v4118_v22  ;;  %v1818_v11 = vrot.slane %v1523_v24, %v5618_v39  ;;  %5024 = vmatprep.subr.mxu1 %v6833_v44  ;;  %v8249_v13 = vld [vmem:[#allocation15_spill] sm:$0xff]  ;;  %v8252_v22 = vld [vmem:[#allocation4_spill] sm:$0xff] }
 0x1e8   : > { %v1147_v46 = vpop.permute.xlu1 %1146  ;;  %v1464_v10 = vsel %vm1442_vm8, %v1433_v21, %v6618_v53  ;;  %v1336_v56 = vsel %vm1318_vm4, %v1305_v3, %v6526_v8  ;;  %v1803_v59 = vcombine.high %v8252_v22, %v8252_v22  ;;  %v1811_v55 = vcombine.high %v1523_v24, %v1523_v24 }
 0x1e9   : > { %v3174_v54 = vcombine.low %v3166_v34, %v3173_v15  ;;  %548 = vrot.lane.b32.xlu0 %v6249_v5, %s5191_s19  ;;  %v1495_v29 = vsel %vm1473_vm9, %v1464_v10, %v6631_v35  ;;  %v1367_v53 = vsel %vm1349_vm5, %v1336_v56, %v6598_v62  ;;  %v5137_v35 = vld [vmem:[%s5285_s17 + $0xb0] sm:$0xff]  ;;  %v1826_v52 = vcombine.high %v1818_v11, %v1818_v11 }
 0x1ea   : > { %877 = vrot.lane.b32.xlu1 %v6549_v20, %s5194_s22  ;;  %v1526_v40 = vsel %vm1504_vm10, %v1495_v29, %v6675_v63  ;;  %v1398_v8 = vsel %vm1380_vm6, %v1367_v53, %v6620_v43  ;;  %v1310_v62 = vsel %vm1287_vm3, %v5137_v35, %v6489_v57  ;;  %v8255_v21 = vrot.slane %v6686_v41, 2 }
 0x1eb   : > { %v6856_v5 = vsel %vm3040_vm13, %v3174_v54, 0.0  ;;  %v6858_v33 = vpop.permute.xlu0 %1045  ;;  %v1429_v63 = vsel %vm1411_vm7, %v1398_v8, %v6657_v7  ;;  %v1852_v43 = vcombine.high %v1526_v40, %v1526_v40  ;;  %v6876_v38 = vrot.slane %v1526_v40, %v5618_v39  ;;  %v8250_v7 = vld [vmem:[#allocation5_spill] sm:$0xff] }
 0x1ec   : > { %v6862_v16 = vpop.permute.xlu1 %530  ;;  %v4120_v20 = vmul.f32 %v6836_v31, %v6856_v5  ;;  %v3838_v25 = vmul.f32 %v6594_v17, %v6856_v5  ;;  %v1460_v28 = vsel %vm1442_vm8, %v1429_v63, %v8249_v13  ;;  %v1341_v26 = vsel %vm1318_vm4, %v1310_v62, %v8250_v7 }
 0x1ed   : > { %782 = vrot.lane.b32.xlu0 %v6529_v4, %s5190_s18  ;;  %v1491_v4 = vsel %vm1473_vm9, %v1460_v28, %v6779_v49  ;;  %v1372_v50 = vsel %vm1349_vm5, %v1341_v26, %v8251_v0  ;;  %v2213_v34 = vcombine.low %v1818_v11, %v1826_v52  ;;  %v1867_v15 = vcombine.high %v6876_v38, %v6876_v38 }
 0x1ee   : > { %1065 = vrot.lane.b32.xlu1 %v6686_v41, %s5192_s20  ;;  %v6882_v57 = vadd.f32 %v4120_v20, %v4100_v2  ;;  %v6888_v27 = vadd.f32 %v3838_v25, %v3818_v6  ;;  %v8253_v2 = vld [vmem:[#allocation8_spill] sm:$0xff]  ;;  %v1866_v6 = vrot.slane %v1852_v43, %v5618_v39  ;;  %v1825_v29 = vrot.slane %v1811_v55, %v5618_v39  ;;  %v8258_v55 = vld [vmem:[#allocation9_spill] sm:$0xff] }
 0x1ef   : > { %v1232_v36 = vpop.permute.xlu0 %1231  ;;  %v1403_v42 = vsel %vm1380_vm6, %v1372_v50, %v8253_v2  ;;  %v2227_v53 = vrot.slane %v2213_v34, %v5618_v39  ;;  %v4154_v43 = vsub.s32 7, %v5605_v32  ;;  %v8259_v34 = vld [vmem:[#allocation6_spill] sm:$0xff] }
 0x1f0   : > { %v1522_v9 = vsel %vm1504_vm10, %v1491_v4, %v1232_v36  ;;  %v6895_v18 = vpop.permute.xlu1 %867  ;;  %v1434_v3 = vsel %vm1411_vm7, %v1403_v42, %v8254_v60  ;;  %v2263_v20 = vcombine.low %v1867_v15, %v1866_v6  ;;  %v1868_v35 = vcombine.high %v1866_v6, %v1866_v6  ;;  %v5138_v6 = vld [vmem:[%s5285_s17 + $0xb8] sm:$0xf]  ;;  %v8260_v15 = vld [vmem:[#allocation10_spill] sm:$0xff] }
 0x1f1   : > { %v1810_v49 = vrot.slane %v1522_v9, %v5618_v39  ;;  %972 = vrot.lane.b32.xlu0 %v6556_v12, %s5196_s12  ;;  %v1465_v24 = vsel %vm1442_vm8, %v1434_v3, %v6798_v30  ;;  %v2731_v12 = vcombine.high %v6772_v19, %v6772_v19  ;;  %v8256_v30 = vrot.slane %v6686_v41, 1  ;;  %s4828_s12 = sshll.u32 %s5172_s27, 3 }
 0x1f2   : > { %1255 = vrot.lane.b32.xlu1 %v8255_v21, %s5198_s14  ;;  %v1496_v11 = vsel %vm1473_vm9, %v1465_v24, %v1147_v46  ;;  %v1827_v13 = vcombine.high %v1825_v29, %v1825_v29  ;;  %v2271_v28 = vrot.slane %v2263_v20, %v5618_v39  ;;  %v8257_v4 = vmov 0.0   ;;  %p7978_p7 = scmp.lt.s32.totalorder %s4828_s12, 15 }
 0x1f3   : > { %v2212_v10 = vcombine.low %v1803_v59, %v1810_v49  ;;  %v6912_v54 = vpop.permute.xlu0 %865  ;;  %v2745_v63 = vrot.slane %v2731_v12, %v5618_v39  ;;  %v6948_v2 = vrot.slane %v6321_v47, %v4154_v43  ;;  %v1369_v49 = vsel %vm1349_vm5, %v8259_v34, %v8258_v55  ;;  %v8261_v47 = vld [vmem:[#allocation11_spill] sm:$0xff]  ;;  %v8262_v12 = vld [vmem:[#allocation14_spill] sm:$0xff]  ;;  %s8016_s14 = scalar_select %p3036_p8, 1, 0 }
 0x1f4   : > { %v1242_v56 = vpop.permute.xlu1 %1241  ;;  %v6950_v42 = vcombine.low %v1825_v29, %v1827_v13  ;;  %v1311_v60 = vsel %vm1287_vm3, %v5138_v6, %v8260_v15  ;;  %v1400_v24 = vsel %vm1380_vm6, %v1369_v49, %v8261_v47  ;;  %s8299_s12 = smov (!%p7978_p7, %s4828_s12), 15 }
 0x1f5   : > { %v2220_v40 = vrot.slane %v2212_v10, %v5618_v39  ;;  %v6921_v8 = vsel %vm1504_vm10, %v1496_v11, %v1242_v56  ;;  %1160 = vrot.lane.b32.xlu0 %v8256_v30, %s5197_s23  ;;  %v2747_v50 = vcombine.high %v2745_v63, %v2745_v63  ;;  %v5139_v10 = vld [vmem:[%s5285_s17 + $0xc0] sm:$0xff]  ;;  %v8263_v56 = vld [vmem:[#allocation17_spill] sm:$0xff]  ;;  %s4829_s16 = sshll.u32 %s8299_s12, 1 }
 0x1f6   : > { %v6928_v19 = vrot.slane %v6921_v8, %v5618_v39  ;;  %v1312_v11 = vsel %vm1287_vm3, %v5139_v10, %v8262_v12  ;;  %v1342_v29 = vsel %vm1318_vm4, %v1311_v60, %v8263_v56  ;;  %v4442_v30 = vld [vmem:[%s8206_s6 + $0x18] sm:$0xff]  ;;  %s8032_s27 = sadd.s32 %s4830_s24, %s4829_s16 }
 0x1f7   : > { %v6930_v46 = vpop.permute.xlu0 %1140  ;;  %v2228_v62 = vcombine.low %v2220_v40, %v2227_v53  ;;  %v6973_v53 = vld [vmem:[%s8204_s4 + $0x8] ss:$0 sm:$0xff]  ;;  %v3175_v20 = vcombine.low %v2745_v63, %v2747_v50  ;;  %v1869_v63 = vcombine.high %v6921_v8, %v6921_v8  ;;  %s4831_s28 = sshll.u32 %s8032_s27, 3 }
 0x1f8   : > { %v2264_v52 = vcombine.low %v1868_v35, %v6928_v19  ;;  %v6934_v25 = vpop.permute.xlu1 %671  ;;  %8264 = vst [vmem:[#allocation15_spill] sm:$0xff] %v6973_v53  ;;  %v1343_v35 = vsel %vm1318_vm4, %v1312_v11, %v6774_v51  ;;  %v4441_v51 = vld [vmem:[%s8206_s6 + $0x10] sm:$0xff]  ;;  %v4440_v50 = vld [vmem:[%s8206_s6 + $0x8] sm:$0xff]  ;;  %s8063_s13 = scalar_lea.vmem %s8201_s1, %s4831_s28  ;;  %s8100_s20 = scalar_lea.vmem %s8208_s8, %s4831_s28 }
 0x1f9   : > { %v2516_v41 = vpop.f32.mrf.mxu0  ;;  %4995 = vmatmul.mubr.msk.f32.gmra.mxu0 %vm2373_vm11, %v2228_v62  ;;  %v3183_v34 = vrot.slane %v3175_v20, %v5618_v39  ;;  %v7037_v60 = vrot.slane %v1869_v63, %v5618_v39 }
 0x1fa   : > { %v2278_v7 = vrot.slane %v2264_v52, %v5618_v39  ;;  %v2517_v26 = vadd.f32 %v6218_v48, %v2516_v41  ;;  %4997 = vmatprep.mubr.msk.f32.mxu0 %vm5199_vm2, %v8257_v4  ;;  %v4443_v48 = vld [vmem:[%s8206_s6 + $0x20] sm:$0xff]  ;;  %v1374_v41 = vsel %vm1349_vm5, %v1343_v35, %v6806_v58  ;;  %v1373_v58 = vsel %vm1349_vm5, %v1342_v29, %v6823_v37 }
 0x1fb   : > { %v4975_v36 = vpop.f32.mrf.mxu0  ;;  %v6943_v0 = vpop.permute.xlu0 %540  ;;  %v7067_v35 = vmul.f32 %v6337_v23, %v6856_v5 }
 0x1fc   : > { %v2606_v22 = vmax.f32 %v2517_v26, 0.0  ;;  %v6945_v59 = vpop.permute.xlu1 %962  ;;  %v2279_v9 = vcombine.low %v2271_v28, %v2278_v7  ;;  %v7005_v26 = vmul.f32 %v6948_v2, %v6856_v5 }
 0x1fe   : > { %v2748_v3 = vcombine.high %v2606_v22, %v2606_v22  ;;  %v2755_v21 = vrot.slane %v2606_v22, %v5618_v39  ;;  %5004 = vmatmul.mubr.msk.f32.vlgmr.msra.gmra.mxu1 %vm2373_vm11, %v2279_v9  ;;  %v8265_v22 = vld [vmem:[#allocation12_spill] sm:$0xff]  ;;  %v4204_v12 = vrot.slane %v7005_v26, 1 }
 0x1ff   : > { %v6975_v40 = vpop.permute.xlu0 %960  ;;  %5006 = vmatprep.mubr.msk.f32.mxu1 %vm5199_vm2, %v8257_v4  ;;  %5025 = vmatpush3.msra.mxu1 %v6833_v44  ;;  %v1431_v44 = vsel %vm1411_vm7, %v1400_v24, %v6753_v61  ;;  %v7009_v61 = vmul.f32 %v6973_v53, %v6856_v5  ;;  %v7020_v9 = vmul.f32 %v8265_v22, %v6856_v5  ;;  %v4439_v24 = vld [vmem:[%s8206_s6] sm:$0xff] }
 0x200   : > { %v6986_v62 = vrot.slane %v2748_v3, %v5618_v39  ;;  %v2763_v52 = vcombine.high %v2755_v21, %v2755_v21  ;;  %v6988_v43 = vpop.permute.xlu1 %681  ;;  %5026 = vmatprep.subr.mxu1 %v4443_v48  ;;  %v1462_v8 = vsel %vm1442_vm8, %v1431_v44, %v6858_v33  ;;  %v1884_v3 = vcombine.high %v6928_v19, %v6928_v19 }
 0x201   : > { %5027 = vmatpush3.msra.mxu1 %v4443_v48  ;;  %v8266_v48 = vld [vmem:[#allocation13_spill] sm:$0xff]  ;;  %v1493_v37 = vsel %vm1473_vm9, %v1462_v8, %v6930_v46  ;;  %v4328_v11 = vrot.slane %v7009_v61, 2  ;;  %v7055_v19 = vmul.f32 %v6357_v45, %v6856_v5  ;;  %v3925_v29 = vrot.slane %v7020_v9, 1 }
 0x202   : > { %v3176_v28 = vcombine.low %v2755_v21, %v2763_v52  ;;  %v3198_v7 = vrot.slane %v6986_v62, %v5618_v39  ;;  %5028 = vmatprep.subr.mxu1 %v4442_v30  ;;  %v7024_v55 = vmul.f32 %v8266_v48, %v6856_v5  ;;  %v8268_v21 = vld [vmem:[#allocation2_spill] sm:$0xff]  ;;  %v7071_v52 = vsel %vm1380_vm6, %v1374_v41, %v6895_v18 }
 0x203   : > { %v1236_v36 = vpop.permute.xlu0 %1235  ;;  %5029 = vmatpush3.msra.mxu1 %v4442_v30  ;;  %v7063_v20 = vmul.f32 %v8268_v21, %v6856_v5  ;;  %v1404_v5 = vsel %vm1380_vm6, %v1373_v58, %v6912_v54 }
 0x204   : > { %v3190_v33 = vrot.slane %v3176_v28, %v5618_v39  ;;  %v7032_v6 = vsel %vm3045_vm15, %v3198_v7, 0.0  ;;  %v7034_v15 = vpop.permute.xlu1 %1053  ;;  %5030 = vmatprep.subr.mxu1 %v4441_v51  ;;  %v7044_v46 = vsel %vm1504_vm10, %v1493_v37, %v1236_v36  ;;  %v7086_v7 = vcombine.low %v1884_v3, %v7037_v60 }
 0x205   : > { %v3596_v47 = vmul.f32 %v8268_v21, %v7032_v6  ;;  %5031 = vmatpush3.msra.mxu1 %v4441_v51  ;;  %v4158_v63 = vmul.f32 %v6948_v2, %v7032_v6  ;;  %v1835_v51 = vrot.slane %v7044_v46, %v5618_v39  ;;  %v4282_v41 = vmul.f32 %v6973_v53, %v7032_v6 }
 0x206   : > { %v7049_v10 = vcombine.low %v3183_v34, %v3190_v33  ;;  %5032 = vmatprep.subr.mxu1 %v4440_v50  ;;  %v3877_v54 = vmul.f32 %v8265_v22, %v7032_v6  ;;  %v1435_v58 = vsel %vm1411_vm7, %v1404_v5, %v6975_v40 }
 0x207   : > { %v7057_v56 = vpop.permute.xlu0 %764  ;;  %5033 = vmatpush3.msra.mxu1 %v4440_v50  ;;  %v3649_v18 = vrot.slane %v3596_v47, 1  ;;  %v1843_v61 = vcombine.high %v1835_v51, %v1835_v51  ;;  %v4207_v33 = vrot.slane %v4158_v63, 1  ;;  %v4331_v30 = vrot.slane %v4282_v41, 2  ;;  %v7119_v63 = vld [vmem:[%s8203_s3] ss:$0 sm:$0xff] }
 0x208   : > { %v7075_v44 = vmul.f32 %v8268_v21, %v7049_v10  ;;  %v7081_v28 = vpop.permute.xlu1 %774  ;;  %5034 = vmatprep.subr.mxu1 %v4439_v24  ;;  %v4157_v8 = vmul.f32 %v6948_v2, %v7049_v10  ;;  %v4281_v36 = vmul.f32 %v6973_v53, %v7049_v10  ;;  %v4121_v9 = vmul.f32 %v6836_v31, %v7049_v10 }
 0x209   : > { %5035 = vmatpush3.msra.mxu1 %v4439_v24  ;;  %v3876_v34 = vmul.f32 %v8265_v22, %v7049_v10  ;;  %v2230_v3 = vcombine.low %v1835_v51, %v1843_v61  ;;  %v4000_v5 = vmul.f32 %v8266_v48, %v7049_v10 }
 0x20a   : > { %v8225_v26 = vrot.slane %v7075_v44, 1  ;;  %v4205_v24 = vrot.slane %v4157_v8, 1  ;;  %v4329_v13 = vrot.slane %v4281_v36, 2  ;;  %v4137_v40 = vadd.f32 %v4121_v9, %v6770_v1 }
 0x20b   : > { %v7099_v50 = vpop.permute.xlu0 %1055  ;;  %v2244_v21 = vrot.slane %v2230_v3, %v5618_v39  ;;  %v2764_v1 = vcombine.high %v6986_v62, %v6986_v62  ;;  %v8269_v36 = vrot.slane %v6950_v42, %v5618_v39  ;;  %v3928_v62 = vrot.slane %v3877_v54, 1 }
 0x20c   : > { %v7108_v37 = vsel %vm439_vm0, %v8225_v26, %v3649_v18  ;;  %v1149_v47 = vpop.permute.xlu1 %1148  ;;  %v4206_v22 = vsel %vm439_vm0, %v4204_v12, %v4205_v24  ;;  %v4208_v53 = vsel %vm439_vm0, %v4205_v24, %v4207_v33  ;;  %v3926_v18 = vrot.slane %v3876_v34, 1 }
 0x20d   : > { %v4260_v61 = vadd.f32 %v4206_v22, %v6882_v57  ;;  %v4330_v8 = vsel %vm580_vm1, %v4328_v11, %v4329_v13  ;;  %v4001_v12 = vmul.f32 %v8266_v48, %v7032_v6  ;;  %v2245_v9 = vcombine.low %v8269_v36, %v2244_v21 }
 0x20e   : > { %v2521_v49 = vpop.f32.mrf.mxu0  ;;  %v4261_v3 = vadd.f32 %v4208_v53, %v4137_v40  ;;  %v3927_v57 = vsel %vm439_vm0, %v3925_v29, %v3926_v18  ;;  %v4050_v42 = vrot.slane %v4000_v5, 2  ;;  %v3839_v21 = vmul.f32 %v6594_v17, %v7049_v10 }
 0x20f   : > { %v2522_v51 = vadd.f32 %v7119_v63, %v2521_v49  ;;  %v7124_v41 = vpop.permute.xlu0 %859  ;;  %v4332_v49 = vsel %vm580_vm1, %v4329_v13, %v4331_v30  ;;  %v7136_v26 = vadd.f32 %v4330_v8, %v4260_v61  ;;  %4998 = vmatmul.mubr.msk.f32.gmra.mxu0 %vm2373_vm11, %v2245_v9  ;;  %v3978_v11 = vadd.f32 %v3927_v57, %v6888_v27 }
 0x210   : > { %v7133_v34 = vpop.permute.xlu1 %869  ;;  %v4978_v33 = vpop.f32.mrf.mxu0  ;;  %v7140_v22 = vadd.f32 %v4332_v49, %v4261_v3  ;;  %v1466_v13 = vsel %vm1442_vm8, %v1435_v58, %v7034_v15  ;;  %5000 = vmatprep.mubr.msk.f32.mxu0 %vm5199_vm2, %v8257_v4  ;;  %v3929_v29 = vsel %vm439_vm0, %v3926_v18, %v3928_v62  ;;  %v8270_v27 = vrot.slane %v7024_v55, 2 }
 0x211   : > { %v2607_v24 = vmax.f32 %v2522_v51, 0.0  ;;  %v1497_v40 = vsel %vm1473_vm9, %v1466_v13, %v1149_v47  ;;  %v3855_v61 = vadd.f32 %v3839_v21, %v6761_v14  ;;  %v3646_v15 = vrot.slane %v7063_v20, 1 }
 0x212   : > { %v4051_v5 = vsel %vm580_vm1, %v8270_v27, %v4050_v42  ;;  %v4052_v33 = vrot.slane %v4001_v12, 2  ;;  %v1885_v47 = vcombine.high %v7037_v60, %v7037_v60  ;;  %v2288_v49 = vrot.slane %v7086_v7, %v5618_v39 }
 0x213   : > { %v2765_v53 = vcombine.high %v2607_v24, %v2607_v24  ;;  %v2772_v30 = vrot.slane %v2607_v24, %v5618_v39  ;;  %v1151_v54 = vpop.permute.xlu0 %1150  ;;  %v4102_v55 = vadd.f32 %v4051_v5, %v3978_v11  ;;  %v1436_v14 = vsel %vm1411_vm7, %v7071_v52, %v6945_v59 }
 0x214   : > { %v1244_v51 = vpop.permute.xlu1 %1243  ;;  %v1828_v12 = vcombine.high %v7044_v46, %v7044_v46  ;;  %v4053_v60 = vsel %vm580_vm1, %v4050_v42, %v4052_v33  ;;  %v8271_v57 = vrot.slane %v7075_v44, 1  ;;  %v1467_v46 = vsel %vm1442_vm8, %v1436_v14, %v7099_v50  ;;  %v5142_v14 = vld [vmem:[%s5285_s17 + $0xc8] sm:$0xff] }
 0x215   : > { %v7158_v58 = vrot.slane %v2765_v53, %v5618_v39  ;;  %v2780_v8 = vcombine.high %v2772_v30, %v2772_v30  ;;  %v3199_v36 = vcombine.low %v2764_v1, %v2772_v30  ;;  %v1528_v9 = vsel %vm1504_vm10, %v1497_v40, %v1244_v51 }
 0x216   : > { %v1892_v18 = vrot.slane %v1528_v9, %v5618_v39  ;;  %v3979_v1 = vadd.f32 %v3929_v29, %v3855_v61  ;;  %v3648_v7 = vsel %vm439_vm0, %v3646_v15, %v8271_v57  ;;  %v3719_v42 = vmul.f32 %v6337_v23, %v7049_v10  ;;  %v5141_v15 = vld [vmem:[%s5285_s17 + $0xa0] sm:$0xf] }
 0x217   : > { %v3200_v20 = vcombine.low %v2780_v8, %v7158_v58  ;;  %v955_v3 = vpop.permute.xlu0 %954  ;;  %v3207_v11 = vrot.slane %v3199_v36, %v5618_v39  ;;  %v3696_v21 = vadd.f32 %v3648_v7, %v7055_v19  ;;  %v3557_v44 = vmul.f32 %v6357_v45, %v7049_v10 }
 0x218   : > { %v2281_v62 = vcombine.low %v1885_v47, %v1892_v18  ;;  %v7172_v24 = vpop.permute.xlu1 %964  ;;  %v7180_v52 = vadd.f32 %v4053_v60, %v3979_v1  ;;  %v3720_v53 = vmul.f32 %v6337_v23, %v7032_v6  ;;  %v1498_v29 = vsel %vm1473_vm9, %v1467_v46, %v1151_v54 }
 0x219   : > { %v3214_v59 = vrot.slane %v3200_v20, %v5618_v39  ;;  %v3770_v19 = vrot.slane %v7067_v35, 2  ;;  %v3771_v5 = vrot.slane %v3719_v42, 2  ;;  %v3697_v61 = vadd.f32 %v7108_v37, %v3557_v44 }
 0x21a   : > { %v2295_v13 = vrot.slane %v2281_v62, %v5618_v39  ;;  %v1308_v10 = vsel %vm1287_vm3, %v5141_v15, %v6862_v16  ;;  %v1842_v36 = vrot.slane %v1828_v12, %v5618_v39  ;;  %v1313_v20 = vsel %vm1287_vm3, %v5142_v14, %v6943_v0 }
 0x21b   : > { %v3215_v30 = vcombine.low %v3207_v11, %v3214_v59  ;;  %v1246_v40 = vpop.permute.xlu0 %1245  ;;  %v1339_v35 = vsel %vm1318_vm4, %v1308_v10, %v6934_v25  ;;  %v3772_v16 = vsel %vm580_vm1, %v3770_v19, %v3771_v5  ;;  %v1344_v59 = vsel %vm1318_vm4, %v1313_v20, %v6988_v43 }
 0x21c   : > { %v1529_v51 = vsel %vm1504_vm10, %v1498_v29, %v1246_v40  ;;  %v1058_v50 = vpop.permute.xlu1 %1057  ;;  %v2296_v27 = vcombine.low %v2288_v49, %v2295_v13  ;;  %v3820_v18 = vadd.f32 %v3772_v16, %v3696_v21  ;;  %v3773_v49 = vrot.slane %v3720_v53, 2 }
 0x21d   : > { %v7201_v6 = vsel %vm3040_vm13, %v3215_v30, 0.0  ;;  %v1893_v54 = vcombine.high %v1529_v51, %v1529_v51  ;;  %v1900_v8 = vrot.slane %v1529_v51, %v5618_v39  ;;  %v1370_v1 = vsel %vm1349_vm5, %v1339_v35, %v7057_v56 }
 0x21e   : > { %5007 = vmatmul.mubr.msk.f32.gmra.mxu1 %vm2373_vm11, %v2296_v27  ;;  %v4122_v37 = vmul.f32 %v6836_v31, %v7201_v6  ;;  %v3840_v25 = vmul.f32 %v6594_v17, %v7201_v6  ;;  %v1401_v60 = vsel %vm1380_vm6, %v1370_v1, %v7124_v41  ;;  %v3774_v0 = vsel %vm580_vm1, %v3771_v5, %v3773_v49 }
 0x21f   : > { %v1907_v9 = vrot.slane %v1893_v54, %v5618_v39  ;;  %v1908_v33 = vcombine.high %v1900_v8, %v1900_v8  ;;  %v1048_v47 = vpop.permute.xlu0 %1047  ;;  %5009 = vmatprep.mubr.msk.f32.mxu1 %vm5199_vm2, %v8257_v4  ;;  %v1432_v21 = vsel %vm1411_vm7, %v1401_v60, %v955_v3  ;;  %v1844_v46 = vcombine.high %v1842_v36, %v1842_v36 }
 0x220   : > { %v7221_v12 = vpop.permute.xlu1 %544  ;;  %v7223_v62 = vadd.f32 %v4122_v37, %v4102_v55  ;;  %v7227_v11 = vadd.f32 %v3840_v25, %v3820_v18  ;;  %v1463_v13 = vsel %vm1442_vm8, %v1432_v21, %v1048_v47  ;;  %v7234_v42 = vadd.f32 %v3774_v0, %v3697_v61 }
 0x221   : > { %v1909_v57 = vcombine.high %v1907_v9, %v1907_v9  ;;  %v2297_v7 = vcombine.low %v1900_v8, %v1908_v33  ;;  %v1375_v41 = vsel %vm1349_vm5, %v1344_v59, %v7081_v28  ;;  %v2246_v51 = vcombine.low %v1842_v36, %v1844_v46 }
 0x222   : > { %v1406_v43 = vsel %vm1380_vm6, %v1375_v41, %v7133_v34  ;;  %v2781_v60 = vcombine.high %v7158_v58, %v7158_v58 }
 0x223   : > { %v2298_v56 = vcombine.low %v1907_v9, %v1909_v57  ;;  %v1143_v55 = vpop.permute.xlu0 %1142  ;;  %v2305_v3 = vrot.slane %v2297_v7, %v5618_v39  ;;  %v1437_v40 = vsel %vm1411_vm7, %v1406_v43, %v7172_v24 }
 0x224   : > { %v1494_v44 = vsel %vm1473_vm9, %v1463_v13, %v1143_v55  ;;  %v1238_v53 = vpop.permute.xlu1 %1237  ;;  %v1468_v28 = vsel %vm1442_vm8, %v1437_v40, %v1058_v50 }
 0x225   : > { %v2312_v30 = vrot.slane %v2298_v56, %v5618_v39  ;;  %v1525_v29 = vsel %vm1504_vm10, %v1494_v44, %v1238_v53 }
 0x226   : > { %v1851_v19 = vrot.slane %v1525_v29, %v5618_v39 }
 0x227   : > { %v1153_v27 = vpop.permute.xlu0 %1152  ;;  %v2313_v5 = vcombine.low %v2305_v3, %v2312_v30 }
 0x228   : > { %v2247_v61 = vcombine.low %v1851_v19, %v6876_v38  ;;  %v1499_v34 = vsel %vm1473_vm9, %v1468_v28, %v1153_v27  ;;  %v1248_v15 = vpop.permute.xlu1 %1247  ;;  %v2254_v38 = vrot.slane %v2246_v51, %v5618_v39  ;;  %v4159_v51 = vmul.f32 %v6948_v2, %v7201_v6  ;;  %v8272_v28 = vld [vmem:[#allocation15_spill] sm:$0xff] }
 0x229   : > { %v1530_v10 = vsel %vm1504_vm10, %v1499_v34, %v1248_v15  ;;  %v2526_v54 = vpop.f32.mrf.mxu0  ;;  %5010 = vmatmul.mubr.msk.f32.gmra.mxu1 %vm2373_vm11, %v2313_v5  ;;  %v4283_v27 = vmul.f32 %v8272_v28, %v7201_v6  ;;  %v8273_v34 = vld [vmem:[#allocation12_spill] sm:$0xff] }
 0x22a   : > { %v2261_v8 = vrot.slane %v2247_v61, %v5618_v39  ;;  %v1910_v24 = vcombine.high %v1530_v10, %v1530_v10  ;;  %v1917_v35 = vrot.slane %v1530_v10, %v5618_v39  ;;  %v2527_v36 = vadd.f32 %v7119_v63, %v2526_v54  ;;  %5012 = vmatprep.mubr.msk.f32.mxu1 %vm5199_vm2, %v8257_v4 }
 0x22b   : > { %v4981_v50 = vpop.f32.mrf.mxu0  ;;  %v686_v37 = vpop.permute.xlu0 %685  ;;  %v7279_v15 = vmul.f32 %v8273_v34, %v7201_v6 }
 0x22c   : > { %v1924_v16 = vrot.slane %v1910_v24, %v5618_v39  ;;  %v1925_v9 = vcombine.high %v1917_v35, %v1917_v35  ;;  %v2608_v33 = vmax.f32 %v2527_v36, 0.0  ;;  %v779_v47 = vpop.permute.xlu1 %778  ;;  %v2262_v25 = vcombine.low %v2254_v38, %v2261_v8  ;;  %v5143_v8 = vld [vmem:[%s5285_s17 + $0xd8] sm:$0xff] }
 0x22d   : > { %v2531_v18 = vpop.f32.mrf.mxu0  ;;  %v1315_v24 = vsel %vm1287_vm3, %v5143_v8, %v7221_v12 }
 0x22e   : > { %v1926_v49 = vcombine.high %v1924_v16, %v1924_v16  ;;  %v2314_v14 = vcombine.low %v1917_v35, %v1925_v9  ;;  %v2782_v20 = vcombine.high %v2608_v33, %v2608_v33  ;;  %v2789_v1 = vrot.slane %v2608_v33, %v5618_v39  ;;  %5001 = vmatmul.mubr.msk.f32.gmra.mxu0 %vm2373_vm11, %v2262_v25 }
 0x22f   : > { %v2532_v57 = vadd.f32 %v7119_v63, %v2531_v18  ;;  %v4984_v7 = vpop.f32.mrf.mxu0  ;;  %v543_v59 = vpop.permute.xlu0 %542  ;;  %v7299_v9 = vmul.f32 %v8266_v48, %v7201_v6  ;;  %v1346_v33 = vsel %vm1318_vm4, %v1315_v24, %v686_v37  ;;  %v4209_v18 = vrot.slane %v4159_v51, 1 }
 0x230   : > { %v2315_v21 = vcombine.low %v1924_v16, %v1926_v49  ;;  %v2796_v0 = vrot.slane %v2782_v20, %v5618_v39  ;;  %v2797_v46 = vcombine.high %v2789_v1, %v2789_v1  ;;  %v874_v56 = vpop.permute.xlu1 %873  ;;  %v2322_v13 = vrot.slane %v2314_v14, %v5618_v39  ;;  %v8275_v20 = vld [vmem:[#allocation2_spill] sm:$0xff] }
 0x231   : > { %v3216_v55 = vcombine.low %v2781_v60, %v2789_v1  ;;  %v2609_v43 = vmax.f32 %v2532_v57, 0.0  ;;  %v4333_v25 = vrot.slane %v4283_v27, 2  ;;  %v3930_v14 = vrot.slane %v7279_v15, 1 }
 0x232   : > { %v2329_v41 = vrot.slane %v2315_v21, %v5618_v39  ;;  %v2798_v44 = vcombine.high %v2796_v0, %v2796_v0  ;;  %v3217_v53 = vcombine.low %v2797_v46, %v2796_v0  ;;  %v7306_v1 = vmul.f32 %v8275_v20, %v7201_v6  ;;  %v5144_v46 = vld [vmem:[%s5285_s17 + $0xd0] sm:$0xf] }
 0x233   : > { %v684_v58 = vpop.permute.xlu0 %683  ;;  %v3224_v19 = vrot.slane %v3216_v55, %v5618_v39  ;;  %v2799_v5 = vcombine.high %v2609_v43, %v2609_v43  ;;  %v1377_v0 = vsel %vm1349_vm5, %v1346_v33, %v779_v47 }
 0x234   : > { %v3231_v3 = vrot.slane %v3217_v53, %v5618_v39  ;;  %v3239_v30 = vrot.slane %v2798_v44, %v5618_v39  ;;  %v7269_v29 = vpop.permute.xlu1 %776  ;;  %v2330_v40 = vcombine.low %v2322_v13, %v2329_v41  ;;  %v1314_v13 = vsel %vm1287_vm3, %v5144_v46, %v543_v59 }
 0x235   : > { %v2813_v12 = vrot.slane %v2799_v5, %v5618_v39  ;;  %v4054_v44 = vrot.slane %v7299_v9, 2  ;;  %v2806_v53 = vrot.slane %v2609_v43, %v5618_v39  ;;  %v1408_v8 = vsel %vm1380_vm6, %v1377_v0, %v874_v56 }
 0x236   : > { %v2536_v61 = vpop.f32.mrf.mxu0  ;;  %5013 = vmatmul.mubr.msk.f32.gmra.mxu1 %vm2373_vm11, %v2330_v40  ;;  %v7281_v10 = vcombine.low %v3224_v19, %v3231_v3  ;;  %v7292_v36 = vsel %vm3045_vm15, %v3239_v30, 0.0 }
 0x237   : > { %v7283_v54 = vpop.permute.xlu0 %546  ;;  %5015 = vmatprep.mubr.msk.f32.mxu1 %vm5199_vm2, %v8257_v4  ;;  %v2537_v38 = vadd.f32 %v7119_v63, %v2536_v61  ;;  %v4161_v21 = vmul.f32 %v6948_v2, %v7292_v36  ;;  %v2815_v19 = vcombine.high %v2813_v12, %v2813_v12  ;;  %v4285_v15 = vmul.f32 %v8272_v28, %v7292_v36 }
 0x238   : > { %v7295_v50 = vpop.permute.xlu1 %687  ;;  %v4987_v16 = vpop.f32.mrf.mxu0  ;;  %v4160_v57 = vmul.f32 %v6948_v2, %v7281_v10  ;;  %v4284_v7 = vmul.f32 %v8272_v28, %v7281_v10  ;;  %v4123_v37 = vmul.f32 %v6836_v31, %v7281_v10  ;;  %v3879_v43 = vmul.f32 %v8273_v34, %v7281_v10 }
 0x239   : > { %v2610_v49 = vmax.f32 %v2537_v38, 0.0  ;;  %v4212_v5 = vrot.slane %v4161_v21, 1  ;;  %v7334_v16 = vmul.f32 %v6337_v23, %v7201_v6  ;;  %v2814_v9 = vcombine.high %v2806_v53, %v2806_v53 }
 0x23a   : > { %v4210_v3 = vrot.slane %v4160_v57, 1  ;;  %v4334_v30 = vrot.slane %v4284_v7, 2  ;;  %v4139_v40 = vadd.f32 %v4123_v37, %v7180_v52  ;;  %v1345_v52 = vsel %vm1318_vm4, %v1314_v13, %v684_v58 }
 0x23b   : > { %v969_v60 = vpop.permute.xlu0 %968  ;;  %v2816_v55 = vcombine.high %v2610_v49, %v2610_v49  ;;  %v2823_v51 = vrot.slane %v2610_v49, %v5618_v39  ;;  %v3880_v49 = vmul.f32 %v8273_v34, %v7292_v36  ;;  %v3931_v56 = vrot.slane %v3879_v43, 1 }
 0x23c   : > { %v1062_v41 = vpop.permute.xlu1 %1061  ;;  %v4211_v61 = vsel %vm439_vm0, %v4209_v18, %v4210_v3  ;;  %v4335_v59 = vsel %vm580_vm1, %v4333_v25, %v4334_v30  ;;  %v4213_v18 = vsel %vm439_vm0, %v4210_v3, %v4212_v5  ;;  %v4336_v25 = vrot.slane %v4285_v15, 2 }
 0x23d   : > { %v2830_v27 = vrot.slane %v2816_v55, %v5618_v39  ;;  %v4262_v33 = vadd.f32 %v4211_v61, %v7223_v62  ;;  %v2831_v57 = vcombine.high %v2823_v51, %v2823_v51  ;;  %v4263_v7 = vadd.f32 %v4213_v18, %v4139_v40 }
 0x23e   : > { %v3241_v37 = vcombine.low %v2813_v12, %v2815_v19  ;;  %v4337_v0 = vsel %vm580_vm1, %v4334_v30, %v4336_v25  ;;  %v4003_v46 = vmul.f32 %v8266_v48, %v7281_v10  ;;  %v1439_v13 = vsel %vm1411_vm7, %v1408_v8, %v969_v60 }
 0x23f   : > { %v872_v47 = vpop.permute.xlu0 %871  ;;  %v2832_v24 = vcombine.high %v2830_v27, %v2830_v27  ;;  %v7340_v21 = vadd.f32 %v4335_v59, %v4262_v33  ;;  %v7346_v3 = vadd.f32 %v4337_v0, %v4263_v7  ;;  %v3932_v5 = vsel %vm439_vm0, %v3930_v14, %v3931_v56 }
 0x240   : > { %v967_v38 = vpop.permute.xlu1 %966  ;;  %v3240_v40 = vcombine.low %v2806_v53, %v2814_v9  ;;  %v1376_v12 = vsel %vm1349_vm5, %v1345_v52, %v7269_v29  ;;  %v3980_v19 = vadd.f32 %v3932_v5, %v7227_v11  ;;  %v4055_v61 = vrot.slane %v4003_v46, 2  ;;  %v5145_v53 = vld [vmem:[%s5285_s17 + $0xe0] sm:$0xff] }
 0x241   : > { %v3258_v62 = vcombine.low %v2830_v27, %v2832_v24  ;;  %v7354_v30 = vmul.f32 %v8275_v20, %v7292_v36  ;;  %v7358_v27 = vmul.f32 %v6337_v23, %v7292_v36  ;;  %v4004_v60 = vmul.f32 %v8266_v48, %v7292_v36 }
 0x242   : > { %v3257_v59 = vcombine.low %v2823_v51, %v2831_v57  ;;  %v3255_v14 = vrot.slane %v3241_v37, %v5618_v39  ;;  %v1316_v29 = vsel %vm1287_vm3, %v5145_v53, %v7283_v54  ;;  %v1470_v11 = vsel %vm1442_vm8, %v1439_v13, %v1062_v41 }
 0x243   : > { %v781_v58 = vpop.permute.xlu0 %780  ;;  %v4056_v43 = vsel %vm580_vm1, %v4054_v44, %v4055_v61  ;;  %v3933_v8 = vrot.slane %v3880_v49, 1  ;;  %v3272_v52 = vrot.slane %v3258_v62, %v5618_v39  ;;  %v1407_v24 = vsel %vm1380_vm6, %v1376_v12, %v872_v47 }
 0x244   : > { %v876_v55 = vpop.permute.xlu1 %875  ;;  %v3248_v51 = vrot.slane %v3240_v40, %v5618_v39  ;;  %v7373_v18 = vadd.f32 %v4056_v43, %v3980_v19  ;;  %v3841_v54 = vmul.f32 %v6594_v17, %v7281_v10  ;;  %v3265_v41 = vrot.slane %v3257_v59, %v5618_v39 }
 0x245   : > { %v1347_v44 = vsel %vm1318_vm4, %v1316_v29, %v7295_v50  ;;  %v4057_v49 = vrot.slane %v4004_v60, 2  ;;  %v1438_v7 = vsel %vm1411_vm7, %v1407_v24, %v967_v38  ;;  %v3934_v40 = vsel %vm439_vm0, %v3931_v56, %v3933_v8 }
 0x246   : > { %v3256_v57 = vcombine.low %v3248_v51, %v3255_v14  ;;  %v1378_v37 = vsel %vm1349_vm5, %v1347_v44, %v781_v58  ;;  %v7383_v46 = vcombine.low %v3265_v41, %v3272_v52  ;;  %v3857_v12 = vadd.f32 %v3841_v54, %v7234_v42 }
 0x247   : > { %v1157_v15 = vpop.permute.xlu0 %1156  ;;  %v3558_v19 = vmul.f32 %v6357_v45, %v7201_v6  ;;  %v3651_v38 = vrot.slane %v7306_v1, 1  ;;  %v3654_v58 = vrot.slane %v7354_v30, 1  ;;  %v3778_v60 = vrot.slane %v7358_v27, 2 }
 0x248   : > { %v1501_v9 = vsel %vm1473_vm9, %v1470_v11, %v1157_v15  ;;  %v1252_v36 = vpop.permute.xlu1 %1251  ;;  %v3775_v14 = vrot.slane %v7334_v16, 2  ;;  %v7400_v56 = vsel %vm3040_vm13, %v3256_v57, 0.0  ;;  %v1409_v53 = vsel %vm1380_vm6, %v1378_v37, %v876_v55 }
 0x249   : > { %v1532_v33 = vsel %vm1504_vm10, %v1501_v9, %v1252_v36  ;;  %v3981_v29 = vadd.f32 %v3934_v40, %v3857_v12  ;;  %v3598_v6 = vmul.f32 %v8275_v20, %v7281_v10  ;;  %v7408_v27 = vmul.f32 %v8275_v20, %v7383_v46 }
 0x24a   : > { %v1934_v25 = vcombine.high %v1532_v33, %v1532_v33  ;;  %v1941_v47 = vrot.slane %v1532_v33, %v5618_v39  ;;  %v4058_v16 = vsel %vm580_vm1, %v4055_v61, %v4057_v49  ;;  %v3722_v11 = vmul.f32 %v6337_v23, %v7281_v10 }
 0x24b   : > { %v1060_v0 = vpop.permute.xlu0 %1059  ;;  %v7416_v55 = vmul.f32 %v6337_v23, %v7383_v46  ;;  %v7418_v43 = vadd.f32 %v4058_v16, %v3981_v29  ;;  %v3652_v8 = vrot.slane %v3598_v6, 1  ;;  %v3881_v61 = vmul.f32 %v8273_v34, %v7400_v56 }
 0x24c   : > { %v7386_v62 = vrot.slane %v1934_v25, %v5618_v39  ;;  %v1949_v13 = vcombine.high %v1941_v47, %v1941_v47  ;;  %v1155_v5 = vpop.permute.xlu1 %1154  ;;  %v1469_v50 = vsel %vm1442_vm8, %v1438_v7, %v1060_v0  ;;  %v3776_v9 = vrot.slane %v3722_v11, 2 }
 0x24d   : > { %v1500_v1 = vsel %vm1473_vm9, %v1469_v50, %v1155_v5  ;;  %v3653_v33 = vsel %vm439_vm0, %v3651_v38, %v3652_v8  ;;  %v7428_v54 = vmul.f32 %v8273_v34, %v7383_v46  ;;  %v4005_v41 = vmul.f32 %v8266_v48, %v7400_v56 }
 0x24e   : > { %v2332_v59 = vcombine.low %v1949_v13, %v7386_v62  ;;  %v3698_v57 = vadd.f32 %v3653_v33, %v3558_v19  ;;  %v3842_v7 = vmul.f32 %v6594_v17, %v7400_v56  ;;  %v3777_v37 = vsel %vm580_vm1, %v3775_v14, %v3776_v9 }
 0x24f   : > { %v971_v42 = vpop.permute.xlu0 %970  ;;  %v3935_v0 = vrot.slane %v3881_v61, 1  ;;  %v3936_v13 = vrot.slane %v7428_v54, 1  ;;  %v7439_v5 = vmul.f32 %v8266_v48, %v7383_v46  ;;  %v3559_v12 = vmul.f32 %v6357_v45, %v7281_v10 }
 0x250   : > { %v1250_v30 = vpop.permute.xlu1 %1249  ;;  %v2346_v52 = vrot.slane %v2332_v59, %v5618_v39  ;;  %v1440_v36 = vsel %vm1411_vm7, %v1409_v53, %v971_v42  ;;  %v3822_v50 = vadd.f32 %v3777_v37, %v3698_v57  ;;  %v3655_v14 = vsel %vm439_vm0, %v3652_v8, %v3654_v58 }
 0x251   : > { %v1531_v15 = vsel %vm1504_vm10, %v1500_v1, %v1250_v30  ;;  %v3937_v38 = vsel %vm439_vm0, %v3935_v0, %v3936_v13  ;;  %v4060_v59 = vrot.slane %v7439_v5, 2  ;;  %v3779_v53 = vsel %vm580_vm1, %v3776_v9, %v3778_v60 }
 0x252   : > { %v1933_v24 = vrot.slane %v1531_v15, %v5618_v39  ;;  %v3858_v1 = vadd.f32 %v3842_v7, %v3822_v50  ;;  %v3699_v30 = vadd.f32 %v3655_v14, %v3559_v12  ;;  %v1950_v10 = vcombine.high %v7386_v62, %v7386_v62 }
 0x253   : > { %v1064_v51 = vpop.permute.xlu0 %1063  ;;  %v3843_v58 = vmul.f32 %v6594_v17, %v7383_v46  ;;  %v3657_v62 = vrot.slane %v7408_v27, 1  ;;  %v3781_v9 = vrot.slane %v7416_v55, 2  ;;  %v3600_v61 = vmul.f32 %v8275_v20, %v7400_v56 }
 0x254   : > { %v2331_v44 = vcombine.low %v1933_v24, %v1941_v47  ;;  %v1471_v25 = vsel %vm1442_vm8, %v1440_v36, %v1064_v51  ;;  %v1254_v49 = vpop.permute.xlu1 %1253  ;;  %v4059_v47 = vrot.slane %v4005_v41, 2  ;;  %v3982_v8 = vadd.f32 %v3937_v38, %v3858_v1 }
 0x255   : > { %v3724_v36 = vmul.f32 %v6337_v23, %v7400_v56  ;;  %v3656_v37 = vrot.slane %v3600_v61, 1  ;;  %v7482_v38 = vmul.f32 %v6948_v2, %v7383_v46 }
 0x256   : > { %v2339_v40 = vrot.slane %v2331_v44, %v5618_v39  ;;  %v4061_v11 = vsel %vm580_vm1, %v4059_v47, %v4060_v59  ;;  %v5146_v44 = vld [vmem:[%s5285_s17 + $0xe8] sm:$0xf] }
 0x257   : > { %v1159_v19 = vpop.permute.xlu0 %1158  ;;  %v7472_v57 = vadd.f32 %v4061_v11, %v3982_v8  ;;  %v3780_v50 = vrot.slane %v3724_v36, 2  ;;  %v3658_v14 = vsel %vm439_vm0, %v3656_v37, %v3657_v62  ;;  %v4124_v8 = vmul.f32 %v6836_v31, %v7400_v56 }
 0x258   : > { %v1502_v42 = vsel %vm1473_vm9, %v1471_v25, %v1159_v19  ;;  %v2347_v29 = vcombine.low %v2339_v40, %v2346_v52  ;;  %v690_v6 = vpop.permute.xlu1 %689  ;;  %v3823_v52 = vadd.f32 %v3779_v53, %v3699_v30  ;;  %v3560_v40 = vmul.f32 %v6357_v45, %v7400_v56 }
 0x259   : > { %v1533_v16 = vsel %vm1504_vm10, %v1502_v42, %v1254_v49  ;;  %v3782_v30 = vsel %vm580_vm1, %v3780_v50, %v3781_v9 }
 0x25a   : > { %v1951_v60 = vcombine.high %v1533_v16, %v1533_v16  ;;  %v1958_v15 = vrot.slane %v1533_v16, %v5618_v39  ;;  %5016 = vmatmul.mubr.msk.f32.gmra.mxu1 %vm2373_vm11, %v2347_v29  ;;  %v7474_v7 = vadd.f32 %v3843_v58, %v3823_v52  ;;  %v3700_v1 = vadd.f32 %v3658_v14, %v3560_v40 }
 0x25b   : > { %v549_v24 = vpop.permute.xlu0 %548  ;;  %5018 = vmatprep.mubr.msk.f32.mxu1 %vm5199_vm2, %v8257_v4 }
 0x25c   : > { %v1965_v51 = vrot.slane %v1951_v60, %v5618_v39  ;;  %v1966_v33 = vcombine.high %v1958_v15, %v1958_v15  ;;  %v2348_v41 = vcombine.low %v1950_v10, %v1958_v15  ;;  %v1317_v25 = vsel %vm1287_vm3, %v5146_v44, %v549_v24  ;;  %v878_v49 = vpop.permute.xlu1 %877 }
 0x25d   : > { %v1348_v12 = vsel %vm1318_vm4, %v1317_v25, %v690_v6  ;;  %v4162_v6 = vmul.f32 %v6948_v2, %v7400_v56  ;;  %v7494_v10 = vadd.f32 %v3782_v30, %v3700_v1  ;;  %v4215_v60 = vrot.slane %v7482_v38, 1 }
 0x25e   : > { %v2349_v0 = vcombine.low %v1966_v33, %v1965_v51  ;;  %v2356_v47 = vrot.slane %v2348_v41, %v5618_v39  ;;  %v7506_v24 = vmul.f32 %v8272_v28, %v7383_v46  ;;  %v4286_v44 = vmul.f32 %v8272_v28, %v7400_v56 }
 0x25f   : > { %v783_v19 = vpop.permute.xlu0 %782  ;;  %v4214_v52 = vrot.slane %v4162_v6, 1  ;;  %v1967_v50 = vcombine.high %v1965_v51, %v1965_v51 }
 0x260   : > { %v2363_v53 = vrot.slane %v2349_v0, %v5618_v39  ;;  %v1379_v42 = vsel %vm1349_vm5, %v1348_v12, %v783_v19  ;;  %v1066_v29 = vpop.permute.xlu1 %1065  ;;  %v4339_v40 = vrot.slane %v7506_v24, 2 }
 0x261   : > { %v1410_v11 = vsel %vm1380_vm6, %v1379_v42, %v878_v49  ;;  %v4216_v41 = vsel %vm439_vm0, %v4214_v52, %v4215_v60  ;;  %v4140_v49 = vadd.f32 %v4124_v8, %v7373_v18 }
 0x262   : > { %v2364_v16 = vcombine.low %v2356_v47, %v2363_v53  ;;  %v4338_v53 = vrot.slane %v4286_v44, 2 }
 0x263   : > { %v973_v58 = vpop.permute.xlu0 %972  ;;  %v4264_v56 = vadd.f32 %v4216_v41, %v4140_v49  ;;  %v3561_v49 = vmul.f32 %v6357_v45, %v7383_v46 }
 0x264   : > { %v1441_v15 = vsel %vm1411_vm7, %v1410_v11, %v973_v58  ;;  %5019 = vmatmul.mubr.msk.f32.gmra.mxu1 %vm2373_vm11, %v2364_v16  ;;  %v1256_v61 = vpop.permute.xlu1 %1255  ;;  %v4340_v51 = vsel %vm580_vm1, %v4338_v53, %v4339_v40 }
 0x265   : > { %5021 = vmatprep.mubr.msk.f32.mxu1 %vm5199_vm2, %v8257_v4  ;;  %v1472_v36 = vsel %vm1442_vm8, %v1441_v15, %v1066_v29  ;;  %v7518_v4 = vld [vmem:[%s8205_s5] ss:$0 sm:$0xff]  ;;  %v4388_v11 = vadd.f32 %v4340_v51, %v4264_v56 }
 0x266   : > { %v4407_v14 = vadd.f32 %v7518_v4, %v7136_v26  ;;  %v4408_v18 = vadd.f32 %v7518_v4, %v7140_v22  ;;  %v4409_v1 = vadd.f32 %v7518_v4, %v7340_v21  ;;  %v4410_v22 = vadd.f32 %v7518_v4, %v7346_v3 }
 0x267   : > { %v1161_v33 = vpop.permute.xlu0 %1160 }
 0x268   : > { %v1503_v25 = vsel %vm1473_vm9, %v1472_v36, %v1161_v33  ;;  %v4423_v58 = vmax.f32 %v4407_v14, 0.0  ;;  %v4424_v21 = vmax.f32 %v4408_v18, 0.0  ;;  %v4425_v52 = vmax.f32 %v4409_v1, 0.0 }
 0x269   : > { %v1534_v37 = vsel %vm1504_vm10, %v1503_v25, %v1256_v61  ;;  %v2541_v0 = vpop.f32.mrf.mxu0  ;;  %v4411_v36 = vadd.f32 %v7518_v4, %v4388_v11  ;;  %v4125_v33 = vmul.f32 %v6836_v31, %v7383_v46 }
 0x26a   : > { %v1974_v47 = vrot.slane %v1534_v37, %v5618_v39  ;;  %v2542_v12 = vadd.f32 %v7119_v63, %v2541_v0  ;;  %v4426_v0 = vmax.f32 %v4410_v22, 0.0 }
 0x26b   : > { %v4990_v19 = vpop.f32.mrf.mxu0  ;;  %v4427_v53 = vmax.f32 %v4411_v36, 0.0 }
 0x26c   : > { %v2365_v42 = vcombine.low %v1967_v50, %v1974_v47  ;;  %v2611_v29 = vmax.f32 %v2542_v12, 0.0 }
 0x26e   : > { %v2372_v30 = vrot.slane %v2365_v42, %v5618_v39  ;;  %v2833_v6 = vcombine.high %v2611_v29, %v2611_v29  ;;  %v2840_v16 = vrot.slane %v2611_v29, %v5618_v39  ;;  %v4141_v42 = vadd.f32 %v4125_v33, %v7418_v43 }
 0x270   : > { %v2847_v26 = vrot.slane %v2833_v6, %v5618_v39  ;;  %v2848_v15 = vcombine.high %v2840_v16, %v2840_v16  ;;  %v3280_v8 = vrot.slane %v2840_v16, %v5618_v39  ;;  %5022 = vmatmul.mubr.msk.f32.gmra.mxu1 %vm2373_vm11, %v2372_v30 }
 0x271   : > { %5036 = vmatprep.mubr.msk.f32.mxu1 %vm1442_vm8, %v4423_v58 }
 0x272   : > { %v3281_v24 = vcombine.low %v2848_v15, %v2847_v26  ;;  %v3530_v61 = vsel %vm3045_vm15, %v3280_v8, 0.0  ;;  %v2849_v16 = vcombine.high %v2847_v26, %v2847_v26 }
 0x273   : > { %v3602_v41 = vmul.f32 %v8275_v20, %v3530_v61  ;;  %v3726_v44 = vmul.f32 %v6337_v23, %v3530_v61  ;;  %v3883_v25 = vmul.f32 %v8273_v34, %v3530_v61  ;;  %v4007_v3 = vmul.f32 %v8266_v48, %v3530_v61 }
 0x274   : > { %v4164_v37 = vmul.f32 %v6948_v2, %v3530_v61  ;;  %5037 = vmatmul.mubr.msk.f32.vlgmr.msra.gmra.mxu1 %vm1442_vm8, %v4424_v21  ;;  %v4288_v50 = vmul.f32 %v8272_v28, %v3530_v61  ;;  %v3289_v58 = vrot.slane %v3281_v24, %v5618_v39 }
 0x275   : > { %v3659_v47 = vrot.slane %v3602_v41, 1  ;;  %v3783_v12 = vrot.slane %v3726_v44, 2  ;;  %v3938_v56 = vrot.slane %v3883_v25, 1  ;;  %v4062_v19 = vrot.slane %v4007_v3, 2  ;;  %5039 = vmatprep.mubr.msk.f32.mxu1 %vm1442_vm8, %v4425_v52 }
 0x276   : > { %v4217_v14 = vrot.slane %v4164_v37, 1  ;;  %v4341_v29 = vrot.slane %v4288_v50, 2 }
 0x277   : > { %v3660_v46 = vsel %vm439_vm0, %v3657_v62, %v3659_v47  ;;  %v3784_v18 = vsel %vm580_vm1, %v3781_v9, %v3783_v12  ;;  %v3939_v28 = vsel %vm439_vm0, %v3936_v13, %v3938_v56  ;;  %v4063_v1 = vsel %vm580_vm1, %v4060_v59, %v4062_v19 }
 0x278   : > { %v3701_v51 = vadd.f32 %v3660_v46, %v3561_v49  ;;  %v2546_v30 = vpop.f32.mrf.mxu0  ;;  %5040 = vmatmul.mubr.msk.f32.gmra.mxu1 %vm1442_vm8, %v4426_v0  ;;  %v4218_v27 = vsel %vm439_vm0, %v4215_v60, %v4217_v14  ;;  %v3983_v55 = vadd.f32 %v3939_v28, %v7474_v7  ;;  %v4342_v5 = vsel %vm580_vm1, %v4339_v40, %v4341_v29  ;;  %v7612_v29 = vld [vmem:[%s8204_s4 + $0x8] ss:$0 sm:$0xff] }
 0x279   : > { %v2547_v43 = vadd.f32 %v7119_v63, %v2546_v30  ;;  %5042 = vmatprep.mubr.msk.f32.mxu1 %vm1442_vm8, %v4427_v53  ;;  %v4265_v54 = vadd.f32 %v4218_v27, %v4141_v42 }
 0x27a   : > { %v4993_v13 = vpop.f32.mrf.mxu0  ;;  %v4107_v62 = vadd.f32 %v4063_v1, %v3983_v55  ;;  %v7576_v59 = vadd.f32 %v3784_v18, %v3701_v51 }
 0x27b   : > { %v2612_v9 = vmax.f32 %v2547_v43, 0.0  ;;  %v4389_v6 = vadd.f32 %v4342_v5, %v4265_v54 }
 0x27d   : > { %v2857_v38 = vrot.slane %v2612_v9, %v5618_v39  ;;  %v4412_v60 = vadd.f32 %v7518_v4, %v4389_v6  ;;  %v2850_v24 = vcombine.high %v2612_v9, %v2612_v9 }
 0x27f   : > { %v3282_v11 = vcombine.low %v2849_v16, %v2857_v38  ;;  %v4428_v7 = vmax.f32 %v4412_v60, 0.0  ;;  %v2864_v36 = vrot.slane %v2850_v24, %v5618_v39  ;;  %v2865_v33 = vcombine.high %v2857_v38, %v2857_v38 }
 0x281   : > { %v3296_v15 = vrot.slane %v3282_v11, %v5618_v39  ;;  %5043 = vmatmul.mubr.msk.f32.gmra.mxu1 %vm1442_vm8, %v4428_v7  ;;  %v3298_v3 = vcombine.low %v2865_v33, %v2864_v36  ;;  %v2866_v49 = vcombine.high %v2864_v36, %v2864_v36 }
 0x283   : > { %v3297_v8 = vcombine.low %v3289_v58, %v3296_v15 }
 0x285   : > { %v7585_v40 = vsel %vm3040_vm13, %v3297_v8, 0.0 }
 0x286   : > { %v4126_v26 = vmul.f32 %v6836_v31, %v7585_v40  ;;  %v3844_v22 = vmul.f32 %v6594_v17, %v7585_v40  ;;  %v4165_v53 = vmul.f32 %v6948_v2, %v7585_v40  ;;  %v4289_v46 = vmul.f32 %v7612_v29, %v7585_v40 }
 0x287   : > { %v3884_v30 = vmul.f32 %v8273_v34, %v7585_v40  ;;  %v4008_v54 = vmul.f32 %v8266_v48, %v7585_v40 }
 0x288   : > { %v4142_v21 = vadd.f32 %v4126_v26, %v7472_v57  ;;  %v3860_v52 = vadd.f32 %v3844_v22, %v7494_v10  ;;  %v3306_v57 = vrot.slane %v3298_v3, %v5618_v39  ;;  %v4219_v27 = vrot.slane %v4165_v53, 1  ;;  %v7657_v53 = vld [vmem:[%s8203_s3] ss:$0 sm:$0xff] }
 0x289   : > { %v4343_v38 = vrot.slane %v4289_v46, 2  ;;  %v3940_v58 = vrot.slane %v3884_v30, 1  ;;  %v4064_v36 = vrot.slane %v4008_v54, 2 }
 0x2b9   : > { %v2551_v61 = vpop.f32.mrf.mxu0 }
 0x2ba   : > { %v2552_v41 = vadd.f32 %v7119_v63, %v2551_v61 }
 0x2bb   : > { %v4996_v44 = vpop.f32.mrf.mxu0 }
 0x2bc   : > { %v2613_v25 = vmax.f32 %v2552_v41, 0.0 }
 0x2be   : > { %v2874_v37 = vrot.slane %v2613_v25, %v5618_v39  ;;  %v2566_v0 = vpop.f32.mrf.mxu1 }
 0x2c0   : > { %v2882_v50 = vcombine.high %v2874_v37, %v2874_v37  ;;  %v3299_v47 = vcombine.low %v2866_v49, %v2874_v37  ;;  %v5005_v12 = vpop.f32.mrf.mxu1 }
 0x2c1   : > { %v2867_v12 = vcombine.high %v2613_v25, %v2613_v25 }
 0x2c2   : > { %v3313_v10 = vrot.slane %v3299_v47, %v5618_v39  ;;  %v3321_v56 = vrot.slane %v2882_v50, %v5618_v39 }
 0x2c4   : > { %v7599_v19 = vcombine.low %v3306_v57, %v3313_v10  ;;  %v7603_v14 = vsel %vm3045_vm15, %v3321_v56, 0.0 }
 0x2c5   : > { %v4167_v1 = vmul.f32 %v6948_v2, %v7603_v14  ;;  %v4291_v51 = vmul.f32 %v7612_v29, %v7603_v14 }
 0x2c6   : > { %v4166_v42 = vmul.f32 %v6948_v2, %v7599_v19  ;;  %v4290_v18 = vmul.f32 %v7612_v29, %v7599_v19  ;;  %v4127_v28 = vmul.f32 %v6836_v31, %v7599_v19  ;;  %v7630_v6 = vmul.f32 %v8273_v34, %v7599_v19 }
 0x2c7   : > { %v4222_v5 = vrot.slane %v4167_v1, 1  ;;  %v4346_v9 = vrot.slane %v4291_v51, 2  ;;  %v7635_v60 = vmul.f32 %v8266_v48, %v7599_v19 }
 0x2c8   : > { %v4220_v55 = vrot.slane %v4166_v42, 1  ;;  %v4344_v43 = vrot.slane %v4290_v18, 2  ;;  %v4143_v13 = vadd.f32 %v4127_v28, %v4107_v62  ;;  %v3941_v15 = vrot.slane %v7630_v6, 1 }
 0x2c9   : > { %v4065_v26 = vrot.slane %v7635_v60, 2  ;;  %v2567_v42 = vadd.f32 %v7657_v53, %v2566_v0  ;;  %v3886_v28 = vmul.f32 %v8273_v34, %v7603_v14  ;;  %v3604_v0 = vmul.f32 %v8275_v20, %v7599_v19 }
 0x2ca   : > { %v4221_v16 = vsel %vm439_vm0, %v4219_v27, %v4220_v55  ;;  %v4223_v7 = vsel %vm439_vm0, %v4220_v55, %v4222_v5  ;;  %v4345_v62 = vsel %vm580_vm1, %v4343_v38, %v4344_v43  ;;  %v4347_v24 = vsel %vm580_vm1, %v4344_v43, %v4346_v9 }
 0x2cb   : > { %v4266_v11 = vadd.f32 %v4221_v16, %v4142_v21  ;;  %v4267_v8 = vadd.f32 %v4223_v7, %v4143_v13  ;;  %v3942_v61 = vsel %vm439_vm0, %v3940_v58, %v3941_v15  ;;  %v4066_v44 = vsel %vm580_vm1, %v4064_v36, %v4065_v26 }
 0x2cc   : > { %v3984_v41 = vadd.f32 %v3942_v61, %v3860_v52  ;;  %v2881_v52 = vrot.slane %v2867_v12, %v5618_v39  ;;  %v2616_v25 = vmax.f32 %v2567_v42, 0.0  ;;  %v3845_v5 = vmul.f32 %v6594_v17, %v7599_v19 }
 0x2cd   : > { %v4390_v22 = vadd.f32 %v4345_v62, %v4266_v11  ;;  %v4391_v33 = vadd.f32 %v4347_v24, %v4267_v8  ;;  %v3605_v9 = vmul.f32 %v8275_v20, %v7603_v14  ;;  %v3943_v6 = vrot.slane %v3886_v28, 1 }
 0x2ce   : > { %v7648_v37 = vadd.f32 %v4066_v44, %v3984_v41  ;;  %v2883_v46 = vcombine.high %v2881_v52, %v2881_v52  ;;  %v2918_v27 = vcombine.high %v2616_v25, %v2616_v25  ;;  %v7665_v55 = vrot.slane %v2616_v25, %v5618_v39 }
 0x2cf   : > { %v4413_v21 = vadd.f32 %v7518_v4, %v4390_v22  ;;  %v2556_v3 = vpop.f32.mrf.mxu0  ;;  %v4414_v49 = vadd.f32 %v7518_v4, %v4391_v33  ;;  %v3729_v38 = vmul.f32 %v6337_v23, %v7603_v14  ;;  %v4010_v11 = vmul.f32 %v8266_v48, %v7603_v14 }
 0x2d0   : > { %v2557_v50 = vadd.f32 %v7119_v63, %v2556_v3  ;;  %v3322_v30 = vcombine.low %v2881_v52, %v2883_v46  ;;  %v3603_v7 = vmul.f32 %v8275_v20, %v7585_v40  ;;  %v2932_v62 = vrot.slane %v2918_v27, %v5618_v39 }
 0x2d1   : > { %v4429_v47 = vmax.f32 %v4413_v21, 0.0  ;;  %v4999_v57 = vpop.f32.mrf.mxu0  ;;  %v4430_v10 = vmax.f32 %v4414_v49, 0.0  ;;  %v2933_v8 = vcombine.high %v7665_v55, %v7665_v55  ;;  %v3662_v24 = vrot.slane %v3604_v0, 1 }
 0x2d2   : > { %v2614_v56 = vmax.f32 %v2557_v50, 0.0  ;;  %v3330_v58 = vrot.slane %v3322_v30, %v5618_v39  ;;  %v3861_v33 = vadd.f32 %v3845_v5, %v7576_v59  ;;  %v3664_v41 = vrot.slane %v3605_v9, 1 }
 0x2d3   : > { %5045 = vmatprep.mubr.msk.f32.mxu1 %vm1442_vm8, %v4429_v47  ;;  %v3944_v21 = vsel %vm439_vm0, %v3941_v15, %v3943_v6  ;;  %v3728_v44 = vmul.f32 %v6337_v23, %v7599_v19  ;;  %v3562_v3 = vmul.f32 %v6357_v45, %v7585_v40  ;;  %v3661_v49 = vrot.slane %v3603_v7, 1 }
 0x2d4   : > { %5046 = vmatmul.mubr.msk.f32.gmra.mxu1 %vm1442_vm8, %v4430_v10  ;;  %v2891_v63 = vrot.slane %v2614_v56, %v5618_v39  ;;  %v2884_v16 = vcombine.high %v2614_v56, %v2614_v56  ;;  %v3727_v50 = vmul.f32 %v6337_v23, %v7585_v40  ;;  %v3788_v47 = vrot.slane %v3729_v38, 2 }
 0x2d5   : > { %v4067_v12 = vrot.slane %v4010_v11, 2  ;;  %v7694_v57 = vcombine.low %v2933_v8, %v2932_v62  ;;  %v3985_v15 = vadd.f32 %v3944_v21, %v3861_v33  ;;  %v3663_v42 = vsel %vm439_vm0, %v3661_v49, %v3662_v24 }
 0x2d6   : > { %v2899_v18 = vcombine.high %v2891_v63, %v2891_v63  ;;  %v2898_v14 = vrot.slane %v2884_v16, %v5618_v39  ;;  %v2934_v28 = vcombine.high %v2932_v62, %v2932_v62 }
 0x2d7   : > { %v3378_v30 = vrot.slane %v7694_v57, %v5618_v39 }
 0x2d8   : > { %v3323_v43 = vcombine.low %v2891_v63, %v2899_v18  ;;  %v3665_v63 = vsel %vm439_vm0, %v3662_v24, %v3664_v41  ;;  %v2900_v46 = vcombine.high %v2898_v14, %v2898_v14  ;;  %v3786_v18 = vrot.slane %v3728_v44, 2 }
 0x2da   : > { %v3337_v22 = vrot.slane %v3323_v43, %v5618_v39  ;;  %v4068_v43 = vsel %vm580_vm1, %v4065_v26, %v4067_v12  ;;  %v3339_v6 = vcombine.low %v2898_v14, %v2900_v46  ;;  %v3789_v38 = vsel %vm580_vm1, %v3786_v18, %v3788_v47 }
 0x2db   : > { %v7709_v5 = vadd.f32 %v4068_v43, %v3985_v15 }
 0x2dc   : > { %v3338_v59 = vcombine.low %v3330_v58, %v3337_v22 }
 0x2de   : > { %v2571_v1 = vpop.f32.mrf.mxu1  ;;  %v3534_v27 = vsel %vm3040_vm13, %v3338_v59, 0.0 }
 0x2df   : > { %v2572_v51 = vadd.f32 %v7657_v53, %v2571_v1  ;;  %v3785_v1 = vrot.slane %v3727_v50, 2  ;;  %v4128_v62 = vmul.f32 %v6836_v31, %v3534_v27  ;;  %v7715_v60 = vmul.f32 %v6948_v2, %v3534_v27 }
 0x2e0   : > { %v5008_v54 = vpop.f32.mrf.mxu1  ;;  %v7719_v8 = vmul.f32 %v7612_v29, %v3534_v27  ;;  %v3846_v24 = vmul.f32 %v6594_v17, %v3534_v27  ;;  %v7725_v41 = vmul.f32 %v8273_v34, %v3534_v27  ;;  %v7728_v14 = vmul.f32 %v8266_v48, %v3534_v27 }
 0x2e1   : > { %v2617_v13 = vmax.f32 %v2572_v51, 0.0  ;;  %v3563_v51 = vmul.f32 %v6357_v45, %v7599_v19  ;;  %v3702_v54 = vadd.f32 %v3663_v42, %v3562_v3  ;;  %v3787_v19 = vsel %vm580_vm1, %v3785_v1, %v3786_v18 }
 0x2e2   : > { %v3347_v50 = vrot.slane %v3339_v6, %v5618_v39  ;;  %v7737_v12 = vadd.f32 %v4128_v62, %v7648_v37  ;;  %v4224_v59 = vrot.slane %v7715_v60, 1  ;;  %v4348_v15 = vrot.slane %v7719_v8, 2 }
 0x2e3   : > { %v2935_v61 = vcombine.high %v2617_v13, %v2617_v13  ;;  %v2942_v36 = vrot.slane %v2617_v13, %v5618_v39  ;;  %v3703_v9 = vadd.f32 %v3665_v63, %v3563_v51  ;;  %v3826_v22 = vadd.f32 %v3787_v19, %v3702_v54 }
 0x2e4   : > { %v3945_v46 = vrot.slane %v7725_v41, 1  ;;  %v7755_v43 = vmul.f32 %v6357_v45, %v3534_v27  ;;  %v7758_v54 = vmul.f32 %v8275_v20, %v3534_v27 }
 0x2e5   : > { %v2949_v10 = vrot.slane %v2935_v61, %v5618_v39  ;;  %v2950_v56 = vcombine.high %v2942_v36, %v2942_v36  ;;  %v3380_v11 = vcombine.low %v2934_v28, %v2942_v36  ;;  %v7732_v49 = vadd.f32 %v3789_v38, %v3703_v9 }
 0x2e6   : > { %v7744_v63 = vadd.f32 %v3846_v24, %v3826_v22 }
 0x2e7   : > { %v3381_v0 = vcombine.low %v2950_v56, %v2949_v10  ;;  %v2951_v16 = vcombine.high %v2949_v10, %v2949_v10  ;;  %v3388_v47 = vrot.slane %v3380_v11, %v5618_v39 }
 0x2e9   : > { %v2576_v52 = vpop.f32.mrf.mxu1  ;;  %v3395_v61 = vrot.slane %v3381_v0, %v5618_v39  ;;  %v3403_v21 = vrot.slane %v2951_v16, %v5618_v39  ;;  %v7761_v0 = vmul.f32 %v6337_v23, %v3534_v27 }
 0x2ea   : > { %v2577_v25 = vadd.f32 %v7657_v53, %v2576_v52 }
 0x2eb   : > { %v5011_v40 = vpop.f32.mrf.mxu1  ;;  %v7742_v42 = vcombine.low %v3388_v47, %v3395_v61  ;;  %v7750_v37 = vsel %vm3045_vm15, %v3403_v21, 0.0 }
 0x2ec   : > { %v2618_v13 = vmax.f32 %v2577_v25, 0.0  ;;  %v4069_v25 = vrot.slane %v7728_v14, 2  ;;  %v7778_v27 = vmul.f32 %v7612_v29, %v7750_v37  ;;  %v7788_v24 = vmul.f32 %v8273_v34, %v7750_v37 }
 0x2ed   : > { %v7766_v38 = vmul.f32 %v6948_v2, %v7742_v42  ;;  %v7770_v11 = vmul.f32 %v7612_v29, %v7742_v42 }
 0x2ee   : > { %v2952_v7 = vcombine.high %v2618_v13, %v2618_v13  ;;  %v2561_v58 = vpop.f32.mrf.mxu0  ;;  %v2959_v44 = vrot.slane %v2618_v13, %v5618_v39 }
 0x2ef   : > { %v2562_v26 = vadd.f32 %v7657_v53, %v2561_v58 }
 0x2f0   : > { %v2966_v33 = vrot.slane %v2952_v7, %v5618_v39  ;;  %v5002_v36 = vpop.f32.mrf.mxu0  ;;  %v2967_v18 = vcombine.high %v2959_v44, %v2959_v44  ;;  %v7774_v7 = vmul.f32 %v6948_v2, %v7750_v37 }
 0x2f1   : > { %v2615_v3 = vmax.f32 %v2562_v26, 0.0 }
 0x2f2   : > { %v2968_v10 = vcombine.high %v2966_v33, %v2966_v33  ;;  %v3404_v58 = vcombine.low %v2959_v44, %v2967_v18 }
 0x2f3   : > { %v2901_v56 = vcombine.high %v2615_v3, %v2615_v3  ;;  %v2908_v52 = vrot.slane %v2615_v3, %v5618_v39  ;;  %v7801_v3 = vmul.f32 %v8273_v34, %v7742_v42 }
 0x2f4   : > { %v3405_v13 = vcombine.low %v2966_v33, %v2968_v10  ;;  %v3666_v33 = vrot.slane %v7758_v54, 1 }
 0x2f5   : > { %v2915_v28 = vrot.slane %v2901_v56, %v5618_v39  ;;  %v2916_v40 = vcombine.high %v2908_v52, %v2908_v52  ;;  %v4230_v56 = vrot.slane %v7766_v38, 1 }
 0x2f6   : > { %v2581_v1 = vpop.f32.mrf.mxu1  ;;  %v3419_v21 = vrot.slane %v3405_v13, %v5618_v39 }
 0x2f7   : > { %v2582_v51 = vadd.f32 %v7657_v53, %v2581_v1  ;;  %v2917_v9 = vcombine.high %v2915_v28, %v2915_v28  ;;  %v3340_v6 = vcombine.low %v2908_v52, %v2916_v40  ;;  %v3362_v16 = vrot.slane %v2915_v28, %v5618_v39 }
 0x2f8   : > { %v5014_v19 = vpop.f32.mrf.mxu1  ;;  %v7813_v40 = vmul.f32 %v8266_v48, %v7742_v42 }
 0x2f9   : > { %v3354_v62 = vrot.slane %v3340_v6, %v5618_v39  ;;  %v3363_v26 = vcombine.low %v2917_v9, %v7665_v55  ;;  %v7784_v22 = vsel %vm3045_vm15, %v3362_v16, 0.0  ;;  %v2619_v61 = vmax.f32 %v2582_v51, 0.0 }
 0x2fa   : > { %v7797_v55 = vmul.f32 %v6836_v31, %v7742_v42  ;;  %v3889_v10 = vmul.f32 %v8273_v34, %v7784_v22 }
 0x2fb   : > { %v7793_v44 = vcombine.low %v3347_v50, %v3354_v62  ;;  %v3371_v47 = vrot.slane %v3363_v26, %v5618_v39  ;;  %v3412_v50 = vrot.slane %v3404_v58, %v5618_v39  ;;  %v2969_v51 = vcombine.high %v2619_v61, %v2619_v61 }
 0x2fc   : > { %v2976_v13 = vrot.slane %v2619_v61, %v5618_v39  ;;  %v3948_v62 = vrot.slane %v3889_v10, 1 }
 0x2fd   : > { %v3379_v1 = vcombine.low %v3371_v47, %v3378_v30  ;;  %v4169_v9 = vmul.f32 %v6948_v2, %v7793_v44  ;;  %v7821_v6 = vcombine.low %v3412_v50, %v3419_v21  ;;  %v4293_v16 = vmul.f32 %v7612_v29, %v7793_v44 }
 0x2fe   : > { %v4129_v19 = vmul.f32 %v6836_v31, %v7793_v44  ;;  %v2983_v57 = vrot.slane %v2969_v51, %v5618_v39  ;;  %v2984_v30 = vcombine.high %v2976_v13, %v2976_v13  ;;  %v7835_v21 = vmul.f32 %v8275_v20, %v7793_v44 }
 0x2ff   : > { %v4225_v26 = vrot.slane %v4169_v9, 1  ;;  %v7831_v61 = vsel %vm3040_vm13, %v3379_v1, 0.0  ;;  %v4349_v47 = vrot.slane %v4293_v16, 2  ;;  %v4170_v50 = vmul.f32 %v6948_v2, %v7784_v22 }
 0x300   : > { %v2985_v28 = vcombine.high %v2983_v57, %v2983_v57  ;;  %v4145_v51 = vadd.f32 %v4129_v19, %v7709_v5  ;;  %v4294_v9 = vmul.f32 %v7612_v29, %v7784_v22  ;;  %v3421_v1 = vcombine.low %v2976_v13, %v2984_v30 }
 0x301   : > { %v4226_v10 = vsel %vm439_vm0, %v4224_v59, %v4225_v26  ;;  %v4227_v36 = vrot.slane %v4170_v50, 1  ;;  %v3888_v16 = vmul.f32 %v8273_v34, %v7793_v44  ;;  %v4350_v52 = vsel %vm580_vm1, %v4348_v15, %v4349_v47 }
 0x302   : > { %v4268_v58 = vadd.f32 %v4226_v10, %v7737_v12  ;;  %v3422_v18 = vcombine.low %v2983_v57, %v2985_v28  ;;  %v4351_v60 = vrot.slane %v4294_v9, 2  ;;  %v4012_v59 = vmul.f32 %v8266_v48, %v7793_v44 }
 0x303   : > { %v4013_v5 = vmul.f32 %v8266_v48, %v7784_v22  ;;  %v4228_v13 = vsel %vm439_vm0, %v4225_v26, %v4227_v36  ;;  %v3946_v12 = vrot.slane %v3888_v16, 1  ;;  %v3667_v30 = vrot.slane %v7835_v21, 1 }
 0x304   : > { %v4392_v19 = vadd.f32 %v4350_v52, %v4268_v58  ;;  %v4269_v50 = vadd.f32 %v4228_v13, %v4145_v51  ;;  %v4352_v28 = vsel %vm580_vm1, %v4349_v47, %v4351_v60  ;;  %v4070_v57 = vrot.slane %v4012_v59, 2 }
 0x305   : > { %v3947_v15 = vsel %vm439_vm0, %v3945_v46, %v3946_v12  ;;  %v4171_v10 = vmul.f32 %v6948_v2, %v7831_v61  ;;  %v4295_v52 = vmul.f32 %v7612_v29, %v7831_v61  ;;  %v3429_v36 = vrot.slane %v3421_v1, %v5618_v39 }
 0x306   : > { %v4415_v8 = vadd.f32 %v7518_v4, %v4392_v19  ;;  %v3436_v58 = vrot.slane %v3422_v18, %v5618_v39  ;;  %v4393_v26 = vadd.f32 %v4352_v28, %v4269_v50  ;;  %v3986_v47 = vadd.f32 %v3947_v15, %v7744_v63 }
 0x307   : > { %v4071_v41 = vsel %vm580_vm1, %v4069_v25, %v4070_v57  ;;  %v4229_v9 = vrot.slane %v4171_v10, 1  ;;  %v3847_v46 = vmul.f32 %v6594_v17, %v7793_v44  ;;  %v4130_v1 = vmul.f32 %v6836_v31, %v7831_v61 }
 0x308   : > { %v4431_v51 = vmax.f32 %v4415_v8, 0.0  ;;  %v4416_v16 = vadd.f32 %v7518_v4, %v4393_v26  ;;  %v4110_v60 = vadd.f32 %v4071_v41, %v3986_v47  ;;  %v3949_v18 = vsel %vm439_vm0, %v3946_v12, %v3948_v62 }
 0x309   : > { %v4072_v59 = vrot.slane %v4013_v5, 2  ;;  %v4353_v63 = vrot.slane %v4295_v52, 2  ;;  %v3863_v14 = vadd.f32 %v3847_v46, %v7732_v49  ;;  %v3668_v25 = vsel %vm439_vm0, %v3666_v33, %v3667_v30 }
 0x30a   : > { %5048 = vmatprep.mubr.msk.f32.mxu1 %vm1442_vm8, %v4431_v51  ;;  %v7885_v19 = vcombine.low %v3429_v36, %v3436_v58  ;;  %v4432_v13 = vmax.f32 %v4416_v16, 0.0  ;;  %v4146_v50 = vadd.f32 %v4130_v1, %v4110_v60  ;;  %v3731_v28 = vmul.f32 %v6337_v23, %v7793_v44 }
 0x30b   : > { %v4231_v62 = vsel %vm439_vm0, %v4229_v9, %v4230_v56  ;;  %v3987_v5 = vadd.f32 %v3949_v18, %v3863_v14  ;;  %v3704_v49 = vadd.f32 %v3668_v25, %v7755_v43  ;;  %v3890_v12 = vmul.f32 %v8273_v34, %v7831_v61 }
 0x30c   : > { %5049 = vmatmul.mubr.msk.f32.gmra.mxu1 %vm1442_vm8, %v4432_v13  ;;  %v4270_v54 = vadd.f32 %v4231_v62, %v4146_v50  ;;  %v4073_v33 = vsel %vm580_vm1, %v4070_v57, %v4072_v59  ;;  %v3791_v8 = vrot.slane %v3731_v28, 2  ;;  %v4014_v15 = vmul.f32 %v8266_v48, %v7831_v61 }
 0x30d   : > { %v3608_v10 = vmul.f32 %v8275_v20, %v7784_v22  ;;  %v8276_v52 = vrot.slane %v7770_v11, 2  ;;  %v4111_v43 = vadd.f32 %v4073_v33, %v3987_v5  ;;  %v4075_v58 = vrot.slane %v7813_v40, 2 }
 0x30e   : > { %v8277_v47 = vrot.slane %v7774_v7, 1  ;;  %v8278_v51 = vrot.slane %v7761_v0, 2  ;;  %v3950_v9 = vrot.slane %v3890_v12, 1  ;;  %v7916_v46 = vsel %vm3040_vm13, %v7821_v6, 0.0 }
 0x30f   : > { %v4355_v36 = vsel %vm580_vm1, %v4353_v63, %v8276_v52  ;;  %v4147_v16 = vadd.f32 %v7797_v55, %v4111_v43  ;;  %v3848_v7 = vmul.f32 %v6594_v17, %v7831_v61  ;;  %v8280_v0 = vmov %v8276_v52 }
 0x310   : > { %v4394_v26 = vadd.f32 %v4355_v36, %v4270_v54  ;;  %v4233_v57 = vsel %vm439_vm0, %v4230_v56, %v8277_v47  ;;  %v3792_v41 = vsel %vm580_vm1, %v8278_v51, %v3791_v8  ;;  %v8279_v56 = vrot.slane %v7778_v27, 2 }
 0x311   : > { %v3828_v60 = vadd.f32 %v3792_v41, %v3704_v49  ;;  %v4074_v18 = vrot.slane %v4014_v15, 2  ;;  %v7929_v59 = vmul.f32 %v6948_v2, %v7885_v19  ;;  %v3669_v6 = vrot.slane %v3608_v10, 1 }
 0x312   : > { %v4417_v38 = vadd.f32 %v7518_v4, %v4394_v26  ;;  %v4357_v1 = vsel %vm580_vm1, %v8280_v0, %v8279_v56  ;;  %v3732_v55 = vmul.f32 %v6337_v23, %v7784_v22  ;;  %v4271_v63 = vadd.f32 %v4233_v57, %v4147_v16 }
 0x313   : > { %v3864_v14 = vadd.f32 %v3848_v7, %v3828_v60  ;;  %v8281_v13 = vrot.slane %v7801_v3, 1  ;;  %v4174_v11 = vmul.f32 %v6948_v2, %v7916_v46  ;;  %v7940_v50 = vmul.f32 %v7612_v29, %v7885_v19 }
 0x314   : > { %v4433_v25 = vmax.f32 %v4417_v38, 0.0  ;;  %v4016_v28 = vmul.f32 %v8266_v48, %v7750_v37  ;;  %v3670_v22 = vsel %vm439_vm0, %v3667_v30, %v3669_v6  ;;  %v4395_v62 = vadd.f32 %v4357_v1, %v4271_v63 }
 0x315   : > { %v3952_v27 = vsel %vm439_vm0, %v3950_v9, %v8281_v13  ;;  %v4076_v49 = vsel %vm580_vm1, %v4074_v18, %v4075_v58  ;;  %v4235_v12 = vrot.slane %v7929_v59, 1  ;;  %v4298_v54 = vmul.f32 %v7612_v29, %v7916_v46 }
 0x316   : > { %v3988_v5 = vadd.f32 %v3952_v27, %v3864_v14  ;;  %5051 = vmatprep.mubr.msk.f32.mxu1 %vm1442_vm8, %v4433_v25  ;;  %v3565_v33 = vmul.f32 %v6357_v45, %v7793_v44  ;;  %v3793_v15 = vrot.slane %v3732_v55, 2  ;;  %v4418_v21 = vadd.f32 %v7518_v4, %v4395_v62 }
 0x317   : > { %v4132_v10 = vmul.f32 %v6836_v31, %v7916_v46  ;;  %v3953_v52 = vrot.slane %v7788_v24, 1  ;;  %v4234_v36 = vrot.slane %v4174_v11, 1  ;;  %v4359_v43 = vrot.slane %v7940_v50, 2 }
 0x318   : > { %v4112_v30 = vadd.f32 %v4076_v49, %v3988_v5  ;;  %v3705_v26 = vadd.f32 %v3670_v22, %v3565_v33  ;;  %v4434_v47 = vmax.f32 %v4418_v21, 0.0  ;;  %v3794_v41 = vsel %vm580_vm1, %v3791_v8, %v3793_v15 }
 0x319   : > { %v3849_v44 = vmul.f32 %v6594_v17, %v7742_v42  ;;  %v4236_v9 = vsel %vm439_vm0, %v4234_v36, %v4235_v12  ;;  %v4358_v16 = vrot.slane %v4298_v54, 2  ;;  %v4077_v1 = vrot.slane %v4016_v28, 2 }
 0x31a   : > { %v4148_v57 = vadd.f32 %v4132_v10, %v4112_v30  ;;  %v2586_v51 = vpop.f32.mrf.mxu1  ;;  %v3829_v60 = vadd.f32 %v3794_v41, %v3705_v26  ;;  %5052 = vmatmul.mubr.msk.f32.gmra.mxu1 %vm1442_vm8, %v4434_v47  ;;  %v8282_v6 = vmov %v8281_v13  ;;  %v3611_v11 = vmul.f32 %v8275_v20, %v7750_v37 }
 0x31b   : > { %v2587_v24 = vadd.f32 %v7657_v53, %v2586_v51  ;;  %v4360_v56 = vsel %vm580_vm1, %v4358_v16, %v4359_v43  ;;  %v3954_v55 = vsel %vm439_vm0, %v8282_v6, %v3953_v52  ;;  %v3610_v3 = vmul.f32 %v8275_v20, %v7742_v42 }
 0x31c   : > { %v4272_v7 = vadd.f32 %v4236_v9, %v4148_v57  ;;  %v5017_v38 = vpop.f32.mrf.mxu1  ;;  %v3865_v0 = vadd.f32 %v3849_v44, %v3829_v60  ;;  %v4078_v22 = vsel %vm580_vm1, %v4075_v58, %v4077_v1  ;;  %v3609_v49 = vmul.f32 %v8275_v20, %v7831_v61 }
 0x31d   : > { %v2620_v8 = vmax.f32 %v2587_v24, 0.0  ;;  %v3735_v58 = vmul.f32 %v6337_v23, %v7750_v37  ;;  %v4133_v21 = vmul.f32 %v6836_v31, %v7885_v19  ;;  %v3674_v30 = vrot.slane %v3611_v11, 1 }
 0x31e   : > { %v4396_v18 = vadd.f32 %v4360_v56, %v4272_v7  ;;  %v3989_v14 = vadd.f32 %v3954_v55, %v3865_v0  ;;  %v3672_v10 = vrot.slane %v3610_v3, 1  ;;  %v3734_v47 = vmul.f32 %v6337_v23, %v7742_v42 }
 0x31f   : > { %v2993_v63 = vrot.slane %v2620_v8, %v5618_v39  ;;  %v2986_v13 = vcombine.high %v2620_v8, %v2620_v8  ;;  %v3671_v51 = vrot.slane %v3609_v49, 1  ;;  %v3733_v60 = vmul.f32 %v6337_v23, %v7831_v61 }
 0x320   : > { %v4419_v25 = vadd.f32 %v7518_v4, %v4396_v18  ;;  %v4113_v5 = vadd.f32 %v4078_v22, %v3989_v14  ;;  %v3798_v7 = vrot.slane %v3735_v58, 2  ;;  %v3567_v38 = vmul.f32 %v6357_v45, %v7742_v42 }
 0x321   : > { %v3444_v27 = vrot.slane %v2993_v63, %v5618_v39  ;;  %v3000_v15 = vrot.slane %v2986_v13, %v5618_v39  ;;  %v3001_v41 = vcombine.high %v2993_v63, %v2993_v63  ;;  %v3675_v56 = vsel %vm439_vm0, %v3672_v10, %v3674_v30 }
 0x322   : > { %v4435_v28 = vmax.f32 %v4419_v25, 0.0  ;;  %v4149_v37 = vadd.f32 %v4133_v21, %v4113_v5  ;;  %v3673_v1 = vsel %vm439_vm0, %v3671_v51, %v3672_v10  ;;  %v3038_v6 = vstv %s8016_s14 }
 0x323   : > { %v7992_v62 = vsel %vm3045_vm15, %v3444_v27, 0.0  ;;  %v3002_v9 = vcombine.high %v3000_v15, %v3000_v15  ;;  %v3445_v18 = vcombine.low %v3001_v41, %v3000_v15  ;;  %v3566_v42 = vmul.f32 %v6357_v45, %v7831_v61 }
 0x324   : > { %5054 = vmatprep.mubr.msk.f32.mxu1 %vm1442_vm8, %v4435_v28  ;;  %v4176_v54 = vmul.f32 %v6948_v2, %v7992_v62  ;;  %v4300_v40 = vmul.f32 %v7612_v29, %v7992_v62  ;;  %v2591_v33 = vpop.f32.mrf.mxu1  ;;  %v3707_v55 = vadd.f32 %v3675_v56, %v3567_v38  ;;  %v3895_v50 = vmul.f32 %v8273_v34, %v7992_v62 }
 0x325   : > { %v2592_v20 = vadd.f32 %v7657_v53, %v2591_v33  ;;  %v3795_v63 = vrot.slane %v3733_v60, 2  ;;  %v3894_v14 = vmul.f32 %v8273_v34, %v7885_v19  ;;  %v3706_v13 = vadd.f32 %v3673_v1, %v3566_v42  ;;  %v4648_v42 = vld [vmem:[%s8063_s13 + $0x18] sm:$0xff] }
 0x326   : > { %v4237_v52 = vrot.slane %v4176_v54, 1  ;;  %v4361_v36 = vrot.slane %v4300_v40, 2  ;;  %v5020_v26 = vpop.f32.mrf.mxu1  ;;  %v3893_v27 = vmul.f32 %v8273_v34, %v7916_v46  ;;  %vm8048_vm2 = vcmp.eq.s32.totalorder %v3038_v6, 1 }
 0x327   : > { %v2621_v57 = vmax.f32 %v2592_v20, 0.0  ;;  %v3851_v28 = vmul.f32 %v6594_v17, %v7885_v19  ;;  %v3958_v54 = vrot.slane %v3895_v50, 1  ;;  %v3956_v33 = vrot.slane %v3894_v14, 1  ;;  %vm3055_vm4 = vmand %vm8048_vm2, %vm3040_vm13 }
 0x328   : > { %v4238_v44 = vsel %vm439_vm0, %v4235_v12, %v4237_v52  ;;  %v4362_v59 = vsel %vm580_vm1, %v4359_v43, %v4361_v36  ;;  %v3796_v12 = vrot.slane %v3734_v47, 2  ;;  %v4019_v58 = vmul.f32 %v8266_v48, %v7992_v62  ;;  %vm3057_vm5 = vmand %vm8048_vm2, %vm3045_vm15 }
 0x329   : > { %v3010_v16 = vrot.slane %v2621_v57, %v5618_v39  ;;  %v4273_v24 = vadd.f32 %v4238_v44, %v4149_v37  ;;  %v3003_v23 = vcombine.high %v2621_v57, %v2621_v57  ;;  %v3850_v30 = vmul.f32 %v6594_v17, %v7916_v46  ;;  %v4646_v37 = vld [vmem:[%s8063_s13 + $0x8] sm:$0xff] }
 0x32a   : > { %v3799_v45 = vsel %vm580_vm1, %v3796_v12, %v3798_v7  ;;  %v3797_v40 = vsel %vm580_vm1, %v3795_v63, %v3796_v12  ;;  %v4017_v10 = vmul.f32 %v8266_v48, %v7916_v46  ;;  %v3955_v52 = vrot.slane %v3893_v27, 1  ;;  %v4647_v63 = vld [vmem:[%s8063_s13 + $0x10] sm:$0xff] }
 0x32b   : > { %v3446_v8 = vcombine.low %v3002_v9, %v3010_v16  ;;  %v4397_v0 = vadd.f32 %v4362_v59, %v4273_v24  ;;  %v3017_v3 = vrot.slane %v3003_v23, %v5618_v39  ;;  %v3018_v22 = vcombine.high %v3010_v16, %v3010_v16  ;;  %v4645_v16 = vld [vmem:[%s8063_s13] sm:$0xff] }
 0x32c   : > { %v3831_v49 = vadd.f32 %v3799_v45, %v3707_v55  ;;  %v3830_v21 = vadd.f32 %v3797_v40, %v3706_v13  ;;  %v4018_v26 = vmul.f32 %v8266_v48, %v7885_v19  ;;  %v3959_v17 = vsel %vm439_vm0, %v3956_v33, %v3958_v54 }
 0x32d   : > { %v4420_v43 = vadd.f32 %v7518_v4, %v4397_v0  ;;  %v3460_v25 = vrot.slane %v3446_v8, %v5618_v39  ;;  %v3453_v4 = vrot.slane %v3445_v18, %v5618_v39  ;;  %v3462_v47 = vcombine.low %v3018_v22, %v3017_v3 }
 0x32e   : > { %v3867_v36 = vadd.f32 %v3851_v28, %v3831_v49  ;;  %v3019_v51 = vcombine.high %v3017_v3, %v3017_v3  ;;  %v4082_v41 = vrot.slane %v4019_v58, 2  ;;  %v3866_v24 = vadd.f32 %v3850_v30, %v3830_v21 }
 0x32f   : > { %v4436_v11 = vmax.f32 %v4420_v43, 0.0  ;;  %v3461_v15 = vcombine.low %v3453_v4, %v3460_v25  ;;  %v3957_v60 = vsel %vm439_vm0, %v3955_v52, %v3956_v33  ;;  %v4079_v56 = vrot.slane %v4017_v10, 2 }
 0x330   : > { %v2596_v5 = vpop.f32.mrf.mxu1  ;;  %v3991_v59 = vadd.f32 %v3959_v17, %v3867_v36  ;;  %v4080_v12 = vrot.slane %v4018_v26, 2  ;;  %v3470_v8 = vrot.slane %v3462_v47, %v5618_v39  ;;  %v3990_v14 = vadd.f32 %v3957_v60, %v3866_v24  ;;  %v4649_v17 = vld [vmem:[%s8063_s13 + $0x20] sm:$0xff] }
 0x331   : > { %v2597_v34 = vadd.f32 %v7657_v53, %v2596_v5  ;;  %5055 = vmatmul.mubr.msk.f32.gmra.mxu1 %vm1442_vm8, %v4436_v11  ;;  %v8071_v53 = vld [vmem:[%s8207_s7] ss:$0 sm:$0xff]  ;;  %v3543_v44 = vsel %vm3055_vm4, %v3461_v15, 0.0 }
 0x332   : > { %v5023_v20 = vpop.f32.mrf.mxu1  ;;  %v4083_v35 = vsel %vm580_vm1, %v4080_v12, %v4082_v41  ;;  %v4177_v55 = vmul.f32 %v6948_v2, %v3543_v44  ;;  %v4081_v4 = vsel %vm580_vm1, %v4079_v56, %v4080_v12  ;;  %v4134_v3 = vmul.f32 %v6836_v31, %v3543_v44 }
 0x333   : > { %v2622_v62 = vmax.f32 %v2597_v34, 0.0  ;;  %v4115_v28 = vadd.f32 %v4083_v35, %v3991_v59  ;;  %v4301_v22 = vmul.f32 %v7612_v29, %v3543_v44  ;;  %v4114_v21 = vadd.f32 %v4081_v4, %v3990_v14 }
 0x334   : > { %v5038_v57 = vpop.f32.mrf.mxu1  ;;  %v4239_v58 = vrot.slane %v4177_v55, 1 }
 0x335   : > { %v3026_v46 = vrot.slane %v2622_v62, %v5618_v39  ;;  %v4572_v32 = vadd.f32 %v5038_v57, %v8071_v53  ;;  %v4363_v52 = vrot.slane %v4301_v22, 2  ;;  %v4150_v36 = vadd.f32 %v4134_v3, %v4114_v21  ;;  %v4656_v3 = vld [vmem:[%s8063_s13 + $0x58] sm:$0xff] }
 0x336   : > { %v4566_v9 = vpop.f32.mrf.mxu1 }
 0x337   : > { %v3027_v48 = vcombine.high %v3026_v46, %v3026_v46  ;;  %v3463_v19 = vcombine.low %v3019_v51, %v3026_v46  ;;  %v4662_v7 = vadd.f32 %v4646_v37, %v4572_v32  ;;  %v4567_v38 = vadd.f32 %v8071_v53, %v4566_v9 }
 0x338   : > { %v5041_v0 = vpop.f32.mrf.mxu1 }
 0x339   : > { %v3477_v1 = vrot.slane %v3463_v19, %v5618_v39  ;;  %v3485_v18 = vrot.slane %v3027_v48, %v5618_v39  ;;  %v4678_v23 = vmax.f32 %v4662_v7, 0.0  ;;  %v4661_v6 = vadd.f32 %v4645_v16, %v4567_v38  ;;  %v5149_v19 = vld [vmem:[%s8205_s5] ss:$0 sm:$0xff] }
 0x33a   : > { %v4582_v50 = vadd.f32 %v5041_v0, %v8071_v53  ;;  %v4576_v43 = vpop.f32.mrf.mxu1  ;;  %v4652_v0 = vld [vmem:[%s8063_s13 + $0x38] sm:$0xff] }
 0x33b   : > { %v3478_v25 = vcombine.low %v3470_v8, %v3477_v1  ;;  %v3545_v13 = vsel %vm3057_vm5, %v3485_v18, 0.0  ;;  %4694 = vst.msk [vmem:[%s8100_s20 + $0x8] sm:$0xff] %vm1287_vm3, %v4678_v23  ;;  %v4677_v27 = vmax.f32 %v4661_v6, 0.0  ;;  %v4577_v39 = vadd.f32 %v8071_v53, %v4576_v43  ;;  %v4651_v23 = vld [vmem:[%s8063_s13 + $0x30] sm:$0xff] }
 0x33c   : > { %v4179_v45 = vmul.f32 %v6948_v2, %v3545_v13  ;;  %v4664_v11 = vadd.f32 %v4648_v42, %v4582_v50  ;;  %v4303_v33 = vmul.f32 %v7612_v29, %v3545_v13  ;;  %v4653_v13 = vld [vmem:[%s8063_s13 + $0x40] sm:$0xff] }
 0x33d   : > { %v3544_v5 = vsel %vm8048_vm2, %v3478_v25, 0.0  ;;  %4693 = vst.msk [vmem:[%s8100_s20] sm:$0xff] %vm1287_vm3, %v4677_v27  ;;  %v4663_v49 = vadd.f32 %v4647_v63, %v4577_v39  ;;  %v4654_v63 = vld [vmem:[%s8063_s13 + $0x48] sm:$0xff] }
 0x33e   : > { %v4135_v54 = vmul.f32 %v6836_v31, %v3544_v5  ;;  %v4178_v34 = vmul.f32 %v6948_v2, %v3544_v5  ;;  %v4302_v40 = vmul.f32 %v7612_v29, %v3544_v5  ;;  %v4680_v15 = vmax.f32 %v4664_v11, 0.0  ;;  %v4650_v2 = vld [vmem:[%s8063_s13 + $0x28] sm:$0xff] }
 0x33f   : > { %v4679_v20 = vmax.f32 %v4663_v49, 0.0  ;;  %v4242_v30 = vrot.slane %v4179_v45, 1  ;;  %v4366_v26 = vrot.slane %v4303_v33, 2  ;;  %v4655_v49 = vld [vmem:[%s8063_s13 + $0x50] sm:$0xff] }
 0x340   : > { %v4240_v61 = vrot.slane %v4178_v34, 1  ;;  %v4364_v10 = vrot.slane %v4302_v40, 2  ;;  %v4151_v62 = vadd.f32 %v4135_v54, %v4115_v28  ;;  %4696 = vst.msk [vmem:[%s8100_s20 + $0x18] sm:$0xff] %vm1287_vm3, %v4680_v15 }
 0x341   : > { %4695 = vst.msk [vmem:[%s8100_s20 + $0x10] sm:$0xff] %vm1287_vm3, %v4679_v20  ;;  %v5044_v31 = vpop.f32.mrf.mxu1  ;;  %v4658_v20 = vld [vmem:[%s8063_s13 + $0x68] sm:$0xff] }
 0x342   : > { %v4592_v29 = vadd.f32 %v5044_v31, %v8071_v53  ;;  %v4241_v47 = vsel %vm439_vm0, %v4239_v58, %v4240_v61  ;;  %v4243_v57 = vsel %vm439_vm0, %v4240_v61, %v4242_v30  ;;  %v4365_v44 = vsel %vm580_vm1, %v4363_v52, %v4364_v10  ;;  %v4657_v30 = vld [vmem:[%s8063_s13 + $0x60] sm:$0xff] }
 0x343   : > { %v4586_v37 = vpop.f32.mrf.mxu1  ;;  %v4274_v51 = vadd.f32 %v4241_v47, %v4150_v36  ;;  %v4275_v46 = vadd.f32 %v4243_v57, %v4151_v62  ;;  %v4367_v9 = vsel %vm580_vm1, %v4364_v10, %v4366_v26  ;;  %v4660_v26 = vld [vmem:[%s8063_s13 + $0x78] sm:$0xff]  ;;  %v4659_v57 = vld [vmem:[%s8063_s13 + $0x70] sm:$0xff] }
 0x344   : > { %v4666_v32 = vadd.f32 %v4650_v2, %v4592_v29  ;;  %v4587_v41 = vadd.f32 %v8071_v53, %v4586_v37 }
 0x345   : > { %v4398_v16 = vadd.f32 %v4365_v44, %v4274_v51  ;;  %v4399_v24 = vadd.f32 %v4367_v9, %v4275_v46 }
 0x346   : > { %v4682_v60 = vmax.f32 %v4666_v32, 0.0  ;;  %v4665_v48 = vadd.f32 %v4649_v17, %v4587_v41 }
 0x347   : > { %v4421_v7 = vadd.f32 %v5149_v19, %v4398_v16  ;;  %v4422_v38 = vadd.f32 %v5149_v19, %v4399_v24 }
 0x348   : > { %4698 = vst.msk [vmem:[%s8100_s20 + $0x28] sm:$0xff] %vm1287_vm3, %v4682_v60  ;;  %v4681_v56 = vmax.f32 %v4665_v48, 0.0 }
 0x349   : > { %v4437_v59 = vmax.f32 %v4421_v7, 0.0  ;;  %v4438_v12 = vmax.f32 %v4422_v38, 0.0 }
 0x34a   : > { %4697 = vst.msk [vmem:[%s8100_s20 + $0x20] sm:$0xff] %vm1287_vm3, %v4681_v56 }
 0x34b   : > { %5057 = vmatprep.mubr.msk.f32.mxu1 %vm1442_vm8, %v4437_v59 }
 0x34c   : > { %5058 = vmatmul.mubr.msk.f32.gmra.mxu1 %vm1442_vm8, %v4438_v12 }
 0x394   : > { %v5047_v8 = vpop.f32.mrf.mxu1 }
 0x395   : > { %v4602_v1 = vadd.f32 %v5047_v8, %v8071_v53 }
 0x396   : > { %v4596_v18 = vpop.f32.mrf.mxu1 }
 0x397   : > { %v4668_v6 = vadd.f32 %v4652_v0, %v4602_v1  ;;  %v4597_v42 = vadd.f32 %v8071_v53, %v4596_v18 }
 0x399   : > { %v4684_v35 = vmax.f32 %v4668_v6, 0.0  ;;  %v4667_v55 = vadd.f32 %v4651_v23, %v4597_v42 }
 0x39b   : > { %4700 = vst.msk [vmem:[%s8100_s20 + $0x38] sm:$0xff] %vm1287_vm3, %v4684_v35  ;;  %v4683_v50 = vmax.f32 %v4667_v55, 0.0 }
 0x39d   : > { %4699 = vst.msk [vmem:[%s8100_s20 + $0x30] sm:$0xff] %vm1287_vm3, %v4683_v50 }
 0x3cc   : > { %v5050_v43 = vpop.f32.mrf.mxu1 }
 0x3cd   : > { %v4612_v14 = vadd.f32 %v5050_v43, %v8071_v53 }
 0x3ce   : > { %v4606_v25 = vpop.f32.mrf.mxu1 }
 0x3cf   : > { %v4670_v27 = vadd.f32 %v4654_v63, %v4612_v14  ;;  %v4607_v39 = vadd.f32 %v8071_v53, %v4606_v25 }
 0x3d1   : > { %v4686_v45 = vmax.f32 %v4670_v27, 0.0  ;;  %v4669_v11 = vadd.f32 %v4653_v13, %v4607_v39 }
 0x3d3   : > { %4702 = vst.msk [vmem:[%s8100_s20 + $0x48] sm:$0xff] %vm1287_vm3, %v4686_v45  ;;  %v4685_v4 = vmax.f32 %v4669_v11, 0.0 }
 0x3d5   : > { %4701 = vst.msk [vmem:[%s8100_s20 + $0x40] sm:$0xff] %vm1287_vm3, %v4685_v4 }
 0x3da   : > { %v5053_v28 = vpop.f32.mrf.mxu1 }
 0x3db   : > { %v4622_v22 = vadd.f32 %v5053_v28, %v8071_v53 }
 0x3dc   : > { %v4616_v5 = vpop.f32.mrf.mxu1 }
 0x3dd   : > { %v4672_v54 = vadd.f32 %v4656_v3, %v4622_v22  ;;  %v4617_v34 = vadd.f32 %v8071_v53, %v4616_v5 }
 0x3df   : > { %v4688_v40 = vmax.f32 %v4672_v54, 0.0  ;;  %v4671_v33 = vadd.f32 %v4655_v49, %v4617_v34 }
 0x3e1   : > { %4704 = vst.msk [vmem:[%s8100_s20 + $0x58] sm:$0xff] %vm1287_vm3, %v4688_v40  ;;  %v4687_v58 = vmax.f32 %v4671_v33, 0.0 }
 0x3e3   : > { %4703 = vst.msk [vmem:[%s8100_s20 + $0x50] sm:$0xff] %vm1287_vm3, %v4687_v58 }
 0x3f1   : > { %v5056_v15 = vpop.f32.mrf.mxu1 }
 0x3f2   : > { %v4632_v21 = vadd.f32 %v5056_v15, %v8071_v53 }
 0x3f3   : > { %v4626_v61 = vpop.f32.mrf.mxu1 }
 0x3f4   : > { %v4674_v10 = vadd.f32 %v4658_v20, %v4632_v21  ;;  %v4627_v62 = vadd.f32 %v8071_v53, %v4626_v61 }
 0x3f6   : > { %v4690_v52 = vmax.f32 %v4674_v10, 0.0  ;;  %v4673_v31 = vadd.f32 %v4657_v30, %v4627_v62 }
 0x3f8   : > { %4706 = vst.msk [vmem:[%s8100_s20 + $0x68] sm:$0xff] %vm1287_vm3, %v4690_v52  ;;  %v4689_v2 = vmax.f32 %v4673_v31, 0.0 }
 0x3fa   : > { %4705 = vst.msk [vmem:[%s8100_s20 + $0x60] sm:$0xff] %vm1287_vm3, %v4689_v2 }
 0x40c   : > { %v5059_v36 = vpop.f32.mrf.mxu1 }
 0x40d   : > { %v4642_v29 = vadd.f32 %v5059_v36, %v8071_v53 }
 0x40e   : > { %v4636_v47 = vpop.f32.mrf.mxu1 }
 0x40f   : > { %v4676_v37 = vadd.f32 %v4660_v26, %v4642_v29  ;;  %v4637_v17 = vadd.f32 %v8071_v53, %v4636_v47 }
 0x411   : > { %v4692_v51 = vmax.f32 %v4676_v37, 0.0  ;;  %v4675_v46 = vadd.f32 %v4659_v57, %v4637_v17 }
 0x413   : > { %4708 = vst.msk [vmem:[%s8100_s20 + $0x78] sm:$0xff] %vm1287_vm3, %v4692_v51  ;;  %v4691_v32 = vmax.f32 %v4675_v46, 0.0 }
 0x415   : > { %4707 = vst.msk [vmem:[%s8100_s20 + $0x70] sm:$0xff] %vm1287_vm3, %v4691_v32 }
 0x416 PF: > { %s18_s9 = sadd.s32 1, %s5188_s9   ;;  %s8286_s27 = smov %s5180_s29 }
 0x417   : > { %p15_p9 = scmp.ge.s32.totalorder %s18_s9, 6   ;;  %s8287_s28 = smov %s5184_s30 }
 0x418   : > { %s8288_s29 = smov %s8291_s10  ;;  %s8289_s30 = smov %s8295_s11 }
 0x419   :  { %17 = sbr.rel (!%p15_p9) target bundleno = 3 (0x3), region = 86 }

</bundles_post_ra>
